<compile_context>
chip_gen: v7x
topology: tpu7x:2x2x1
jax: 0.10.0
libtpu: 0.0.40
codegen_flags: <defaults>
</compile_context>

<pallas_src>
import functools

import jax
import jax.numpy as jnp
from jax.experimental import pallas as pl
from jax.experimental.pallas import tpu as pltpu

EPS = 1e-5
LANE = 128        # FC feature dims / folded conv layouts use full 128 lanes
NEG = -1e30       # "minus infinity" for masking padded logits
VMEM_LIMIT = 32 * 1024 * 1024


def _vmem_spec():
    return pl.BlockSpec(memory_space=pltpu.MemorySpace.VMEM)


# ----------------------------------------------------------------------------
# Conv stage, pass 1: one merged matmul of the 4 pool-tap im2col patches,
# write the pre-BN conv result (bf16) + per-tile BN partial statistics.
# ----------------------------------------------------------------------------

def conv_stats_kernel(x_ref, w_ref, conv_ref, stats_ref):
    # x_ref:    (4, tw, K)  bf16 im2col patches (tap-major)
    # w_ref:    (K, C)      bf16 quantized conv weights
    # conv_ref: (4, tw, C)  bf16 pre-BN conv result (cached for pass 2)
    # stats_ref:(1, 2, C)   f32  per-tile (sum, sumsq) partials
    nt, tw, k = x_ref.shape
    y = jnp.dot(x_ref[...].reshape(nt * tw, k), w_ref[...],
                preferred_element_type=jnp.float32)          # one long MXU burst
    s = jnp.sum(y, axis=0, keepdims=True)
    ss = jnp.sum(y * y, axis=0, keepdims=True)
    stats_ref[...] = jnp.concatenate([s, ss], axis=0).reshape(1, 2, -1)
    conv_ref[...] = y.astype(jnp.bfloat16).reshape(nt, tw, -1)


# ----------------------------------------------------------------------------
# Conv stage, pass 2: BN affine (precomputed global scale/shift) -> tanh ->
# 2x2 max over the 4 pool taps.  Operates on the lane-dense view of the conv
# result (8 windows x 16 channels folded into 128 lanes), so loads, EUP tanh,
# maxes and the output store all use full-lane vregs / unmasked vst.
# ----------------------------------------------------------------------------

def conv_apply_kernel(conv_ref, scale_ref, shift_ref, o_ref):
    # conv_ref: (4, tr, 128) bf16   scale/shift: (1, 128) f32   o_ref: (tr, 128) bf16
    scale = scale_ref[...]
    shift = shift_ref[...]

    def tap(t):
        return jnp.tanh(conv_ref[t].astype(jnp.float32) * scale + shift)

    pooled = jnp.maximum(jnp.maximum(tap(0), tap(1)),
                         jnp.maximum(tap(2), tap(3)))
    o_ref[...] = pooled.astype(o_ref.dtype)


def conv_bn_tanh_pool(x_nhwc, w_mat, gamma, beta, *, tile_windows=1024):
    """Fused 3x3 conv (pad 1, no bias) -> BN(batch stats) -> tanh -> 2x2 maxpool.

    x_nhwc : (B, H, W, Cin) activations, w_mat : (9*Cin, Cout) bf16 weights.
    Returns (B, H//2, W//2, Cout) in bf16.
    """
    B, H, W, Cin = x_nhwc.shape
    K, Cout = w_mat.shape
    Hp, Wp = H // 2, W // 2
    NW = B * Hp * Wp          # number of 2x2 pooling windows
    M = B * H * W             # rows the BatchNorm statistics run over (= 4*NW)

    # im2col patches grouped by pooling-window tap: taps[t, win, :] holds the
    # 9*Cin features of conv-output pixel (2*ph + t//2, 2*pw + t%2).
    # TODO(synk): this still materializes the 9x im2col slab in HBM; a direct
    # NHWC halo-window kernel would cut pass-1 input traffic ~9x.
    # TODO(synk): conv1 (K=9, Cin=1) still lane-pads 9->128 in VMEM; a
    # block-diagonal (36, 64) weight or a 9-FMA VPU path would fix its
    # degenerate MXU/DMA shapes.
    xp = jnp.pad(x_nhwc, ((0, 0), (1, 1), (1, 1), (0, 0)))
    tap_slabs = []
    for i in range(2):
        for j in range(2):
            feats = [xp[:, i + dy:i + dy + H:2, j + dx:j + dx + W:2, :]
                     for dy in range(3) for dx in range(3)]
            tap_slabs.append(jnp.concatenate(feats, axis=-1).reshape(NW, K))
    taps = jnp.stack(tap_slabs, axis=0).astype(jnp.bfloat16)      # (4, NW, K)

    # Window tiling (multiple of 16 for bf16 sublane packing). Zero-padded
    # windows contribute exactly 0 to sum/sumsq (conv has no bias) and the
    # corresponding output rows are sliced off below, so stats stay exact.
    tw = min(tile_windows, ((NW + 15) // 16) * 16)
    nw_pad = pl.cdiv(NW, tw) * tw
    if nw_pad != NW:
        taps = jnp.pad(taps, ((0, 0), (0, nw_pad - NW), (0, 0)))
    ntiles = nw_pad // tw
    grid = (ntiles,)

    pat_spec = pl.BlockSpec((4, tw, K), lambda i: (0, i, 0))
    w_spec = pl.BlockSpec((K, Cout), lambda i: (0, 0))

    # ---- pass 1: conv matmul + cached pre-BN result + per-tile BN partials ----
    conv_pre, stats = pl.pallas_call(
        conv_stats_kernel,
        grid=grid,
        in_specs=[pat_spec, w_spec],
        out_specs=(pl.BlockSpec((4, tw, Cout), lambda i: (0, i, 0)),
                   pl.BlockSpec((1, 2, Cout), lambda i: (i, 0, 0))),
        out_shape=(jax.ShapeDtypeStruct((4, nw_pad, Cout), jnp.bfloat16),
                   jax.ShapeDtypeStruct((ntiles, 2, Cout), jnp.float32)),
        compiler_params=pltpu.CompilerParams(
            dimension_semantics=("parallel",), vmem_limit_bytes=VMEM_LIMIT),
    )(taps, w_mat)

    # ---- BN scale/shift hoisted to JAX (exact full-batch statistics) ----
    tot = stats.sum(axis=0)                                       # (2, Cout)
    mean = tot[0] / M
    var = jnp.maximum(tot[1] / M - mean * mean, 0.0)              # biased var
    scale = gamma.astype(jnp.float32) * jax.lax.rsqrt(var + EPS)
    shift = beta.astype(jnp.float32) - mean * scale

    # Lane-dense views: fold 8 consecutive windows x Cout channels into 128
    # lanes.  Contiguous row-major reshapes -> free (no data movement).
    fold = LANE // Cout                                           # 8
    conv_dense = conv_pre.reshape(4, nw_pad // fold, LANE)
    scale_l = jnp.tile(scale, fold).reshape(1, LANE)              # lane % 16 = channel
    shift_l = jnp.tile(shift, fold).reshape(1, LANE)
    tr = tw // fold

    # ---- pass 2: BN affine -> tanh -> pool, tiles independent -> "parallel" ----
    pooled = pl.pallas_call(
        conv_apply_kernel,
        grid=grid,
        in_specs=[pl.BlockSpec((4, tr, LANE), lambda i: (0, i, 0)),
                  pl.BlockSpec((1, LANE), lambda i: (0, 0)),
                  pl.BlockSpec((1, LANE), lambda i: (0, 0))],
        out_specs=pl.BlockSpec((tr, LANE), lambda i: (i, 0)),
        out_shape=jax.ShapeDtypeStruct((nw_pad // fold, LANE), jnp.bfloat16),
        compiler_params=pltpu.CompilerParams(
            dimension_semantics=("parallel",), vmem_limit_bytes=VMEM_LIMIT),
    )(conv_dense, scale_l, shift_l)

    # Unfold (free reshape), drop padded windows, restore NHWC.
    return pooled.reshape(nw_pad, Cout)[:NW].reshape(B, Hp, Wp, Cout)


# ----------------------------------------------------------------------------
# Fully-connected head: fc1 -> bn3 -> tanh -> fc2 -> bn4 -> logsoftmax,
# fused in one kernel with all feature dims padded to 128 lanes.
# TODO(synk): single un-gridded block; tile over the batch (two-pass BN stats)
# if B grows beyond a few thousand rows.
# ----------------------------------------------------------------------------

def fc_head_kernel(x_ref, w1_ref, b1_ref, g1_ref, be1_ref,
                   w2_ref, b2_ref, g2_ref, be2_ref, o_ref, *, n_classes):
    # fc1 -> bn3 -> tanh  (padded fc1 columns come out exactly 0)
    y1 = jnp.dot(x_ref[...], w1_ref[...],
                 preferred_element_type=jnp.float32) + b1_ref[...]
    m1 = jnp.mean(y1, axis=0, keepdims=True)
    v1 = jnp.mean(jnp.square(y1 - m1), axis=0, keepdims=True)      # biased var
    h1 = jnp.tanh(g1_ref[...] * (y1 - m1) * jax.lax.rsqrt(v1 + EPS) + be1_ref[...])

    # fc2 -> bn4 -> logsoftmax over the first n_classes lanes only
    y2 = jnp.dot(h1.astype(jnp.bfloat16), w2_ref[...],
                 preferred_element_type=jnp.float32) + b2_ref[...]
    m2 = jnp.mean(y2, axis=0, keepdims=True)
    v2 = jnp.mean(jnp.square(y2 - m2), axis=0, keepdims=True)
    z = g2_ref[...] * (y2 - m2) * jax.lax.rsqrt(v2 + EPS) + be2_ref[...]

    col = jax.lax.broadcasted_iota(jnp.int32, z.shape, 1)
    z = jnp.where(col < n_classes, z, NEG)                 # mask padded logits
    zmax = jnp.max(z, axis=1, keepdims=True)
    lse = zmax + jnp.log(jnp.sum(jnp.exp(z - zmax), axis=1, keepdims=True))
    o_ref[...] = z - lse


def fc_head(flat, w1, b1, g1, be1, w2, b2, g2, be2, *, n_classes=10):
    B = flat.shape[0]
    spec = _vmem_spec()
    out = pl.pallas_call(
        functools.partial(fc_head_kernel, n_classes=n_classes),
        out_shape=jax.ShapeDtypeStruct((B, w2.shape[1]), jnp.float32),
        in_specs=[spec] * 9,
        out_specs=spec,
    )(flat, w1, b1, g1, be1, w2, b2, g2, be2)
    return out[:, :n_classes]


# ----------------------------------------------------------------------------
# Plain-JAX glue: weight layout, quantization, parameter init
# ----------------------------------------------------------------------------

def conv_weight_to_mat(w):
    # torch conv weight (Cout, Cin, kh, kw) -> (kh*kw*Cin, Cout), (dy, dx, cin) order
    cout, cin, kh, kw = w.shape
    return jnp.transpose(w, (2, 3, 1, 0)).reshape(kh * kw * cin, cout)


def quantize(x, k):
    n = float(2 ** k - 1)
    return jnp.round(x * n) / n


def quantize_weights(key, w, bitW):
    # per-tensor max-abs scale path of QuantizedNet (bitW in {2, 4});
    # torch.rand noise replaced by jax.random.uniform under a fixed key
    s = jnp.max(jnp.abs(w))
    n = float(2 ** bitW - 1)
    noise = jax.random.uniform(key, w.shape, jnp.float32) / n - 0.5 / n
    qw = 2.0 * quantize(w / (2.0 * s) + 0.5 + noise, bitW) - 1.0
    return s * qw  # module sets weight = scale * quantized


def init_params(key):
    ks = jax.random.split(key, 16)

    def u(k, shape, fan_in):
        bound = 1.0 / (fan_in ** 0.5)
        return jax.random.uniform(k, shape, jnp.float32, -bound, bound)

    p = {
        "conv1_w": u(ks[0], (16, 1, 3, 3), 1 * 9),
        "conv2_w": u(ks[1], (16, 16, 3, 3), 16 * 9),
        "fc1_w": u(ks[2], (100, 7 * 7 * 16), 7 * 7 * 16),
        "fc1_b": u(ks[3], (100,), 7 * 7 * 16),
        "fc2_w": u(ks[4], (10, 100), 100),
        "fc2_b": u(ks[5], (10,), 100),
    }
    for i, (name, c) in enumerate([("bn1", 16), ("bn2", 16), ("bn3", 100), ("bn4", 10)]):
        p[name + "_g"] = 1.0 + 0.1 * jax.random.uniform(ks[6 + 2 * i], (c,), jnp.float32, -1.0, 1.0)
        p[name + "_b"] = 0.1 * jax.random.uniform(ks[7 + 2 * i], (c,), jnp.float32, -1.0, 1.0)
    return p


# ----------------------------------------------------------------------------
# Forward pass (mirrors QuantizedNet.forward in training mode)
# ----------------------------------------------------------------------------

def forward(params, x_nchw, quant_key):
    x = x_nchw.astype(jnp.float32).reshape(-1, 1, 28, 28)   # x.view(-1,1,28,28)
    B = x.shape[0]

    original_weights = {k: params[k] for k in ("conv1_w", "conv2_w", "fc1_w", "fc2_w")}

    # ---- weight prep, hoisted out of the layer call path: quantize once,
    #      pre-lay-out as (K, N) matrices, pad FC dims to 128 lanes, cast bf16 ----
    bitw = {"conv1_w": 4, "conv2_w": 2, "fc1_w": 2, "fc2_w": 4}
    qk = jax.random.split(quant_key, 4)
    qw = {name: quantize_weights(qk[i], params[name], bitw[name])
          for i, name in enumerate(("conv1_w", "conv2_w", "fc1_w", "fc2_w"))}

    conv1_m = conv_weight_to_mat(qw["conv1_w"]).astype(jnp.bfloat16)   # (9, 16)
    conv2_m = conv_weight_to_mat(qw["conv2_w"]).astype(jnp.bfloat16)   # (144, 16)

    # Padded fc1 columns produce exactly 0 activations (gamma=1, beta=0, tanh(0)=0)
    # and are killed by zero fc2 weight rows; padded fc2 columns are masked to
    # -inf before the log-softmax inside the kernel.
    fc1_w = (jnp.zeros((16 * 7 * 7, LANE), jnp.float32)
             .at[:, :100].set(qw["fc1_w"].T).astype(jnp.bfloat16))
    fc1_b = jnp.zeros((1, LANE), jnp.float32).at[0, :100].set(params["fc1_b"])
    bn3_g = jnp.ones((1, LANE), jnp.float32).at[0, :100].set(params["bn3_g"])
    bn3_b = jnp.zeros((1, LANE), jnp.float32).at[0, :100].set(params["bn3_b"])
    fc2_w = (jnp.zeros((LANE, LANE), jnp.float32)
             .at[:100, :10].set(qw["fc2_w"].T).astype(jnp.bfloat16))
    fc2_b = jnp.zeros((1, LANE), jnp.float32).at[0, :10].set(params["fc2_b"])
    bn4_g = jnp.ones((1, LANE), jnp.float32).at[0, :10].set(params["bn4_g"])
    bn4_b = jnp.zeros((1, LANE), jnp.float32).at[0, :10].set(params["bn4_b"])

    # ---- conv1 -> bn1 -> tanh -> maxpool (two-pass fused) ----
    x_nhwc = jnp.transpose(x, (0, 2, 3, 1))                      # (B,28,28,1)
    y = conv_bn_tanh_pool(x_nhwc, conv1_m, params["bn1_g"], params["bn1_b"])
    # (B,14,14,16) bf16

    # ---- conv2 -> bn2 -> tanh -> maxpool (two-pass fused) ----
    y = conv_bn_tanh_pool(y, conv2_m, params["bn2_g"], params["bn2_b"])
    # (B,7,7,16) bf16

    # flatten in PyTorch NCHW order: (B, C*H*W) = (B, 784)
    flat = jnp.transpose(y, (0, 3, 1, 2)).reshape(B, 16 * 7 * 7).astype(jnp.bfloat16)

    # ---- fc1 -> bn3 -> tanh -> fc2 -> bn4 -> logsoftmax (single fused kernel) ----
    logits = fc_head(flat, fc1_w, fc1_b, bn3_g, bn3_b,
                     fc2_w, fc2_b, bn4_g, bn4_b, n_classes=10)
    return logits, original_weights


if __name__ == "__main__":
    key = jax.random.PRNGKey(0)
    k_params, k_x, k_quant = jax.random.split(key, 3)

    params = init_params(k_params)
    x = jax.random.normal(k_x, (2, 1, 28, 28), jnp.float32)     # small MNIST batch

    fwd = jax.jit(forward)
    logits, orig_w = fwd(params, x, k_quant)
    jax.block_until_ready((logits, orig_w))
    assert logits.shape == (2, 10)
    assert bool(jnp.all(jnp.isfinite(logits)))
    print("KERNEL_OK")
</pallas_src>

<mosaic_0001>
module attributes {stable_mosaic.version = 11 : i64} {
  func.func @conv_stats_kernel(%arg0: i32, %arg1: memref<4x400x9xbf16, #tpu.memory_space<vmem>>, %arg2: memref<9x16xbf16, #tpu.memory_space<vmem>>, %arg3: memref<4x400x16xbf16, #tpu.memory_space<vmem>>, %arg4: memref<1x2x16xf32, #tpu.memory_space<vmem>>) attributes {dimension_semantics = [#tpu.dimension_semantics<parallel>], iteration_bounds = array<i64: 1>, scalar_prefetch = 0 : i64, scratch_operands = 0 : i64, tpu.core_type = #tpu.core_type<tc>, window_params = [{transform_indices = @transform_0, window_bounds = array<i64: 4, 400, 9>}, {pipeline_mode = #tpu.pipeline_mode<synchronous>, transform_indices = @transform_1, window_bounds = array<i64: 9, 16>}, {transform_indices = @transform_2, window_bounds = array<i64: 4, 400, 16>}, {transform_indices = @transform_3, window_bounds = array<i64: 1, 2, 16>}]} {
    %c0 = arith.constant 0 : index
    %c0_0 = arith.constant 0 : index
    %c0_1 = arith.constant 0 : index
    %0 = vector.load %arg1[%c0, %c0_0, %c0_1] : memref<4x400x9xbf16, #tpu.memory_space<vmem>>, vector<4x400x9xbf16>
    %1 = vector.shape_cast %0 : vector<4x400x9xbf16> to vector<1600x9xbf16>
    %c0_2 = arith.constant 0 : index
    %c0_3 = arith.constant 0 : index
    %2 = vector.load %arg2[%c0_2, %c0_3] : memref<9x16xbf16, #tpu.memory_space<vmem>>, vector<9x16xbf16>
    %cst = arith.constant dense<0.000000e+00> : vector<1600x16xf32>
    %3 = tpu.matmul %1, %2, %cst {dimension_numbers = #tpu.dot_dimension_numbers<[1], [0], [0], [1], [0, 0, 1, 1], [], []>} : vector<1600x9xbf16>, vector<9x16xbf16>, vector<1600x16xf32> -> vector<1600x16xf32>
    %cst_4 = arith.constant dense<0.000000e+00> : vector<16xf32>
    %4 = vector.multi_reduction <add>, %3, %cst_4 [0] : vector<1600x16xf32> to vector<16xf32>
    %5 = vector.shape_cast %4 : vector<16xf32> to vector<1x16xf32>
    %6 = arith.mulf %3, %3 : vector<1600x16xf32>
    %cst_5 = arith.constant dense<0.000000e+00> : vector<16xf32>
    %7 = vector.multi_reduction <add>, %6, %cst_5 [0] : vector<1600x16xf32> to vector<16xf32>
    %8 = vector.shape_cast %7 : vector<16xf32> to vector<1x16xf32>
    %9 = tpu.concatenate %5, %8 in 0 : vector<1x16xf32>, vector<1x16xf32> -> vector<2x16xf32>
    %10 = vector.shape_cast %9 : vector<2x16xf32> to vector<1x2x16xf32>
    %c0_6 = arith.constant 0 : index
    %c0_7 = arith.constant 0 : index
    %c0_8 = arith.constant 0 : index
    %11 = vector.load %arg4[%c0_6, %c0_7, %c0_8] : memref<1x2x16xf32, #tpu.memory_space<vmem>>, vector<1x2x16xf32>
    tpu.vector_store %arg4[%c0_6, %c0_7, %c0_8], %10 {strides = array<i32>} : memref<1x2x16xf32, #tpu.memory_space<vmem>>, vector<1x2x16xf32>,
    %12 = arith.truncf %3 : vector<1600x16xf32> to vector<1600x16xbf16>
    %13 = vector.shape_cast %12 : vector<1600x16xbf16> to vector<4x400x16xbf16>
    %c0_9 = arith.constant 0 : index
    %c0_10 = arith.constant 0 : index
    %c0_11 = arith.constant 0 : index
    %14 = vector.load %arg3[%c0_9, %c0_10, %c0_11] : memref<4x400x16xbf16, #tpu.memory_space<vmem>>, vector<4x400x16xbf16>
    tpu.vector_store %arg3[%c0_9, %c0_10, %c0_11], %13 {strides = array<i32>} : memref<4x400x16xbf16, #tpu.memory_space<vmem>>, vector<4x400x16xbf16>,
    return
  }
  func.func @transform_0(%arg0: i32) -> (i32, i32, i32) {
    %c0_i32 = arith.constant 0 : i32
    %c0_i32_0 = arith.constant 0 : i32
    %c0_i32_1 = arith.constant 0 : i32
    return %c0_i32, %arg0, %c0_i32_0 : i32, i32, i32
  }
  func.func @transform_1(%arg0: i32) -> (i32, i32) {
    %c0_i32 = arith.constant 0 : i32
    %c0_i32_0 = arith.constant 0 : i32
    %c0_i32_1 = arith.constant 0 : i32
    return %c0_i32, %c0_i32_0 : i32, i32
  }
  func.func @transform_2(%arg0: i32) -> (i32, i32, i32) {
    %c0_i32 = arith.constant 0 : i32
    %c0_i32_0 = arith.constant 0 : i32
    %c0_i32_1 = arith.constant 0 : i32
    return %c0_i32, %arg0, %c0_i32_0 : i32, i32, i32
  }
  func.func @transform_3(%arg0: i32) -> (i32, i32, i32) {
    %c0_i32 = arith.constant 0 : i32
    %c0_i32_0 = arith.constant 0 : i32
    %c0_i32_1 = arith.constant 0 : i32
    return %arg0, %c0_i32, %c0_i32_0 : i32, i32, i32
  }
}

module attributes {stable_mosaic.version = 11 : i64} {
  func.func @conv_apply_kernel(%arg0: i32, %arg1: memref<4x50x128xbf16, #tpu.memory_space<vmem>>, %arg2: memref<1x128xf32, #tpu.memory_space<vmem>>, %arg3: memref<1x128xf32, #tpu.memory_space<vmem>>, %arg4: memref<50x128xbf16, #tpu.memory_space<vmem>>) attributes {dimension_semantics = [#tpu.dimension_semantics<parallel>], iteration_bounds = array<i64: 1>, scalar_prefetch = 0 : i64, scratch_operands = 0 : i64, tpu.core_type = #tpu.core_type<tc>, window_params = [{transform_indices = @transform_0, window_bounds = array<i64: 4, 50, 128>}, {pipeline_mode = #tpu.pipeline_mode<synchronous>, transform_indices = @transform_1, window_bounds = array<i64: 1, 128>}, {pipeline_mode = #tpu.pipeline_mode<synchronous>, transform_indices = @transform_2, window_bounds = array<i64: 1, 128>}, {transform_indices = @transform_3, window_bounds = array<i64: 50, 128>}]} {
    %c0 = arith.constant 0 : index
    %c0_0 = arith.constant 0 : index
    %0 = vector.load %arg2[%c0, %c0_0] : memref<1x128xf32, #tpu.memory_space<vmem>>, vector<1x128xf32>
    %c0_1 = arith.constant 0 : index
    %c0_2 = arith.constant 0 : index
    %1 = vector.load %arg3[%c0_1, %c0_2] : memref<1x128xf32, #tpu.memory_space<vmem>>, vector<1x128xf32>
    %c0_3 = arith.constant 0 : index
    %c0_4 = arith.constant 0 : index
    %c0_5 = arith.constant 0 : index
    %2 = vector.load %arg1[%c0_3, %c0_4, %c0_5] : memref<4x50x128xbf16, #tpu.memory_space<vmem>>, vector<1x50x128xbf16>
    %3 = vector.shape_cast %2 : vector<1x50x128xbf16> to vector<50x128xbf16>
    %4 = arith.extf %3 : vector<50x128xbf16> to vector<50x128xf32>
    %5 = vector.broadcast %0 : vector<1x128xf32> to vector<50x128xf32>
    %6 = arith.mulf %4, %5 : vector<50x128xf32>
    %7 = vector.broadcast %1 : vector<1x128xf32> to vector<50x128xf32>
    %8 = arith.addf %6, %7 : vector<50x128xf32>
    %9 = math.tanh %8 : vector<50x128xf32>
    %c1 = arith.constant 1 : index
    %c0_6 = arith.constant 0 : index
    %c0_7 = arith.constant 0 : index
    %10 = vector.load %arg1[%c1, %c0_6, %c0_7] : memref<4x50x128xbf16, #tpu.memory_space<vmem>>, vector<1x50x128xbf16>
    %11 = vector.shape_cast %10 : vector<1x50x128xbf16> to vector<50x128xbf16>
    %12 = arith.extf %11 : vector<50x128xbf16> to vector<50x128xf32>
    %13 = vector.broadcast %0 : vector<1x128xf32> to vector<50x128xf32>
    %14 = arith.mulf %12, %13 : vector<50x128xf32>
    %15 = vector.broadcast %1 : vector<1x128xf32> to vector<50x128xf32>
    %16 = arith.addf %14, %15 : vector<50x128xf32>
    %17 = math.tanh %16 : vector<50x128xf32>
    %18 = arith.maximumf %9, %17 : vector<50x128xf32>
    %c2 = arith.constant 2 : index
    %c0_8 = arith.constant 0 : index
    %c0_9 = arith.constant 0 : index
    %19 = vector.load %arg1[%c2, %c0_8, %c0_9] : memref<4x50x128xbf16, #tpu.memory_space<vmem>>, vector<1x50x128xbf16>
    %20 = vector.shape_cast %19 : vector<1x50x128xbf16> to vector<50x128xbf16>
    %21 = arith.extf %20 : vector<50x128xbf16> to vector<50x128xf32>
    %22 = vector.broadcast %0 : vector<1x128xf32> to vector<50x128xf32>
    %23 = arith.mulf %21, %22 : vector<50x128xf32>
    %24 = vector.broadcast %1 : vector<1x128xf32> to vector<50x128xf32>
    %25 = arith.addf %23, %24 : vector<50x128xf32>
    %26 = math.tanh %25 : vector<50x128xf32>
    %c3 = arith.constant 3 : index
    %c0_10 = arith.constant 0 : index
    %c0_11 = arith.constant 0 : index
    %27 = vector.load %arg1[%c3, %c0_10, %c0_11] : memref<4x50x128xbf16, #tpu.memory_space<vmem>>, vector<1x50x128xbf16>
    %28 = vector.shape_cast %27 : vector<1x50x128xbf16> to vector<50x128xbf16>
    %29 = arith.extf %28 : vector<50x128xbf16> to vector<50x128xf32>
    %30 = vector.broadcast %0 : vector<1x128xf32> to vector<50x128xf32>
    %31 = arith.mulf %29, %30 : vector<50x128xf32>
    %32 = vector.broadcast %1 : vector<1x128xf32> to vector<50x128xf32>
    %33 = arith.addf %31, %32 : vector<50x128xf32>
    %34 = math.tanh %33 : vector<50x128xf32>
    %35 = arith.maximumf %26, %34 : vector<50x128xf32>
    %36 = arith.maximumf %18, %35 : vector<50x128xf32>
    %37 = arith.truncf %36 : vector<50x128xf32> to vector<50x128xbf16>
    %c0_12 = arith.constant 0 : index
    %c0_13 = arith.constant 0 : index
    %38 = vector.load %arg4[%c0_12, %c0_13] : memref<50x128xbf16, #tpu.memory_space<vmem>>, vector<50x128xbf16>
    tpu.vector_store %arg4[%c0_12, %c0_13], %37 {strides = array<i32>} : memref<50x128xbf16, #tpu.memory_space<vmem>>, vector<50x128xbf16>,
    return
  }
  func.func @transform_0(%arg0: i32) -> (i32, i32, i32) {
    %c0_i32 = arith.constant 0 : i32
    %c0_i32_0 = arith.constant 0 : i32
    %c0_i32_1 = arith.constant 0 : i32
    return %c0_i32, %arg0, %c0_i32_0 : i32, i32, i32
  }
  func.func @transform_1(%arg0: i32) -> (i32, i32) {
    %c0_i32 = arith.constant 0 : i32
    %c0_i32_0 = arith.constant 0 : i32
    %c0_i32_1 = arith.constant 0 : i32
    return %c0_i32, %c0_i32_0 : i32, i32
  }
  func.func @transform_2(%arg0: i32) -> (i32, i32) {
    %c0_i32 = arith.constant 0 : i32
    %c0_i32_0 = arith.constant 0 : i32
    %c0_i32_1 = arith.constant 0 : i32
    return %c0_i32, %c0_i32_0 : i32, i32
  }
  func.func @transform_3(%arg0: i32) -> (i32, i32) {
    %c0_i32 = arith.constant 0 : i32
    %c0_i32_0 = arith.constant 0 : i32
    return %arg0, %c0_i32 : i32, i32
  }
}

module attributes {stable_mosaic.version = 11 : i64} {
  func.func @conv_stats_kernel(%arg0: i32, %arg1: memref<4x112x144xbf16, #tpu.memory_space<vmem>>, %arg2: memref<144x16xbf16, #tpu.memory_space<vmem>>, %arg3: memref<4x112x16xbf16, #tpu.memory_space<vmem>>, %arg4: memref<1x2x16xf32, #tpu.memory_space<vmem>>) attributes {dimension_semantics = [#tpu.dimension_semantics<parallel>], iteration_bounds = array<i64: 1>, scalar_prefetch = 0 : i64, scratch_operands = 0 : i64, tpu.core_type = #tpu.core_type<tc>, window_params = [{transform_indices = @transform_0, window_bounds = array<i64: 4, 112, 144>}, {pipeline_mode = #tpu.pipeline_mode<synchronous>, transform_indices = @transform_1, window_bounds = array<i64: 144, 16>}, {transform_indices = @transform_2, window_bounds = array<i64: 4, 112, 16>}, {transform_indices = @transform_3, window_bounds = array<i64: 1, 2, 16>}]} {
    %c0 = arith.constant 0 : index
    %c0_0 = arith.constant 0 : index
    %c0_1 = arith.constant 0 : index
    %0 = vector.load %arg1[%c0, %c0_0, %c0_1] : memref<4x112x144xbf16, #tpu.memory_space<vmem>>, vector<4x112x144xbf16>
    %1 = vector.shape_cast %0 : vector<4x112x144xbf16> to vector<448x144xbf16>
    %c0_2 = arith.constant 0 : index
    %c0_3 = arith.constant 0 : index
    %2 = vector.load %arg2[%c0_2, %c0_3] : memref<144x16xbf16, #tpu.memory_space<vmem>>, vector<144x16xbf16>
    %cst = arith.constant dense<0.000000e+00> : vector<448x16xf32>
    %3 = tpu.matmul %1, %2, %cst {dimension_numbers = #tpu.dot_dimension_numbers<[1], [0], [0], [1], [0, 0, 1, 1], [], []>} : vector<448x144xbf16>, vector<144x16xbf16>, vector<448x16xf32> -> vector<448x16xf32>
    %cst_4 = arith.constant dense<0.000000e+00> : vector<16xf32>
    %4 = vector.multi_reduction <add>, %3, %cst_4 [0] : vector<448x16xf32> to vector<16xf32>
    %5 = vector.shape_cast %4 : vector<16xf32> to vector<1x16xf32>
    %6 = arith.mulf %3, %3 : vector<448x16xf32>
    %cst_5 = arith.constant dense<0.000000e+00> : vector<16xf32>
    %7 = vector.multi_reduction <add>, %6, %cst_5 [0] : vector<448x16xf32> to vector<16xf32>
    %8 = vector.shape_cast %7 : vector<16xf32> to vector<1x16xf32>
    %9 = tpu.concatenate %5, %8 in 0 : vector<1x16xf32>, vector<1x16xf32> -> vector<2x16xf32>
    %10 = vector.shape_cast %9 : vector<2x16xf32> to vector<1x2x16xf32>
    %c0_6 = arith.constant 0 : index
    %c0_7 = arith.constant 0 : index
    %c0_8 = arith.constant 0 : index
    %11 = vector.load %arg4[%c0_6, %c0_7, %c0_8] : memref<1x2x16xf32, #tpu.memory_space<vmem>>, vector<1x2x16xf32>
    tpu.vector_store %arg4[%c0_6, %c0_7, %c0_8], %10 {strides = array<i32>} : memref<1x2x16xf32, #tpu.memory_space<vmem>>, vector<1x2x16xf32>,
    %12 = arith.truncf %3 : vector<448x16xf32> to vector<448x16xbf16>
    %13 = vector.shape_cast %12 : vector<448x16xbf16> to vector<4x112x16xbf16>
    %c0_9 = arith.constant 0 : index
    %c0_10 = arith.constant 0 : index
    %c0_11 = arith.constant 0 : index
    %14 = vector.load %arg3[%c0_9, %c0_10, %c0_11] : memref<4x112x16xbf16, #tpu.memory_space<vmem>>, vector<4x112x16xbf16>
    tpu.vector_store %arg3[%c0_9, %c0_10, %c0_11], %13 {strides = array<i32>} : memref<4x112x16xbf16, #tpu.memory_space<vmem>>, vector<4x112x16xbf16>,
    return
  }
  func.func @transform_0(%arg0: i32) -> (i32, i32, i32) {
    %c0_i32 = arith.constant 0 : i32
    %c0_i32_0 = arith.constant 0 : i32
    %c0_i32_1 = arith.constant 0 : i32
    return %c0_i32, %arg0, %c0_i32_0 : i32, i32, i32
  }
  func.func @transform_1(%arg0: i32) -> (i32, i32) {
    %c0_i32 = arith.constant 0 : i32
    %c0_i32_0 = arith.constant 0 : i32
    %c0_i32_1 = arith.constant 0 : i32
    return %c0_i32, %c0_i32_0 : i32, i32
  }
  func.func @transform_2(%arg0: i32) -> (i32, i32, i32) {
    %c0_i32 = arith.constant 0 : i32
    %c0_i32_0 = arith.constant 0 : i32
    %c0_i32_1 = arith.constant 0 : i32
    return %c0_i32, %arg0, %c0_i32_0 : i32, i32, i32
  }
  func.func @transform_3(%arg0: i32) -> (i32, i32, i32) {
    %c0_i32 = arith.constant 0 : i32
    %c0_i32_0 = arith.constant 0 : i32
    %c0_i32_1 = arith.constant 0 : i32
    return %arg0, %c0_i32, %c0_i32_0 : i32, i32, i32
  }
}

module attributes {stable_mosaic.version = 11 : i64} {
  func.func @conv_apply_kernel(%arg0: i32, %arg1: memref<4x14x128xbf16, #tpu.memory_space<vmem>>, %arg2: memref<1x128xf32, #tpu.memory_space<vmem>>, %arg3: memref<1x128xf32, #tpu.memory_space<vmem>>, %arg4: memref<14x128xbf16, #tpu.memory_space<vmem>>) attributes {dimension_semantics = [#tpu.dimension_semantics<parallel>], iteration_bounds = array<i64: 1>, scalar_prefetch = 0 : i64, scratch_operands = 0 : i64, tpu.core_type = #tpu.core_type<tc>, window_params = [{transform_indices = @transform_0, window_bounds = array<i64: 4, 14, 128>}, {pipeline_mode = #tpu.pipeline_mode<synchronous>, transform_indices = @transform_1, window_bounds = array<i64: 1, 128>}, {pipeline_mode = #tpu.pipeline_mode<synchronous>, transform_indices = @transform_2, window_bounds = array<i64: 1, 128>}, {transform_indices = @transform_3, window_bounds = array<i64: 14, 128>}]} {
    %c0 = arith.constant 0 : index
    %c0_0 = arith.constant 0 : index
    %0 = vector.load %arg2[%c0, %c0_0] : memref<1x128xf32, #tpu.memory_space<vmem>>, vector<1x128xf32>
    %c0_1 = arith.constant 0 : index
    %c0_2 = arith.constant 0 : index
    %1 = vector.load %arg3[%c0_1, %c0_2] : memref<1x128xf32, #tpu.memory_space<vmem>>, vector<1x128xf32>
    %c0_3 = arith.constant 0 : index
    %c0_4 = arith.constant 0 : index
    %c0_5 = arith.constant 0 : index
    %2 = vector.load %arg1[%c0_3, %c0_4, %c0_5] : memref<4x14x128xbf16, #tpu.memory_space<vmem>>, vector<1x14x128xbf16>
    %3 = vector.shape_cast %2 : vector<1x14x128xbf16> to vector<14x128xbf16>
    %4 = arith.extf %3 : vector<14x128xbf16> to vector<14x128xf32>
    %5 = vector.broadcast %0 : vector<1x128xf32> to vector<14x128xf32>
    %6 = arith.mulf %4, %5 : vector<14x128xf32>
    %7 = vector.broadcast %1 : vector<1x128xf32> to vector<14x128xf32>
    %8 = arith.addf %6, %7 : vector<14x128xf32>
    %9 = math.tanh %8 : vector<14x128xf32>
    %c1 = arith.constant 1 : index
    %c0_6 = arith.constant 0 : index
    %c0_7 = arith.constant 0 : index
    %10 = vector.load %arg1[%c1, %c0_6, %c0_7] : memref<4x14x128xbf16, #tpu.memory_space<vmem>>, vector<1x14x128xbf16>
    %11 = vector.shape_cast %10 : vector<1x14x128xbf16> to vector<14x128xbf16>
    %12 = arith.extf %11 : vector<14x128xbf16> to vector<14x128xf32>
    %13 = vector.broadcast %0 : vector<1x128xf32> to vector<14x128xf32>
    %14 = arith.mulf %12, %13 : vector<14x128xf32>
    %15 = vector.broadcast %1 : vector<1x128xf32> to vector<14x128xf32>
    %16 = arith.addf %14, %15 : vector<14x128xf32>
    %17 = math.tanh %16 : vector<14x128xf32>
    %18 = arith.maximumf %9, %17 : vector<14x128xf32>
    %c2 = arith.constant 2 : index
    %c0_8 = arith.constant 0 : index
    %c0_9 = arith.constant 0 : index
    %19 = vector.load %arg1[%c2, %c0_8, %c0_9] : memref<4x14x128xbf16, #tpu.memory_space<vmem>>, vector<1x14x128xbf16>
    %20 = vector.shape_cast %19 : vector<1x14x128xbf16> to vector<14x128xbf16>
    %21 = arith.extf %20 : vector<14x128xbf16> to vector<14x128xf32>
    %22 = vector.broadcast %0 : vector<1x128xf32> to vector<14x128xf32>
    %23 = arith.mulf %21, %22 : vector<14x128xf32>
    %24 = vector.broadcast %1 : vector<1x128xf32> to vector<14x128xf32>
    %25 = arith.addf %23, %24 : vector<14x128xf32>
    %26 = math.tanh %25 : vector<14x128xf32>
    %c3 = arith.constant 3 : index
    %c0_10 = arith.constant 0 : index
    %c0_11 = arith.constant 0 : index
    %27 = vector.load %arg1[%c3, %c0_10, %c0_11] : memref<4x14x128xbf16, #tpu.memory_space<vmem>>, vector<1x14x128xbf16>
    %28 = vector.shape_cast %27 : vector<1x14x128xbf16> to vector<14x128xbf16>
    %29 = arith.extf %28 : vector<14x128xbf16> to vector<14x128xf32>
    %30 = vector.broadcast %0 : vector<1x128xf32> to vector<14x128xf32>
    %31 = arith.mulf %29, %30 : vector<14x128xf32>
    %32 = vector.broadcast %1 : vector<1x128xf32> to vector<14x128xf32>
    %33 = arith.addf %31, %32 : vector<14x128xf32>
    %34 = math.tanh %33 : vector<14x128xf32>
    %35 = arith.maximumf %26, %34 : vector<14x128xf32>
    %36 = arith.maximumf %18, %35 : vector<14x128xf32>
    %37 = arith.truncf %36 : vector<14x128xf32> to vector<14x128xbf16>
    %c0_12 = arith.constant 0 : index
    %c0_13 = arith.constant 0 : index
    %38 = vector.load %arg4[%c0_12, %c0_13] : memref<14x128xbf16, #tpu.memory_space<vmem>>, vector<14x128xbf16>
    tpu.vector_store %arg4[%c0_12, %c0_13], %37 {strides = array<i32>} : memref<14x128xbf16, #tpu.memory_space<vmem>>, vector<14x128xbf16>,
    return
  }
  func.func @transform_0(%arg0: i32) -> (i32, i32, i32) {
    %c0_i32 = arith.constant 0 : i32
    %c0_i32_0 = arith.constant 0 : i32
    %c0_i32_1 = arith.constant 0 : i32
    return %c0_i32, %arg0, %c0_i32_0 : i32, i32, i32
  }
  func.func @transform_1(%arg0: i32) -> (i32, i32) {
    %c0_i32 = arith.constant 0 : i32
    %c0_i32_0 = arith.constant 0 : i32
    %c0_i32_1 = arith.constant 0 : i32
    return %c0_i32, %c0_i32_0 : i32, i32
  }
  func.func @transform_2(%arg0: i32) -> (i32, i32) {
    %c0_i32 = arith.constant 0 : i32
    %c0_i32_0 = arith.constant 0 : i32
    %c0_i32_1 = arith.constant 0 : i32
    return %c0_i32, %c0_i32_0 : i32, i32
  }
  func.func @transform_3(%arg0: i32) -> (i32, i32) {
    %c0_i32 = arith.constant 0 : i32
    %c0_i32_0 = arith.constant 0 : i32
    return %arg0, %c0_i32 : i32, i32
  }
}

module attributes {stable_mosaic.version = 11 : i64} {
  func.func @fc_head_kernel(%arg0: memref<2x784xbf16, #tpu.memory_space<vmem>>, %arg1: memref<784x128xbf16, #tpu.memory_space<vmem>>, %arg2: memref<1x128xf32, #tpu.memory_space<vmem>>, %arg3: memref<1x128xf32, #tpu.memory_space<vmem>>, %arg4: memref<1x128xf32, #tpu.memory_space<vmem>>, %arg5: memref<128x128xbf16, #tpu.memory_space<vmem>>, %arg6: memref<1x128xf32, #tpu.memory_space<vmem>>, %arg7: memref<1x128xf32, #tpu.memory_space<vmem>>, %arg8: memref<1x128xf32, #tpu.memory_space<vmem>>, %arg9: memref<2x128xf32, #tpu.memory_space<vmem>>) attributes {dimension_semantics = [], scalar_prefetch = 0 : i64, scratch_operands = 0 : i64, tpu.core_type = #tpu.core_type<tc>} {
    %c0 = arith.constant 0 : index
    %c0_0 = arith.constant 0 : index
    %0 = vector.load %arg0[%c0, %c0_0] : memref<2x784xbf16, #tpu.memory_space<vmem>>, vector<2x784xbf16>
    %c0_1 = arith.constant 0 : index
    %c0_2 = arith.constant 0 : index
    %1 = vector.load %arg1[%c0_1, %c0_2] : memref<784x128xbf16, #tpu.memory_space<vmem>>, vector<784x128xbf16>
    %cst = arith.constant dense<0.000000e+00> : vector<2x128xf32>
    %2 = tpu.matmul %0, %1, %cst {dimension_numbers = #tpu.dot_dimension_numbers<[1], [0], [0], [1], [0, 0, 1, 1], [], []>} : vector<2x784xbf16>, vector<784x128xbf16>, vector<2x128xf32> -> vector<2x128xf32>
    %c0_3 = arith.constant 0 : index
    %c0_4 = arith.constant 0 : index
    %3 = vector.load %arg2[%c0_3, %c0_4] : memref<1x128xf32, #tpu.memory_space<vmem>>, vector<1x128xf32>
    %4 = vector.broadcast %3 : vector<1x128xf32> to vector<2x128xf32>
    %5 = arith.addf %2, %4 : vector<2x128xf32>
    %cst_5 = arith.constant dense<0.000000e+00> : vector<128xf32>
    %6 = vector.multi_reduction <add>, %5, %cst_5 [0] : vector<2x128xf32> to vector<128xf32>
    %7 = vector.shape_cast %6 : vector<128xf32> to vector<1x128xf32>
    %cst_6 = arith.constant 2.000000e+00 : f32
    %8 = vector.broadcast %cst_6 : f32 to vector<1x128xf32>
    %9 = arith.divf %7, %8 : vector<1x128xf32>
    %10 = vector.broadcast %9 : vector<1x128xf32> to vector<2x128xf32>
    %11 = arith.subf %5, %10 : vector<2x128xf32>
    %12 = arith.mulf %11, %11 : vector<2x128xf32>
    %cst_7 = arith.constant dense<0.000000e+00> : vector<128xf32>
    %13 = vector.multi_reduction <add>, %12, %cst_7 [0] : vector<2x128xf32> to vector<128xf32>
    %14 = vector.shape_cast %13 : vector<128xf32> to vector<1x128xf32>
    %cst_8 = arith.constant 2.000000e+00 : f32
    %15 = vector.broadcast %cst_8 : f32 to vector<1x128xf32>
    %16 = arith.divf %14, %15 : vector<1x128xf32>
    %c0_9 = arith.constant 0 : index
    %c0_10 = arith.constant 0 : index
    %17 = vector.load %arg3[%c0_9, %c0_10] : memref<1x128xf32, #tpu.memory_space<vmem>>, vector<1x128xf32>
    %18 = vector.broadcast %9 : vector<1x128xf32> to vector<2x128xf32>
    %19 = arith.subf %5, %18 : vector<2x128xf32>
    %20 = vector.broadcast %17 : vector<1x128xf32> to vector<2x128xf32>
    %21 = arith.mulf %20, %19 : vector<2x128xf32>
    %cst_11 = arith.constant 9.99999974E-6 : f32
    %22 = vector.broadcast %cst_11 : f32 to vector<1x128xf32>
    %23 = arith.addf %16, %22 : vector<1x128xf32>
    %24 = math.rsqrt %23 : vector<1x128xf32>
    %25 = vector.broadcast %24 : vector<1x128xf32> to vector<2x128xf32>
    %26 = arith.mulf %21, %25 : vector<2x128xf32>
    %c0_12 = arith.constant 0 : index
    %c0_13 = arith.constant 0 : index
    %27 = vector.load %arg4[%c0_12, %c0_13] : memref<1x128xf32, #tpu.memory_space<vmem>>, vector<1x128xf32>
    %28 = vector.broadcast %27 : vector<1x128xf32> to vector<2x128xf32>
    %29 = arith.addf %26, %28 : vector<2x128xf32>
    %30 = math.tanh %29 : vector<2x128xf32>
    %31 = arith.truncf %30 : vector<2x128xf32> to vector<2x128xbf16>
    %c0_14 = arith.constant 0 : index
    %c0_15 = arith.constant 0 : index
    %32 = vector.load %arg5[%c0_14, %c0_15] : memref<128x128xbf16, #tpu.memory_space<vmem>>, vector<128x128xbf16>
    %cst_16 = arith.constant dense<0.000000e+00> : vector<2x128xf32>
    %33 = tpu.matmul %31, %32, %cst_16 {dimension_numbers = #tpu.dot_dimension_numbers<[1], [0], [0], [1], [0, 0, 1, 1], [], []>} : vector<2x128xbf16>, vector<128x128xbf16>, vector<2x128xf32> -> vector<2x128xf32>
    %c0_17 = arith.constant 0 : index
    %c0_18 = arith.constant 0 : index
    %34 = vector.load %arg6[%c0_17, %c0_18] : memref<1x128xf32, #tpu.memory_space<vmem>>, vector<1x128xf32>
    %35 = vector.broadcast %34 : vector<1x128xf32> to vector<2x128xf32>
    %36 = arith.addf %33, %35 : vector<2x128xf32>
    %cst_19 = arith.constant dense<0.000000e+00> : vector<128xf32>
    %37 = vector.multi_reduction <add>, %36, %cst_19 [0] : vector<2x128xf32> to vector<128xf32>
    %38 = vector.shape_cast %37 : vector<128xf32> to vector<1x128xf32>
    %cst_20 = arith.constant 2.000000e+00 : f32
    %39 = vector.broadcast %cst_20 : f32 to vector<1x128xf32>
    %40 = arith.divf %38, %39 : vector<1x128xf32>
    %41 = vector.broadcast %40 : vector<1x128xf32> to vector<2x128xf32>
    %42 = arith.subf %36, %41 : vector<2x128xf32>
    %43 = arith.mulf %42, %42 : vector<2x128xf32>
    %cst_21 = arith.constant dense<0.000000e+00> : vector<128xf32>
    %44 = vector.multi_reduction <add>, %43, %cst_21 [0] : vector<2x128xf32> to vector<128xf32>
    %45 = vector.shape_cast %44 : vector<128xf32> to vector<1x128xf32>
    %cst_22 = arith.constant 2.000000e+00 : f32
    %46 = vector.broadcast %cst_22 : f32 to vector<1x128xf32>
    %47 = arith.divf %45, %46 : vector<1x128xf32>
    %c0_23 = arith.constant 0 : index
    %c0_24 = arith.constant 0 : index
    %48 = vector.load %arg7[%c0_23, %c0_24] : memref<1x128xf32, #tpu.memory_space<vmem>>, vector<1x128xf32>
    %49 = vector.broadcast %40 : vector<1x128xf32> to vector<2x128xf32>
    %50 = arith.subf %36, %49 : vector<2x128xf32>
    %51 = vector.broadcast %48 : vector<1x128xf32> to vector<2x128xf32>
    %52 = arith.mulf %51, %50 : vector<2x128xf32>
    %cst_25 = arith.constant 9.99999974E-6 : f32
    %53 = vector.broadcast %cst_25 : f32 to vector<1x128xf32>
    %54 = arith.addf %47, %53 : vector<1x128xf32>
    %55 = math.rsqrt %54 : vector<1x128xf32>
    %56 = vector.broadcast %55 : vector<1x128xf32> to vector<2x128xf32>
    %57 = arith.mulf %52, %56 : vector<2x128xf32>
    %c0_26 = arith.constant 0 : index
    %c0_27 = arith.constant 0 : index
    %58 = vector.load %arg8[%c0_26, %c0_27] : memref<1x128xf32, #tpu.memory_space<vmem>>, vector<1x128xf32>
    %59 = vector.broadcast %58 : vector<1x128xf32> to vector<2x128xf32>
    %60 = arith.addf %57, %59 : vector<2x128xf32>
    %61 = tpu.iota {dimensions = array<i32: 1>} : vector<2x128xi32>
    %c10_i32 = arith.constant 10 : i32
    %62 = vector.broadcast %c10_i32 : i32 to vector<2x128xi32>
    %63 = arith.cmpi slt, %61, %62 : vector<2x128xi32>
    %cst_28 = arith.constant -1.000000e+30 : f32
    %64 = vector.broadcast %cst_28 : f32 to vector<2x128xf32>
    %65 = arith.select %63, %60, %64 : vector<2x128xi1>, vector<2x128xf32>
    %cst_29 = arith.constant dense<0xFF800000> : vector<2xf32>
    %66 = vector.multi_reduction <maximumf>, %65, %cst_29 [1] : vector<2x128xf32> to vector<2xf32>
    %67 = vector.shape_cast %66 : vector<2xf32> to vector<2x1xf32>
    %68 = vector.broadcast %67 : vector<2x1xf32> to vector<2x128xf32>
    %69 = arith.subf %65, %68 : vector<2x128xf32>
    %70 = math.exp %69 : vector<2x128xf32>
    %cst_30 = arith.constant dense<0.000000e+00> : vector<2xf32>
    %71 = vector.multi_reduction <add>, %70, %cst_30 [1] : vector<2x128xf32> to vector<2xf32>
    %72 = vector.shape_cast %71 : vector<2xf32> to vector<2x1xf32>
    %73 = math.log %72 : vector<2x1xf32>
    %74 = arith.addf %67, %73 : vector<2x1xf32>
    %75 = vector.broadcast %74 : vector<2x1xf32> to vector<2x128xf32>
    %76 = arith.subf %65, %75 : vector<2x128xf32>
    %c0_31 = arith.constant 0 : index
    %c0_32 = arith.constant 0 : index
    %77 = vector.load %arg9[%c0_31, %c0_32] : memref<2x128xf32, #tpu.memory_space<vmem>>, vector<2x128xf32>
    tpu.vector_store %arg9[%c0_31, %c0_32], %76 {strides = array<i32>} : memref<2x128xf32, #tpu.memory_space<vmem>>, vector<2x128xf32>,
    return
  }
}

</mosaic_0001>

<bundles_post_ra>
// kernel: tile.23
= control target key start
LH: loop header
LB: loop body
LE: loop exit
PB: predicated region body
PF: predicated region fallthrough
CT: control target
= control target key end

     0   :  { %s22_s0 = inlined_call_operand.vmem [shape: f32[16], index: 0, kind: input, shape index: {}]   ;;  %s23_s1 = inlined_call_operand.vmem [shape: f32[8,16], index: 1, kind: output, shape index: {}]  }
   0x1   :  { %v4_v0 = vld [vmem:[%s22_s0] ss:$0 sm:$0xff] }
   0x2   :  { %5 = vst [vmem:[%s23_s1] sm:$0xff] %v4_v0 }

// kernel: tile.24
= control target key start
LH: loop header
LB: loop body
LE: loop exit
PB: predicated region body
PF: predicated region fallthrough
CT: control target
= control target key end

     0   :  { %s67_s10 = smov 112   ;;  %s68_s11 = smov 80   ;;  %vm3_vm0 = vcmask 130048   ;;  %vm9_vm1 = vcmask 1048448   ;;  %vm15_vm2 = vcmask 917248   ;;  %vm21_vm3 = vcmask 786048   ;;  %s111_s0 = inlined_call_operand.vmem [shape: f32[8,16], index: 0, kind: input, shape index: {}]   ;;  %s112_s1 = inlined_call_operand.vmem [shape: f32[1,128], index: 1, kind: output, shape index: {}]  }
   0x1   :  { %v53_v0 = vld [vmem:[%s111_s0 + $0x7] sm:$0x1]   ;;  %v55_v1 = vld [vmem:[%s111_s0 + $0x5] sm:$0x1]   ;;  %v54_v2 = vld [vmem:[%s111_s0 + $0x6] sm:$0x1]  }
   0x2   :  { %7 = vrot.lane.b32.xlu0 %v53_v0, %s67_s10  ;;  %19 = vrot.lane.b32.xlu1 %v55_v1, %s68_s11  ;;  %v56_v3 = vld [vmem:[%s111_s0 + $0x4] sm:$0x1]   ;;  %v2_v4 = vld [vmem:[%s111_s0] sm:$0x1]   ;;  %s69_s18 = smov 96   ;;  %s70_s19 = smov 64  }
   0x3   :  { %4 = vst.msk [vmem:[#allocation0] sm:$0x1] %vm3_vm0, %v2_v4   ;;  %v57_v5 = vld [vmem:[%s111_s0 + $0x3] sm:$0x1]   ;;  %v58_v6 = vld [vmem:[%s111_s0 + $0x2] sm:$0x1]  }
   0x4   :  { %s71_s24 = smov 48   ;;  %s72_s25 = smov 32   ;;  %v59_v7 = vld [vmem:[%s111_s0 + $0x1] sm:$0x1]   ;;  %vm27_vm4 = vcmask 654848   ;;  %vm33_vm5 = vcmask 523648  }
   0x5   :  { %s73_s0 = smov 16   ;;  %vm39_vm6 = vcmask 392448   ;;  %vm45_vm7 = vcmask 261248  }
   0x6   :  { %13 = vrot.lane.b32.xlu0 %v54_v2, %s69_s18  ;;  %25 = vrot.lane.b32.xlu1 %v56_v3, %s70_s19 }
   0xa   :  { %31 = vrot.lane.b32.xlu0 %v57_v5, %s71_s24  ;;  %37 = vrot.lane.b32.xlu1 %v58_v6, %s72_s25 }
   0xe   :  { %43 = vrot.lane.b32.xlu0 %v59_v7, %s73_s0 }
  0x74   :  { %v8_v8 = vpop.permute.xlu0 %7   ;;  %v20_v9 = vpop.permute.xlu1 %19  }
  0x75   :  { %10 = vst.msk [vmem:[#allocation0] sm:$0x1] %vm9_vm1, %v8_v8  }
  0x78   :  { %v14_v10 = vpop.permute.xlu0 %13   ;;  %v26_v11 = vpop.permute.xlu1 %25  }
  0x79   :  { %16 = vst.msk [vmem:[#allocation0] sm:$0x1] %vm15_vm2, %v14_v10  }
  0x7a   :  { %22 = vst.msk [vmem:[#allocation0] sm:$0x1] %vm21_vm3, %v20_v9  }
  0x7b   :  { %28 = vst.msk [vmem:[#allocation0] sm:$0x1] %vm27_vm4, %v26_v11  }
  0x7c   :  { %v32_v12 = vpop.permute.xlu0 %31   ;;  %v38_v13 = vpop.permute.xlu1 %37  }
  0x7d   :  { %34 = vst.msk [vmem:[#allocation0] sm:$0x1] %vm33_vm5, %v32_v12  }
  0x7e   :  { %40 = vst.msk [vmem:[#allocation0] sm:$0x1] %vm39_vm6, %v38_v13  }
  0x80   :  { %v44_v14 = vpop.permute.xlu0 %43  }
  0x81   :  { %46 = vst.msk [vmem:[#allocation0] sm:$0x1] %vm45_vm7, %v44_v14  }
  0x88   :  { %v50_v15 = vld [vmem:[#allocation0] sm:$0x1] }
  0x89   :  { %52 = vst [vmem:[%s112_s1] sm:$0x1] %v50_v15 }

// kernel: forward.8
= control target key start
LH: loop header
LB: loop body
LE: loop exit
PB: predicated region body
PF: predicated region fallthrough
CT: control target
= control target key end

     0   :  { %s537_s0 = inlined_call_operand.vmem [shape: bf16[4,50,128], index: 0, kind: input, shape index: {}]   ;;  %s538_s1 = inlined_call_operand.vmem [shape: f32[1,128], index: 1, kind: input, shape index: {}]   ;;  %s539_s2 = inlined_call_operand.vmem [shape: f32[1,128], index: 2, kind: input, shape index: {}]   ;;  %s540_s3 = inlined_call_operand.vmem [shape: bf16[50,128], index: 3, kind: output, shape index: {}]  }
   0x1   :  { %v414_v0 = vld [vmem:[%s538_s1] ss:$0 sm:$0xff]  ;;  %v234_v4 = vld [vmem:[%s537_s0 + $0x1c] ss:$56 sps:$4 sm:$0xff]   ;;  %v324_v21 = vld [vmem:[%s537_s0 + $0x8] sm:$0xff]  }
   0x2   :  { %v270_v1 = vld [vmem:[%s537_s0] sm:$0xff]   ;;  %v328_v6 = vld [vmem:[%s537_s0 + $0x38] sm:$0xff]   ;;  %v71_v9 = vunpack.c.l.bf16 %v234_v4  ;;  %v150_v16 = vunpack.c.h.bf16 %v234_v4  ;;  %v327_v26 = vld [vmem:[%s537_s0 + $0x28] sm:$0xff]   ;;  %v275_v34 = vunpack.c.l.bf16 %v324_v21  ;;  %v276_v35 = vunpack.c.h.bf16 %v324_v21 }
   0x3   :  { %v271_v2 = vunpack.c.l.bf16 %v270_v1  ;;  %v272_v3 = vunpack.c.h.bf16 %v270_v1  ;;  %v326_v5 = vld [vmem:[%s537_s0 + $0x20] sm:$0xff]   ;;  %v291_v10 = vunpack.c.l.bf16 %v328_v6  ;;  %v292_v11 = vunpack.c.h.bf16 %v328_v6  ;;  %v331_v12 = vld [vmem:[%s537_s0 + $0x58] sm:$0xff]   ;;  %v325_v48 = vld [vmem:[%s537_s0 + $0x10] sm:$0xff]  }
   0x4   :  { %v431_v7 = vld [vmem:[%s539_s2] ss:$0 sm:$0xff]  ;;  %v283_v8 = vunpack.c.l.bf16 %v326_v5  ;;  %v303_v15 = vunpack.c.l.bf16 %v331_v12  ;;  %v78_v17 = vmul.f32 %v414_v0, %v71_v9  ;;  %v157_v24 = vmul.f32 %v414_v0, %v150_v16  ;;  %v239_v52 = vld [vmem:[%s537_s0 + $0x30] ss:$56 sps:$4 sm:$0xff]   ;;  %v22_v16 = vld [vmem:[%s537_s0 + $0x18] sm:$0x1] }
   0x5   :  { %v36_v13 = vmul.f32 %v271_v2, %v414_v0  ;;  %v37_v14 = vmul.f32 %v272_v3, %v414_v0  ;;  %v121_v19 = vmul.f32 %v291_v10, %v414_v0  ;;  %v122_v20 = vmul.f32 %v292_v11, %v414_v0  ;;  %v329_v31 = vld [vmem:[%s537_s0 + $0x40] sm:$0xff]   ;;  %v330_v2 = vld [vmem:[%s537_s0 + $0x48] sm:$0xff]   ;;  %v240_v21 = vld [vmem:[%s537_s0 + $0x34] sm:$0x1] }
   0x6   :  { %v79_v18 = vmul.f32 %v283_v8, %v414_v0  ;;  %v158_v25 = vmul.f32 %v303_v15, %v414_v0  ;;  %v85_v27 = vadd.f32 %v431_v7, %v78_v17  ;;  %v164_v32 = vadd.f32 %v431_v7, %v157_v24  ;;  %v332_v47 = vld [vmem:[%s537_s0 + $0x60] sm:$0xff]  }
   0x7   :  { %v49_v22 = vadd.f32 %v431_v7, %v36_v13  ;;  %v50_v23 = vadd.f32 %v431_v7, %v37_v14  ;;  %v128_v29 = vadd.f32 %v431_v7, %v121_v19  ;;  %v129_v30 = vadd.f32 %v431_v7, %v122_v20 }
   0x8   :  { %v86_v28 = vadd.f32 %v431_v7, %v79_v18  ;;  %v165_v33 = vadd.f32 %v431_v7, %v158_v25  ;;  %v284_v36 = vunpack.c.h.bf16 %v326_v5  ;;  %v287_v37 = vunpack.c.l.bf16 %v327_v26 }
   0x9   :  { %335 = vtanh.f32 %v49_v22  ;;  %v38_v38 = vmul.f32 %v275_v34, %v414_v0  ;;  %v295_v39 = vunpack.c.l.bf16 %v329_v31  ;;  %v296_v40 = vunpack.c.h.bf16 %v329_v31  ;;  %v247_v34 = vld [vmem:[%s537_s0 + $0x50] sm:$0x1] }
   0xa   :  { %337 = vtanh.f32 %v50_v23  ;;  %v39_v41 = vmul.f32 %v276_v35, %v414_v0  ;;  %v80_v42 = vmul.f32 %v284_v36, %v414_v0  ;;  %v81_v43 = vmul.f32 %v287_v37, %v414_v0 }
   0xb   :  { %339 = vtanh.f32 %v85_v27  ;;  %v51_v44 = vadd.f32 %v431_v7, %v38_v38  ;;  %v123_v45 = vmul.f32 %v295_v39, %v414_v0  ;;  %v124_v46 = vmul.f32 %v296_v40, %v414_v0  ;;  %v254_v39 = vld [vmem:[%s537_s0 + $0x6c] sm:$0x1] }
   0xc   :  { %341 = vtanh.f32 %v86_v28  ;;  %v52_v49 = vadd.f32 %v431_v7, %v39_v41  ;;  %v87_v50 = vadd.f32 %v431_v7, %v80_v42  ;;  %v88_v51 = vadd.f32 %v431_v7, %v81_v43 }
   0xd   :  { %343 = vtanh.f32 %v128_v29  ;;  %v130_v53 = vadd.f32 %v431_v7, %v123_v45  ;;  %v131_v54 = vadd.f32 %v431_v7, %v124_v46  ;;  %v304_v55 = vunpack.c.h.bf16 %v331_v12 }
   0xe   :  { %345 = vtanh.f32 %v129_v30  ;;  %v307_v56 = vunpack.c.l.bf16 %v332_v47  ;;  %v279_v57 = vunpack.c.l.bf16 %v325_v48  ;;  %v280_v58 = vunpack.c.h.bf16 %v325_v48 }
   0xf   :  { %347 = vtanh.f32 %v164_v32  ;;  %v159_v59 = vmul.f32 %v304_v55, %v414_v0  ;;  %v288_v60 = vunpack.c.h.bf16 %v327_v26  ;;  %v76_v61 = vunpack.c.l.bf16 %v239_v52 }
  0x10   :  { %349 = vtanh.f32 %v165_v33  ;;  %v160_v62 = vmul.f32 %v307_v56, %v414_v0  ;;  %v40_v63 = vmul.f32 %v279_v57, %v414_v0  ;;  %v41_v1 = vmul.f32 %v280_v58, %v414_v0 }
  0x11   :  { %351 = vtanh.f32 %v51_v44  ;;  %v166_v4 = vadd.f32 %v431_v7, %v159_v59  ;;  %v82_v5 = vmul.f32 %v288_v60, %v414_v0  ;;  %v83_v6 = vmul.f32 %v414_v0, %v76_v61 }
  0x12   :  { %353 = vtanh.f32 %v52_v49  ;;  %v167_v9 = vadd.f32 %v431_v7, %v160_v62  ;;  %v53_v10 = vadd.f32 %v431_v7, %v40_v63  ;;  %v54_v11 = vadd.f32 %v431_v7, %v41_v1 }
  0x13   :  { %v336_v3 = vpop.eup %335  ;;  %355 = vtanh.f32 %v87_v50  ;;  %v89_v13 = vadd.f32 %v431_v7, %v82_v5  ;;  %v90_v14 = vadd.f32 %v431_v7, %v83_v6  ;;  %v299_v15 = vunpack.c.l.bf16 %v330_v2 }
  0x14   :  { %v338_v8 = vpop.eup %337  ;;  %357 = vtanh.f32 %v88_v51  ;;  %v300_v19 = vunpack.c.h.bf16 %v330_v2  ;;  %v308_v20 = vunpack.c.h.bf16 %v332_v47  ;;  %v155_v25 = vunpack.c.h.bf16 %v239_v52 }
  0x15   :  { %v340_v12 = vpop.eup %339  ;;  %359 = vtanh.f32 %v130_v53  ;;  %v125_v24 = vmul.f32 %v299_v15, %v414_v0  ;;  %v29_v29 = vunpack.c.l.bf16 %v22_v16  ;;  %v77_v33 = vunpack.c.l.bf16 %v240_v21 }
  0x16   :  { %v342_v17 = vpop.eup %341  ;;  %v99_v18 = vmax.f32 %v336_v3, %v340_v12  ;;  %361 = vtanh.f32 %v131_v54  ;;  %v126_v27 = vmul.f32 %v300_v19, %v414_v0  ;;  %v161_v28 = vmul.f32 %v308_v20, %v414_v0 }
  0x17   :  { %v344_v22 = vpop.eup %343  ;;  %v100_v23 = vmax.f32 %v338_v8, %v342_v17  ;;  %363 = vtanh.f32 %v166_v4  ;;  %v132_v31 = vadd.f32 %v431_v7, %v125_v24  ;;  %v162_v32 = vmul.f32 %v414_v0, %v155_v25 }
  0x18   :  { %v346_v26 = vpop.eup %345  ;;  %365 = vtanh.f32 %v167_v9  ;;  %v133_v37 = vadd.f32 %v431_v7, %v126_v27  ;;  %v168_v38 = vadd.f32 %v431_v7, %v161_v28  ;;  %v42_v43 = vmul.f32 %v414_v0, %v29_v29 }
  0x19   :  { %v348_v30 = vpop.eup %347  ;;  %367 = vtanh.f32 %v53_v10  ;;  %v169_v42 = vadd.f32 %v431_v7, %v162_v32  ;;  %v84_v46 = vmul.f32 %v414_v0, %v77_v33  ;;  %v120_v47 = vunpack.c.l.bf16 %v247_v34 }
  0x1a   :  { %v350_v35 = vpop.eup %349  ;;  %v178_v36 = vmax.f32 %v344_v22, %v348_v30  ;;  %369 = vtanh.f32 %v54_v11  ;;  %v55_v50 = vadd.f32 %v431_v7, %v42_v43  ;;  %v156_v51 = vunpack.c.l.bf16 %v254_v39 }
  0x1b   :  { %v352_v40 = vpop.eup %351  ;;  %v179_v41 = vmax.f32 %v346_v26, %v350_v35  ;;  %371 = vtanh.f32 %v89_v13  ;;  %v91_v53 = vadd.f32 %v431_v7, %v84_v46  ;;  %v127_v54 = vmul.f32 %v414_v0, %v120_v47 }
  0x1c   :  { %v354_v44 = vpop.eup %353  ;;  %v185_v45 = vmax.f32 %v99_v18, %v178_v36  ;;  %373 = vtanh.f32 %v90_v14  ;;  %v163_v57 = vmul.f32 %v414_v0, %v156_v51 }
  0x1d   :  { %v356_v48 = vpop.eup %355  ;;  %v186_v49 = vmax.f32 %v100_v23, %v179_v41  ;;  %375 = vtanh.f32 %v132_v31  ;;  %v134_v60 = vadd.f32 %v431_v7, %v127_v54 }
  0x1e   :  { %v358_v52 = vpop.eup %357  ;;  %377 = vtanh.f32 %v133_v37  ;;  %v101_v59 = vmax.f32 %v352_v40, %v356_v48  ;;  %v170_v63 = vadd.f32 %v431_v7, %v163_v57 }
  0x1f   :  { %v360_v55 = vpop.eup %359  ;;  %v312_v56 = vpack.c.bf16 %v186_v49, %v185_v45  ;;  %379 = vtanh.f32 %v168_v38  ;;  %v102_v62 = vmax.f32 %v354_v44, %v358_v52 }
  0x20   :  { %v362_v58 = vpop.eup %361  ;;  %381 = vtanh.f32 %v169_v42 }
  0x21   :  { %v364_v61 = vpop.eup %363  ;;  %313 = vst [vmem:[%s540_s3] sm:$0xff] %v312_v56   ;;  %383 = vtanh.f32 %v55_v50 }
  0x22   :  { %v366_v1 = vpop.eup %365  ;;  %v180_v2 = vmax.f32 %v360_v55, %v364_v61  ;;  %385 = vtanh.f32 %v91_v53 }
  0x23   :  { %v368_v3 = vpop.eup %367  ;;  %v181_v4 = vmax.f32 %v362_v58, %v366_v1  ;;  %387 = vtanh.f32 %v134_v60 }
  0x24   :  { %v370_v0 = vpop.eup %369  ;;  %v187_v5 = vmax.f32 %v101_v59, %v180_v2  ;;  %389 = vtanh.f32 %v170_v63 }
  0x25   :  { %v372_v6 = vpop.eup %371  ;;  %v188_v8 = vmax.f32 %v102_v62, %v181_v4 }
  0x26   :  { %v374_v9 = vpop.eup %373  ;;  %v103_v13 = vmax.f32 %v368_v3, %v372_v6 }
  0x27   :  { %v376_v10 = vpop.eup %375  ;;  %v317_v11 = vpack.c.bf16 %v188_v8, %v187_v5  ;;  %v104_v7 = vmax.f32 %v370_v0, %v374_v9 }
  0x28   :  { %v378_v12 = vpop.eup %377 }
  0x29   :  { %v380_v14 = vpop.eup %379  ;;  %333 = vst [vmem:[%s540_s3 + $0x8] sm:$0xff] %v317_v11  }
  0x2a   :  { %v382_v15 = vpop.eup %381  ;;  %v182_v16 = vmax.f32 %v376_v10, %v380_v14 }
  0x2b   :  { %v384_v17 = vpop.eup %383  ;;  %v183_v18 = vmax.f32 %v378_v12, %v382_v15 }
  0x2c   :  { %v386_v19 = vpop.eup %385  ;;  %v189_v20 = vmax.f32 %v103_v13, %v182_v16 }
  0x2d   :  { %v388_v21 = vpop.eup %387  ;;  %v190_v22 = vmax.f32 %v104_v7, %v183_v18  ;;  %v105_v23 = vmax.f32 %v384_v17, %v386_v19 }
  0x2e   :  { %v390_v24 = vpop.eup %389 }
  0x2f   :  { %v322_v25 = vpack.c.bf16 %v190_v22, %v189_v20  ;;  %v184_v26 = vmax.f32 %v388_v21, %v390_v24 }
  0x31   :  { %334 = vst [vmem:[%s540_s3 + $0x10] sm:$0xff] %v322_v25   ;;  %v191_v27 = vmax.f32 %v105_v23, %v184_v26 }
  0x33   :  { %v268_v28 = vpack.c.bf16 %v191_v27, %v191_v27 }
  0x35   :  { %227 = vst [vmem:[%s540_s3 + $0x18] sm:$0x1] %v268_v28 }

// kernel: forward.7
= control target key start
LH: loop header
LB: loop body
LE: loop exit
PB: predicated region body
PF: predicated region fallthrough
CT: control target
= control target key end

     0   :  { %vm1022_vm0 = vcmask 1043456   ;;  %vm1023_vm1 = vcmask 1044480   ;;  %vm721_vm2 = vcmask 72704   ;;  %v4894_v1 = vmov 65535   ;;  %s7221_s1 = inlined_call_operand.vmem [shape: bf16[9,16], index: 1, kind: input, shape index: {}]   ;;  %s7222_s0 = inlined_call_operand.vmem [shape: bf16[4,400,9], index: 0, kind: input, shape index: {}]   ;;  %s7223_s2 = inlined_call_operand.vmem [shape: bf16[4,400,16], index: 2, kind: output, shape index: {0}]   ;;  %s7224_s3 = inlined_call_operand.vmem [shape: f32[1,2,16], index: 3, kind: output, shape index: {1}]  }
   0x1   :  { %v4793_v0 = vld [vmem:[%s7221_s1] sm:$0x1f]   ;;  %v1024_v2 = vsel %vm1022_vm0, 4294967295, %v4894_v1  ;;  %v4795_v6 = vld [vmem:[%s7222_s0 + $0x8] sm:$0xff]   ;;  %v4796_v7 = vld [vmem:[%s7222_s0 + $0x10] sm:$0xff]   ;;  %vm3677_vm3 = vcmask 125952  }
   0x2   :  { %v4794_v3 = vld [vmem:[%s7222_s0] sm:$0xff]   ;;  %v1025_v4 = vsel %vm1023_vm1, %v1024_v2, 0  ;;  %v4797_v8 = vld [vmem:[%s7222_s0 + $0x18] sm:$0xff]   ;;  %v4799_v10 = vld [vmem:[%s7222_s0 + $0x28] sm:$0xff]   ;;  %vm1862_vm4 = vcmask 130048   ;;  %vm2873_vm5 = vcmask 1040384  }
   0x3   :  { %v1027_v5 = vand.u32 %v4793_v0, %v1025_v4  ;;  %4590 = vmatprep.mubr.msk.bf16.mxu0 %vm721_vm2, %v4794_v3  ;;  %v4798_v9 = vld [vmem:[%s7222_s0 + $0x20] sm:$0xff]   ;;  %v4800_v11 = vld [vmem:[%s7222_s0 + $0x30] sm:$0xff]   ;;  %v4801_v12 = vld [vmem:[%s7222_s0 + $0x38] sm:$0xff]   ;;  %vm2875_vm6 = vcmask 123904  }
   0x4   :  { %v4802_v13 = vld [vmem:[%s7222_s0 + $0x40] sm:$0xff]   ;;  %v4803_v14 = vld [vmem:[%s7222_s0 + $0x48] sm:$0xff]   ;;  %v4804_v15 = vld [vmem:[%s7222_s0 + $0x50] sm:$0xff]  }
   0x5   :  { %4588 = vmatprep.subr.bf16.mxu0 %v1027_v5  ;;  %4790 = vmatprep.subr.bf16.mxu1 %v1027_v5  ;;  %v4805_v16 = vld [vmem:[%s7222_s0 + $0x58] sm:$0xff]   ;;  %v4806_v17 = vld [vmem:[%s7222_s0 + $0x60] sm:$0xff]   ;;  %v4807_v18 = vld [vmem:[%s7222_s0 + $0x68] sm:$0xff]  }
   0x6   :  { %4589 = vmatpush3.bf16.msra.mxu0 %v1027_v5  ;;  %4791 = vmatpush3.bf16.msra.mxu1 %v1027_v5  ;;  %v4808_v19 = vld [vmem:[%s7222_s0 + $0x70] sm:$0xff]   ;;  %v4809_v20 = vld [vmem:[%s7222_s0 + $0x78] sm:$0xff]   ;;  %v4810_v21 = vld [vmem:[%s7222_s0 + $0x80] sm:$0xff]  }
   0x7   :  { %v4811_v22 = vld [vmem:[%s7222_s0 + $0x88] sm:$0xff]   ;;  %v4812_v23 = vld [vmem:[%s7222_s0 + $0x90] sm:$0xff]   ;;  %v4845_v25 = vld [vmem:[%s7222_s0 + $0x198] sm:$0xff]  }
   0x8   :  { %v4844_v24 = vld [vmem:[%s7222_s0 + $0x190] sm:$0xff]   ;;  %v4846_v26 = vld [vmem:[%s7222_s0 + $0x1a0] sm:$0xff]   ;;  %v4813_v27 = vld [vmem:[%s7222_s0 + $0x98] sm:$0xff]  }
   0x9   :  { %4591 = vmatmul.mubr.msk.bf16.vlgmr.msra.gmra.mrb[0].mxu0 %vm721_vm2, %v4795_v6  ;;  %4690 = vmatprep.mubr.msk.bf16.mxu1 %vm721_vm2, %v4844_v24  ;;  %v4814_v28 = vld [vmem:[%s7222_s0 + $0xa0] sm:$0xff]   ;;  %v4847_v29 = vld [vmem:[%s7222_s0 + $0x1a8] sm:$0xff]   ;;  %v4816_v31 = vld [vmem:[%s7222_s0 + $0xb0] sm:$0xff]  }
   0xa   :  { %4594 = vmatprep.mubr.msk.bf16.mxu0 %vm721_vm2, %v4796_v7  ;;  %4691 = vmatmul.mubr.msk.bf16.vlgmr.msra.gmra.mrb[0].mxu1 %vm721_vm2, %v4845_v25  ;;  %v4815_v30 = vld [vmem:[%s7222_s0 + $0xa8] sm:$0xff]   ;;  %v4848_v32 = vld [vmem:[%s7222_s0 + $0x1b0] sm:$0xff]   ;;  %v4849_v33 = vld [vmem:[%s7222_s0 + $0x1b8] sm:$0xff]  }
   0xb   :  { %4694 = vmatprep.mubr.msk.bf16.mxu1 %vm721_vm2, %v4846_v26  ;;  %v4817_v34 = vld [vmem:[%s7222_s0 + $0xb8] sm:$0xff]   ;;  %v4818_v35 = vld [vmem:[%s7222_s0 + $0xc0] sm:$0xff]   ;;  %v4819_v37 = vld [vmem:[%s7222_s0 + $0xc8] sm:$0xff]  }
   0xc   :  { %v4850_v36 = vld [vmem:[%s7222_s0 + $0x1c0] sm:$0xff]   ;;  %v4851_v38 = vld [vmem:[%s7222_s0 + $0x1c8] sm:$0xff]   ;;  %v4820_v39 = vld [vmem:[%s7222_s0 + $0xd0] sm:$0xff]  }
   0xd   :  { %v4852_v40 = vld [vmem:[%s7222_s0 + $0x1d0] sm:$0xff]   ;;  %v4821_v41 = vld [vmem:[%s7222_s0 + $0xd8] sm:$0xff]   ;;  %v4822_v43 = vld [vmem:[%s7222_s0 + $0xe0] sm:$0xff]  }
   0xe   :  { %v4853_v42 = vld [vmem:[%s7222_s0 + $0x1d8] sm:$0xff]   ;;  %v4854_v44 = vld [vmem:[%s7222_s0 + $0x1e0] sm:$0xff]   ;;  %v4823_v45 = vld [vmem:[%s7222_s0 + $0xe8] sm:$0xff]  }
   0xf   :  { %v4855_v46 = vld [vmem:[%s7222_s0 + $0x1e8] sm:$0xff]   ;;  %v4824_v47 = vld [vmem:[%s7222_s0 + $0xf0] sm:$0xff]   ;;  %v4825_v49 = vld [vmem:[%s7222_s0 + $0xf8] sm:$0xff]  }
  0x10   :  { %v4856_v48 = vld [vmem:[%s7222_s0 + $0x1f0] sm:$0xff]   ;;  %v4857_v50 = vld [vmem:[%s7222_s0 + $0x1f8] sm:$0xff]   ;;  %v4826_v51 = vld [vmem:[%s7222_s0 + $0x100] sm:$0xff]  }
  0x11   :  { %4595 = vmatmul.mubr.msk.bf16.gmra.mrb[4].mxu0 %vm721_vm2, %v4797_v8  ;;  %v4858_v52 = vld [vmem:[%s7222_s0 + $0x200] sm:$0xff]   ;;  %v4827_v53 = vld [vmem:[%s7222_s0 + $0x108] sm:$0xff]   ;;  %v4828_v55 = vld [vmem:[%s7222_s0 + $0x110] sm:$0xff]  }
  0x12   :  { %4598 = vmatprep.mubr.msk.bf16.mxu0 %vm721_vm2, %v4798_v9  ;;  %4695 = vmatmul.mubr.msk.bf16.gmra.mrb[4].mxu1 %vm721_vm2, %v4847_v29  ;;  %v4859_v54 = vld [vmem:[%s7222_s0 + $0x208] sm:$0xff]   ;;  %v4860_v56 = vld [vmem:[%s7222_s0 + $0x210] sm:$0xff]   ;;  %v4829_v57 = vld [vmem:[%s7222_s0 + $0x118] sm:$0xff]  }
  0x13   :  { %4698 = vmatprep.mubr.msk.bf16.mxu1 %vm721_vm2, %v4848_v32  ;;  %v4861_v58 = vld [vmem:[%s7222_s0 + $0x218] sm:$0xff]   ;;  %v4830_v59 = vld [vmem:[%s7222_s0 + $0x120] sm:$0xff]   ;;  %v4831_v61 = vld [vmem:[%s7222_s0 + $0x128] sm:$0xff]  }
  0x14   :  { %v4862_v60 = vld [vmem:[%s7222_s0 + $0x220] sm:$0xff]   ;;  %v4863_v62 = vld [vmem:[%s7222_s0 + $0x228] sm:$0xff]   ;;  %v4832_v63 = vld [vmem:[%s7222_s0 + $0x130] sm:$0xff]  }
  0x15   :  { %v4864_v0 = vld [vmem:[%s7222_s0 + $0x230] sm:$0xff]   ;;  %v4833_v1 = vld [vmem:[%s7222_s0 + $0x138] sm:$0xff]   ;;  %v4834_v3 = vld [vmem:[%s7222_s0 + $0x140] sm:$0xff]  }
  0x16   :  { %v4865_v2 = vld [vmem:[%s7222_s0 + $0x238] sm:$0xff]   ;;  %v4866_v4 = vld [vmem:[%s7222_s0 + $0x240] sm:$0xff]   ;;  %v4835_v5 = vld [vmem:[%s7222_s0 + $0x148] sm:$0xff]  }
  0x17   :  { %v4867_v6 = vld [vmem:[%s7222_s0 + $0x248] sm:$0xff]   ;;  %v4836_v7 = vld [vmem:[%s7222_s0 + $0x150] sm:$0xff]   ;;  %v4837_v9 = vld [vmem:[%s7222_s0 + $0x158] sm:$0xff]  }
  0x18   :  { %v4868_v8 = vld [vmem:[%s7222_s0 + $0x250] sm:$0xff]   ;;  %v4877_v24 = vld [vmem:[%s7222_s0 + $0x298] sm:$0xff]   ;;  %v4878_v25 = vld [vmem:[%s7222_s0 + $0x2a0] sm:$0xff]  }
  0x19   :  { %4599 = vmatmul.mubr.msk.bf16.gmra.mrb[8].mxu0 %vm721_vm2, %v4799_v10  ;;  %v4869_v10 = vld [vmem:[%s7222_s0 + $0x258] sm:$0xff]   ;;  %v4879_v26 = vld [vmem:[%s7222_s0 + $0x2a8] sm:$0xff]  }
  0x1a   :  { %4602 = vmatprep.mubr.msk.bf16.mxu0 %vm721_vm2, %v4800_v11  ;;  %4699 = vmatmul.mubr.msk.bf16.gmra.mrb[8].mxu1 %vm721_vm2, %v4849_v33  ;;  %v4838_v11 = vld [vmem:[%s7222_s0 + $0x160] sm:$0xff]  }
  0x1b   :  { %4702 = vmatprep.mubr.msk.bf16.mxu1 %vm721_vm2, %v4850_v36 }
  0x21   :  { %4603 = vmatmul.mubr.msk.bf16.gmra.mrb[12].mxu0 %vm721_vm2, %v4801_v12  ;;  %v4870_v12 = vld [vmem:[%s7222_s0 + $0x260] sm:$0xff]  }
  0x22   :  { %4606 = vmatprep.mubr.msk.bf16.mxu0 %vm721_vm2, %v4802_v13  ;;  %4703 = vmatmul.mubr.msk.bf16.gmra.mrb[12].mxu1 %vm721_vm2, %v4851_v38  ;;  %v4839_v13 = vld [vmem:[%s7222_s0 + $0x168] sm:$0xff]  }
  0x23   :  { %4706 = vmatprep.mubr.msk.bf16.mxu1 %vm721_vm2, %v4852_v40 }
  0x29   :  { %4607 = vmatmul.mubr.msk.bf16.gmra.mrb[16].mxu0 %vm721_vm2, %v4803_v14  ;;  %v4871_v14 = vld [vmem:[%s7222_s0 + $0x268] sm:$0xff]  }
  0x2a   :  { %4610 = vmatprep.mubr.msk.bf16.mxu0 %vm721_vm2, %v4804_v15  ;;  %4707 = vmatmul.mubr.msk.bf16.gmra.mrb[16].mxu1 %vm721_vm2, %v4853_v42  ;;  %v4840_v15 = vld [vmem:[%s7222_s0 + $0x170] sm:$0xff]  }
  0x2b   :  { %4710 = vmatprep.mubr.msk.bf16.mxu1 %vm721_vm2, %v4854_v44 }
  0x31   :  { %4611 = vmatmul.mubr.msk.bf16.gmra.mrb[20].mxu0 %vm721_vm2, %v4805_v16  ;;  %v4872_v16 = vld [vmem:[%s7222_s0 + $0x270] sm:$0xff]  }
  0x32   :  { %4614 = vmatprep.mubr.msk.bf16.mxu0 %vm721_vm2, %v4806_v17  ;;  %4711 = vmatmul.mubr.msk.bf16.gmra.mrb[20].mxu1 %vm721_vm2, %v4855_v46  ;;  %v4841_v17 = vld [vmem:[%s7222_s0 + $0x178] sm:$0xff]  }
  0x33   :  { %4714 = vmatprep.mubr.msk.bf16.mxu1 %vm721_vm2, %v4856_v48 }
  0x39   :  { %4615 = vmatmul.mubr.msk.bf16.gmra.mrb[24].mxu0 %vm721_vm2, %v4807_v18  ;;  %v4873_v18 = vld [vmem:[%s7222_s0 + $0x278] sm:$0xff]  }
  0x3a   :  { %4618 = vmatprep.mubr.msk.bf16.mxu0 %vm721_vm2, %v4808_v19  ;;  %4715 = vmatmul.mubr.msk.bf16.gmra.mrb[24].mxu1 %vm721_vm2, %v4857_v50  ;;  %v4842_v19 = vld [vmem:[%s7222_s0 + $0x180] sm:$0xff]  }
  0x3b   :  { %4718 = vmatprep.mubr.msk.bf16.mxu1 %vm721_vm2, %v4858_v52  ;;  %v4882_v52 = vld [vmem:[%s7222_s0 + $0x2c0] sm:$0xff]  }
  0x41   :  { %4619 = vmatmul.mubr.msk.bf16.gmra.mrb[28].mxu0 %vm721_vm2, %v4809_v20  ;;  %v4874_v20 = vld [vmem:[%s7222_s0 + $0x280] sm:$0xff]  }
  0x42   :  { %4622 = vmatprep.mubr.msk.bf16.mxu0 %vm721_vm2, %v4810_v21  ;;  %4719 = vmatmul.mubr.msk.bf16.gmra.mrb[28].mxu1 %vm721_vm2, %v4859_v54  ;;  %v4843_v21 = vld [vmem:[%s7222_s0 + $0x188] sm:$0xff]  }
  0x43   :  { %4722 = vmatprep.mubr.msk.bf16.mxu1 %vm721_vm2, %v4860_v56 }
  0x49   :  { %4623 = vmatmul.mubr.msk.bf16.gmra.mrb[32].mxu0 %vm721_vm2, %v4811_v22  ;;  %v4875_v22 = vld [vmem:[%s7222_s0 + $0x288] sm:$0xff]  }
  0x4a   :  { %4626 = vmatprep.mubr.msk.bf16.mxu0 %vm721_vm2, %v4812_v23  ;;  %4723 = vmatmul.mubr.msk.bf16.gmra.mrb[32].mxu1 %vm721_vm2, %v4861_v58  ;;  %v4876_v23 = vld [vmem:[%s7222_s0 + $0x290] sm:$0xff]  }
  0x4b   :  { %4726 = vmatprep.mubr.msk.bf16.mxu1 %vm721_vm2, %v4862_v60 }
  0x51   :  { %4627 = vmatmul.mubr.msk.bf16.gmra.mrb[36].mxu0 %vm721_vm2, %v4813_v27 }
  0x52   :  { %4630 = vmatprep.mubr.msk.bf16.mxu0 %vm721_vm2, %v4814_v28  ;;  %4727 = vmatmul.mubr.msk.bf16.gmra.mrb[36].mxu1 %vm721_vm2, %v4863_v62  ;;  %v4880_v28 = vld [vmem:[%s7222_s0 + $0x2b0] sm:$0xff]  }
  0x53   :  { %4730 = vmatprep.mubr.msk.bf16.mxu1 %vm721_vm2, %v4864_v0 }
  0x59   :  { %4631 = vmatmul.mubr.msk.bf16.gmra.mrb[40].mxu0 %vm721_vm2, %v4815_v30 }
  0x5a   :  { %4634 = vmatprep.mubr.msk.bf16.mxu0 %vm721_vm2, %v4816_v31  ;;  %4731 = vmatmul.mubr.msk.bf16.gmra.mrb[40].mxu1 %vm721_vm2, %v4865_v2  ;;  %v4881_v31 = vld [vmem:[%s7222_s0 + $0x2b8] sm:$0xff]  }
  0x5b   :  { %4734 = vmatprep.mubr.msk.bf16.mxu1 %vm721_vm2, %v4866_v4 }
  0x61   :  { %4635 = vmatmul.mubr.msk.bf16.gmra.mrb[44].mxu0 %vm721_vm2, %v4817_v34 }
  0x62   :  { %4638 = vmatprep.mubr.msk.bf16.mxu0 %vm721_vm2, %v4818_v35  ;;  %4735 = vmatmul.mubr.msk.bf16.gmra.mrb[44].mxu1 %vm721_vm2, %v4867_v6 }
  0x63   :  { %4738 = vmatprep.mubr.msk.bf16.mxu1 %vm721_vm2, %v4868_v8 }
  0x69   :  { %4639 = vmatmul.mubr.msk.bf16.gmra.mrb[48].mxu0 %vm721_vm2, %v4819_v37 }
  0x6a   :  { %4642 = vmatprep.mubr.msk.bf16.mxu0 %vm721_vm2, %v4820_v39  ;;  %4739 = vmatmul.mubr.msk.bf16.gmra.mrb[48].mxu1 %vm721_vm2, %v4869_v10 }
  0x6b   :  { %4742 = vmatprep.mubr.msk.bf16.mxu1 %vm721_vm2, %v4870_v12 }
  0x71   :  { %4643 = vmatmul.mubr.msk.bf16.gmra.mrb[52].mxu0 %vm721_vm2, %v4821_v41 }
  0x72   :  { %4646 = vmatprep.mubr.msk.bf16.mxu0 %vm721_vm2, %v4822_v43  ;;  %4743 = vmatmul.mubr.msk.bf16.gmra.mrb[52].mxu1 %vm721_vm2, %v4871_v14 }
  0x73   :  { %4746 = vmatprep.mubr.msk.bf16.mxu1 %vm721_vm2, %v4872_v16 }
  0x79   :  { %4647 = vmatmul.mubr.msk.bf16.gmra.mrb[56].mxu0 %vm721_vm2, %v4823_v45 }
  0x7a   :  { %4650 = vmatprep.mubr.msk.bf16.mxu0 %vm721_vm2, %v4824_v47  ;;  %4747 = vmatmul.mubr.msk.bf16.gmra.mrb[56].mxu1 %vm721_vm2, %v4873_v18 }
  0x7b   :  { %4750 = vmatprep.mubr.msk.bf16.mxu1 %vm721_vm2, %v4874_v20 }
  0x81   :  { %4651 = vmatmul.mubr.msk.bf16.gmra.mrb[60].mxu0 %vm721_vm2, %v4825_v49 }
  0x82   :  { %4654 = vmatprep.mubr.msk.bf16.mxu0 %vm721_vm2, %v4826_v51  ;;  %4751 = vmatmul.mubr.msk.bf16.gmra.mrb[60].mxu1 %vm721_vm2, %v4875_v22  ;;  %v4885_v22 = vld [vmem:[%s7222_s0 + $0x2d8] sm:$0xff]  }
  0x83   :  { %4754 = vmatprep.mubr.msk.bf16.mxu1 %vm721_vm2, %v4876_v23 }
  0x89   :  { %4655 = vmatmul.mubr.msk.bf16.gmra.mrb[64].mxu0 %vm721_vm2, %v4827_v53 }
  0x8a   :  { %4658 = vmatprep.mubr.msk.bf16.mxu0 %vm721_vm2, %v4828_v55  ;;  %4755 = vmatmul.mubr.msk.bf16.gmra.mrb[64].mxu1 %vm721_vm2, %v4877_v24 }
  0x8b   :  { %4758 = vmatprep.mubr.msk.bf16.mxu1 %vm721_vm2, %v4878_v25 }
  0x91   :  { %4659 = vmatmul.mubr.msk.bf16.gmra.mrb[68].mxu0 %vm721_vm2, %v4829_v57  ;;  %v4883_v57 = vld [vmem:[%s7222_s0 + $0x2c8] sm:$0xff]  }
  0x92   :  { %4662 = vmatprep.mubr.msk.bf16.mxu0 %vm721_vm2, %v4830_v59  ;;  %4759 = vmatmul.mubr.msk.bf16.gmra.mrb[68].mxu1 %vm721_vm2, %v4879_v26 }
  0x93   :  { %4762 = vmatprep.mubr.msk.bf16.mxu1 %vm721_vm2, %v4880_v28 }
  0x99   :  { %4663 = vmatmul.mubr.msk.bf16.gmra.mrb[72].mxu0 %vm721_vm2, %v4831_v61 }
  0x9a   :  { %4666 = vmatprep.mubr.msk.bf16.mxu0 %vm721_vm2, %v4832_v63  ;;  %4763 = vmatmul.mubr.msk.bf16.gmra.mrb[72].mxu1 %vm721_vm2, %v4881_v31 }
  0x9b   :  { %4766 = vmatprep.mubr.msk.bf16.mxu1 %vm721_vm2, %v4882_v52  ;;  %v4887_v52 = vld [vmem:[%s7222_s0 + $0x2e8] sm:$0xff]  }
  0xa1   :  { %4667 = vmatmul.mubr.msk.bf16.gmra.mrb[76].mxu0 %vm721_vm2, %v4833_v1 }
  0xa2   :  { %4670 = vmatprep.mubr.msk.bf16.mxu0 %vm721_vm2, %v4834_v3  ;;  %4767 = vmatmul.mubr.msk.bf16.gmra.mrb[76].mxu1 %vm721_vm2, %v4883_v57 }
  0xa9   :  { %4671 = vmatmul.mubr.msk.bf16.gmra.mrb[80].mxu0 %vm721_vm2, %v4835_v5 }
  0xaa   :  { %4674 = vmatprep.mubr.msk.bf16.mxu0 %vm721_vm2, %v4836_v7 }
  0xb1   :  { %4675 = vmatmul.mubr.msk.bf16.gmra.mrb[84].mxu0 %vm721_vm2, %v4837_v9 }
  0xb2   :  { %4678 = vmatprep.mubr.msk.bf16.mxu0 %vm721_vm2, %v4838_v11 }
  0xb9   :  { %4679 = vmatmul.mubr.msk.bf16.gmra.mrb[88].mxu0 %vm721_vm2, %v4839_v13 }
  0xba   :  { %4682 = vmatprep.mubr.msk.bf16.mxu0 %vm721_vm2, %v4840_v15 }
  0xc1   :  { %4683 = vmatmul.mubr.msk.bf16.gmra.mrb[92].mxu0 %vm721_vm2, %v4841_v17  ;;  %v4884_v17 = vld [vmem:[%s7222_s0 + $0x2d0] sm:$0xff]  }
  0xc2   :  { %4686 = vmatprep.mubr.msk.bf16.mxu0 %vm721_vm2, %v4842_v19  ;;  %4770 = vmatprep.mubr.msk.bf16.mxu1 %vm721_vm2, %v4884_v17 }
  0xc3   :  { %4771 = vmatmul.mubr.msk.bf16.gmra.mrb[80].mxu1 %vm721_vm2, %v4885_v22 }
  0xc9   :  { %4687 = vmatmul.mubr.msk.bf16.gmra.mrb[96].mxu0 %vm721_vm2, %v4843_v21 }
  0xdc   :  { %v4592_v27 = vpop.f32.mrb[0].mxu0 }
  0xdd   :  { %v4289_v29 = vpack.c.bf16 %v4592_v27, %v4592_v27  ;;  %v1063_v30 = vpop.f32.mrb[1].mxu0  ;;  %v2270_v35 = vmul.f32 %v4592_v27, %v4592_v27  ;;  %v1866_v44 = vsel %vm1862_vm4, %v4592_v27, 0.0 }
  0xde   :  { %v2268_v32 = vmul.f32 %v1063_v30, %v1063_v30  ;;  %v4287_v33 = vpack.c.bf16 %v1063_v30, %v1063_v30  ;;  %v4593_v34 = vpop.f32.mrb[2].mxu0  ;;  %v1863_v38 = vsel %vm1862_vm4, %v1063_v30, 0.0 }
  0xdf   :  { %3680 = vst.msk [vmem:[%s7223_s2 + $0x8] sm:$0xf] %vm3677_vm3, %v4289_v29  ;;  %v4290_v36 = vpack.c.bf16 %v4593_v34, %v4593_v34  ;;  %v1066_v37 = vpop.f32.mrb[3].mxu0  ;;  %v2271_v42 = vmul.f32 %v4593_v34, %v4593_v34  ;;  %v2471_v49 = vsel %vm1862_vm4, %v2270_v35, 0.0  ;;  %v1868_v50 = vsel %vm1862_vm4, %v4593_v34, 0.0 }
  0xe0   :  { %3678 = vst.msk [vmem:[%s7223_s2] sm:$0xf] %vm3677_vm3, %v4287_v33  ;;  %v1864_v39 = vsel %vm1862_vm4, %v1066_v37, 0.0  ;;  %v2269_v40 = vmul.f32 %v1066_v37, %v1066_v37  ;;  %v4288_v41 = vpack.c.bf16 %v1066_v37, %v1066_v37  ;;  %v2468_v45 = vsel %vm1862_vm4, %v2268_v32, 0.0 }
  0xe1   :  { %3681 = vst.msk [vmem:[%s7223_s2 + $0xc] sm:$0xf] %vm3677_vm3, %v4290_v36  ;;  %v1865_v43 = vadd.f32 %v1864_v39, %v1863_v38  ;;  %v2473_v53 = vsel %vm1862_vm4, %v2271_v42, 0.0 }
  0xe2   :  { %v2469_v46 = vsel %vm1862_vm4, %v2269_v40, 0.0  ;;  %3679 = vst.msk [vmem:[%s7223_s2 + $0x4] sm:$0xf] %vm3677_vm3, %v4288_v41 }
  0xe3   :  { %v1867_v47 = vadd.f32 %v1866_v44, %v1865_v43  ;;  %v2470_v48 = vadd.f32 %v2469_v46, %v2468_v45 }
  0xe4   :  { %v4596_v51 = vpop.f32.mrb[4].mxu0 }
  0xe5   :  { %v1869_v54 = vadd.f32 %v1868_v50, %v1867_v47  ;;  %v2472_v55 = vadd.f32 %v2471_v49, %v2470_v48  ;;  %v1079_v56 = vpop.f32.mrb[5].mxu0  ;;  %v4293_v58 = vpack.c.bf16 %v4596_v51, %v4596_v51  ;;  %v2274_v2 = vmul.f32 %v4596_v51, %v4596_v51  ;;  %v4886_v47 = vld [vmem:[%s7222_s0 + $0x2e0] sm:$0xff]  }
  0xe6   :  { %v1870_v59 = vsel %vm1862_vm4, %v1079_v56, 0.0  ;;  %v2272_v60 = vmul.f32 %v1079_v56, %v1079_v56  ;;  %v4291_v61 = vpack.c.bf16 %v1079_v56, %v1079_v56  ;;  %v4597_v62 = vpop.f32.mrb[6].mxu0  ;;  %v1874_v10 = vsel %vm1862_vm4, %v4596_v51, 0.0  ;;  %4774 = vmatprep.mubr.msk.bf16.mxu1 %vm721_vm2, %v4886_v47 }
  0xe7   :  { %v2474_v63 = vadd.f32 %v2473_v53, %v2472_v55  ;;  %v1871_v0 = vadd.f32 %v1870_v59, %v1869_v54  ;;  %v1082_v1 = vpop.f32.mrb[7].mxu0  ;;  %3684 = vst.msk [vmem:[%s7223_s2 + $0x18] sm:$0xf] %vm3677_vm3, %v4293_v58  ;;  %v4294_v4 = vpack.c.bf16 %v4597_v62, %v4597_v62  ;;  %v2275_v11 = vmul.f32 %v4597_v62, %v4597_v62 }
  0xe8   :  { %v2475_v3 = vsel %vm1862_vm4, %v2272_v60, 0.0  ;;  %3682 = vst.msk [vmem:[%s7223_s2 + $0x10] sm:$0xf] %vm3677_vm3, %v4291_v61  ;;  %v1872_v5 = vsel %vm1862_vm4, %v1082_v1, 0.0  ;;  %v2273_v8 = vmul.f32 %v1082_v1, %v1082_v1  ;;  %v4292_v9 = vpack.c.bf16 %v1082_v1, %v1082_v1  ;;  %4775 = vmatmul.mubr.msk.bf16.gmra.mrb[84].mxu1 %vm721_vm2, %v4887_v52 }
  0xe9   :  { %v2476_v6 = vadd.f32 %v2475_v3, %v2474_v63  ;;  %v1873_v7 = vadd.f32 %v1872_v5, %v1871_v0  ;;  %3685 = vst.msk [vmem:[%s7223_s2 + $0x1c] sm:$0xf] %vm3677_vm3, %v4294_v4  ;;  %v1876_v14 = vsel %vm1862_vm4, %v4597_v62, 0.0  ;;  %v2479_v18 = vsel %vm1862_vm4, %v2274_v2, 0.0 }
  0xea   :  { %v2477_v13 = vsel %vm1862_vm4, %v2273_v8, 0.0  ;;  %3683 = vst.msk [vmem:[%s7223_s2 + $0x14] sm:$0xf] %vm3677_vm3, %v4292_v9  ;;  %v2481_v28 = vsel %vm1862_vm4, %v2275_v11, 0.0 }
  0xeb   :  { %v1875_v12 = vadd.f32 %v1874_v10, %v1873_v7  ;;  %v2478_v15 = vadd.f32 %v2477_v13, %v2476_v6  ;;  %v4888_v13 = vld [vmem:[%s7222_s0 + $0x2f0] sm:$0xff]  }
  0xec   :  { %v4600_v16 = vpop.f32.mrb[8].mxu0  ;;  %4778 = vmatprep.mubr.msk.bf16.mxu1 %vm721_vm2, %v4888_v13 }
  0xed   :  { %v1877_v19 = vadd.f32 %v1876_v14, %v1875_v12  ;;  %v4297_v20 = vpack.c.bf16 %v4600_v16, %v4600_v16  ;;  %v1095_v21 = vpop.f32.mrb[9].mxu0  ;;  %v2480_v23 = vadd.f32 %v2479_v18, %v2478_v15  ;;  %v2278_v35 = vmul.f32 %v4600_v16, %v4600_v16  ;;  %v4889_v18 = vld [vmem:[%s7222_s0 + $0x2f8] sm:$0xff]  }
  0xee   :  { %v1878_v24 = vsel %vm1862_vm4, %v1095_v21, 0.0  ;;  %v2276_v25 = vmul.f32 %v1095_v21, %v1095_v21  ;;  %v4295_v26 = vpack.c.bf16 %v1095_v21, %v1095_v21  ;;  %v4601_v27 = vpop.f32.mrb[10].mxu0  ;;  %v1882_v39 = vsel %vm1862_vm4, %v4600_v16, 0.0 }
  0xef   :  { %3688 = vst.msk [vmem:[%s7223_s2 + $0x28] sm:$0xf] %vm3677_vm3, %v4297_v20  ;;  %v1879_v29 = vadd.f32 %v1878_v24, %v1877_v19  ;;  %v1098_v30 = vpop.f32.mrb[11].mxu0  ;;  %v2482_v31 = vadd.f32 %v2481_v28, %v2480_v23  ;;  %v4298_v33 = vpack.c.bf16 %v4601_v27, %v4601_v27  ;;  %v2279_v41 = vmul.f32 %v4601_v27, %v4601_v27 }
  0xf0   :  { %v2483_v32 = vsel %vm1862_vm4, %v2276_v25, 0.0  ;;  %3686 = vst.msk [vmem:[%s7223_s2 + $0x20] sm:$0xf] %vm3677_vm3, %v4295_v26  ;;  %v1880_v34 = vsel %vm1862_vm4, %v1098_v30, 0.0  ;;  %v2277_v37 = vmul.f32 %v1098_v30, %v1098_v30  ;;  %v4296_v38 = vpack.c.bf16 %v1098_v30, %v1098_v30  ;;  %4779 = vmatmul.mubr.msk.bf16.gmra.mrb[88].mxu1 %vm721_vm2, %v4889_v18 }
  0xf1   :  { %v1881_v36 = vadd.f32 %v1880_v34, %v1879_v29  ;;  %v2484_v40 = vadd.f32 %v2483_v32, %v2482_v31  ;;  %3689 = vst.msk [vmem:[%s7223_s2 + $0x2c] sm:$0xf] %vm3677_vm3, %v4298_v33  ;;  %v1884_v44 = vsel %vm1862_vm4, %v4601_v27, 0.0  ;;  %v2487_v48 = vsel %vm1862_vm4, %v2278_v35, 0.0 }
  0xf2   :  { %v2485_v43 = vsel %vm1862_vm4, %v2277_v37, 0.0  ;;  %3687 = vst.msk [vmem:[%s7223_s2 + $0x24] sm:$0xf] %vm3677_vm3, %v4296_v38  ;;  %v2489_v58 = vsel %vm1862_vm4, %v2279_v41, 0.0 }
  0xf3   :  { %v1883_v42 = vadd.f32 %v1882_v39, %v1881_v36  ;;  %v2486_v45 = vadd.f32 %v2485_v43, %v2484_v40  ;;  %v4890_v43 = vld [vmem:[%s7222_s0 + $0x300] sm:$0xff]  }
  0xf4   :  { %v4604_v46 = vpop.f32.mrb[12].mxu0  ;;  %4782 = vmatprep.mubr.msk.bf16.mxu1 %vm721_vm2, %v4890_v43 }
  0xf5   :  { %v1885_v49 = vadd.f32 %v1884_v44, %v1883_v42  ;;  %v4301_v50 = vpack.c.bf16 %v4604_v46, %v4604_v46  ;;  %v1111_v51 = vpop.f32.mrb[13].mxu0  ;;  %v2488_v53 = vadd.f32 %v2487_v48, %v2486_v45  ;;  %v2282_v1 = vmul.f32 %v4604_v46, %v4604_v46  ;;  %v4891_v48 = vld [vmem:[%s7222_s0 + $0x308] sm:$0xff]  }
  0xf6   :  { %v1886_v54 = vsel %vm1862_vm4, %v1111_v51, 0.0  ;;  %v2280_v55 = vmul.f32 %v1111_v51, %v1111_v51  ;;  %v4299_v56 = vpack.c.bf16 %v1111_v51, %v1111_v51  ;;  %v4605_v57 = vpop.f32.mrb[14].mxu0  ;;  %v1890_v5 = vsel %vm1862_vm4, %v4604_v46, 0.0 }
  0xf7   :  { %3692 = vst.msk [vmem:[%s7223_s2 + $0x38] sm:$0xf] %vm3677_vm3, %v4301_v50  ;;  %v1887_v59 = vadd.f32 %v1886_v54, %v1885_v49  ;;  %v1114_v60 = vpop.f32.mrb[15].mxu0  ;;  %v2490_v61 = vadd.f32 %v2489_v58, %v2488_v53  ;;  %v4302_v63 = vpack.c.bf16 %v4605_v57, %v4605_v57  ;;  %v2283_v7 = vmul.f32 %v4605_v57, %v4605_v57 }
  0xf8   :  { %v2491_v62 = vsel %vm1862_vm4, %v2280_v55, 0.0  ;;  %3690 = vst.msk [vmem:[%s7223_s2 + $0x30] sm:$0xf] %vm3677_vm3, %v4299_v56  ;;  %v1888_v0 = vsel %vm1862_vm4, %v1114_v60, 0.0  ;;  %v2281_v3 = vmul.f32 %v1114_v60, %v1114_v60  ;;  %v4300_v4 = vpack.c.bf16 %v1114_v60, %v1114_v60  ;;  %4783 = vmatmul.mubr.msk.bf16.gmra.mrb[92].mxu1 %vm721_vm2, %v4891_v48 }
  0xf9   :  { %v1889_v2 = vadd.f32 %v1888_v0, %v1887_v59  ;;  %v2492_v6 = vadd.f32 %v2491_v62, %v2490_v61  ;;  %3693 = vst.msk [vmem:[%s7223_s2 + $0x3c] sm:$0xf] %vm3677_vm3, %v4302_v63  ;;  %v1892_v10 = vsel %vm1862_vm4, %v4605_v57, 0.0  ;;  %v2495_v14 = vsel %vm1862_vm4, %v2282_v1, 0.0 }
  0xfa   :  { %v2493_v9 = vsel %vm1862_vm4, %v2281_v3, 0.0  ;;  %3691 = vst.msk [vmem:[%s7223_s2 + $0x34] sm:$0xf] %vm3677_vm3, %v4300_v4  ;;  %v2497_v24 = vsel %vm1862_vm4, %v2283_v7, 0.0 }
  0xfb   :  { %v1891_v8 = vadd.f32 %v1890_v5, %v1889_v2  ;;  %v2494_v11 = vadd.f32 %v2493_v9, %v2492_v6  ;;  %v4892_v9 = vld [vmem:[%s7222_s0 + $0x310] sm:$0xff]  }
  0xfc   :  { %v4608_v12 = vpop.f32.mrb[16].mxu0  ;;  %4786 = vmatprep.mubr.msk.bf16.mxu1 %vm721_vm2, %v4892_v9 }
  0xfd   :  { %v1893_v15 = vadd.f32 %v1892_v10, %v1891_v8  ;;  %v4305_v16 = vpack.c.bf16 %v4608_v12, %v4608_v12  ;;  %v1127_v17 = vpop.f32.mrb[17].mxu0  ;;  %v2496_v19 = vadd.f32 %v2495_v14, %v2494_v11  ;;  %v2286_v31 = vmul.f32 %v4608_v12, %v4608_v12  ;;  %v4893_v14 = vld [vmem:[%s7222_s0 + $0x318] sm:$0xff]  }
  0xfe   :  { %v1894_v20 = vsel %vm1862_vm4, %v1127_v17, 0.0  ;;  %v2284_v21 = vmul.f32 %v1127_v17, %v1127_v17  ;;  %v4303_v22 = vpack.c.bf16 %v1127_v17, %v1127_v17  ;;  %v4609_v23 = vpop.f32.mrb[18].mxu0  ;;  %v1898_v35 = vsel %vm1862_vm4, %v4608_v12, 0.0 }
  0xff   :  { %3696 = vst.msk [vmem:[%s7223_s2 + $0x48] sm:$0xf] %vm3677_vm3, %v4305_v16  ;;  %v1895_v25 = vadd.f32 %v1894_v20, %v1893_v15  ;;  %v1130_v26 = vpop.f32.mrb[19].mxu0  ;;  %v2498_v27 = vadd.f32 %v2497_v24, %v2496_v19  ;;  %v4306_v29 = vpack.c.bf16 %v4609_v23, %v4609_v23  ;;  %v2287_v37 = vmul.f32 %v4609_v23, %v4609_v23 }
 0x100   :  { %v2499_v28 = vsel %vm1862_vm4, %v2284_v21, 0.0  ;;  %3694 = vst.msk [vmem:[%s7223_s2 + $0x40] sm:$0xf] %vm3677_vm3, %v4303_v22  ;;  %v1896_v30 = vsel %vm1862_vm4, %v1130_v26, 0.0  ;;  %v2285_v33 = vmul.f32 %v1130_v26, %v1130_v26  ;;  %v4304_v34 = vpack.c.bf16 %v1130_v26, %v1130_v26  ;;  %4787 = vmatmul.mubr.msk.bf16.gmra.mrb[96].mxu1 %vm721_vm2, %v4893_v14 }
 0x101   :  { %v1897_v32 = vadd.f32 %v1896_v30, %v1895_v25  ;;  %v2500_v36 = vadd.f32 %v2499_v28, %v2498_v27  ;;  %3697 = vst.msk [vmem:[%s7223_s2 + $0x4c] sm:$0xf] %vm3677_vm3, %v4306_v29  ;;  %v1900_v40 = vsel %vm1862_vm4, %v4609_v23, 0.0  ;;  %v2503_v44 = vsel %vm1862_vm4, %v2286_v31, 0.0 }
 0x102   :  { %v2501_v39 = vsel %vm1862_vm4, %v2285_v33, 0.0  ;;  %3695 = vst.msk [vmem:[%s7223_s2 + $0x44] sm:$0xf] %vm3677_vm3, %v4304_v34  ;;  %v2505_v54 = vsel %vm1862_vm4, %v2287_v37, 0.0 }
 0x103   :  { %v1899_v38 = vadd.f32 %v1898_v35, %v1897_v32  ;;  %v2502_v41 = vadd.f32 %v2501_v39, %v2500_v36 }
 0x104   :  { %v4612_v42 = vpop.f32.mrb[20].mxu0 }
 0x105   :  { %v1901_v45 = vadd.f32 %v1900_v40, %v1899_v38  ;;  %v4309_v46 = vpack.c.bf16 %v4612_v42, %v4612_v42  ;;  %v1143_v47 = vpop.f32.mrb[21].mxu0  ;;  %v2504_v49 = vadd.f32 %v2503_v44, %v2502_v41  ;;  %v2290_v61 = vmul.f32 %v4612_v42, %v4612_v42 }
 0x106   :  { %v1902_v50 = vsel %vm1862_vm4, %v1143_v47, 0.0  ;;  %v2288_v51 = vmul.f32 %v1143_v47, %v1143_v47  ;;  %v4307_v52 = vpack.c.bf16 %v1143_v47, %v1143_v47  ;;  %v4613_v53 = vpop.f32.mrb[22].mxu0  ;;  %v1906_v1 = vsel %vm1862_vm4, %v4612_v42, 0.0 }
 0x107   :  { %3700 = vst.msk [vmem:[%s7223_s2 + $0x58] sm:$0xf] %vm3677_vm3, %v4309_v46  ;;  %v1903_v55 = vadd.f32 %v1902_v50, %v1901_v45  ;;  %v1146_v56 = vpop.f32.mrb[23].mxu0  ;;  %v2506_v57 = vadd.f32 %v2505_v54, %v2504_v49  ;;  %v4310_v59 = vpack.c.bf16 %v4613_v53, %v4613_v53  ;;  %v2291_v3 = vmul.f32 %v4613_v53, %v4613_v53 }
 0x108   :  { %v2507_v58 = vsel %vm1862_vm4, %v2288_v51, 0.0  ;;  %3698 = vst.msk [vmem:[%s7223_s2 + $0x50] sm:$0xf] %vm3677_vm3, %v4307_v52  ;;  %v1904_v60 = vsel %vm1862_vm4, %v1146_v56, 0.0  ;;  %v2289_v63 = vmul.f32 %v1146_v56, %v1146_v56  ;;  %v4308_v0 = vpack.c.bf16 %v1146_v56, %v1146_v56 }
 0x109   :  { %v1905_v62 = vadd.f32 %v1904_v60, %v1903_v55  ;;  %v2508_v2 = vadd.f32 %v2507_v58, %v2506_v57  ;;  %3701 = vst.msk [vmem:[%s7223_s2 + $0x5c] sm:$0xf] %vm3677_vm3, %v4310_v59  ;;  %v1908_v6 = vsel %vm1862_vm4, %v4613_v53, 0.0  ;;  %v2511_v10 = vsel %vm1862_vm4, %v2290_v61, 0.0 }
 0x10a   :  { %v2509_v5 = vsel %vm1862_vm4, %v2289_v63, 0.0  ;;  %3699 = vst.msk [vmem:[%s7223_s2 + $0x54] sm:$0xf] %vm3677_vm3, %v4308_v0  ;;  %v2513_v20 = vsel %vm1862_vm4, %v2291_v3, 0.0 }
 0x10b   :  { %v1907_v4 = vadd.f32 %v1906_v1, %v1905_v62  ;;  %v2510_v7 = vadd.f32 %v2509_v5, %v2508_v2 }
 0x10c   :  { %v4616_v8 = vpop.f32.mrb[24].mxu0 }
 0x10d   :  { %v1909_v11 = vadd.f32 %v1908_v6, %v1907_v4  ;;  %v4313_v12 = vpack.c.bf16 %v4616_v8, %v4616_v8  ;;  %v1159_v13 = vpop.f32.mrb[25].mxu0  ;;  %v2512_v15 = vadd.f32 %v2511_v10, %v2510_v7  ;;  %v2294_v27 = vmul.f32 %v4616_v8, %v4616_v8 }
 0x10e   :  { %v1910_v16 = vsel %vm1862_vm4, %v1159_v13, 0.0  ;;  %v2292_v17 = vmul.f32 %v1159_v13, %v1159_v13  ;;  %v4311_v18 = vpack.c.bf16 %v1159_v13, %v1159_v13  ;;  %v4617_v19 = vpop.f32.mrb[26].mxu0  ;;  %v1914_v31 = vsel %vm1862_vm4, %v4616_v8, 0.0 }
 0x10f   :  { %3704 = vst.msk [vmem:[%s7223_s2 + $0x68] sm:$0xf] %vm3677_vm3, %v4313_v12  ;;  %v1911_v21 = vadd.f32 %v1910_v16, %v1909_v11  ;;  %v1162_v22 = vpop.f32.mrb[27].mxu0  ;;  %v2514_v23 = vadd.f32 %v2513_v20, %v2512_v15  ;;  %v4314_v25 = vpack.c.bf16 %v4617_v19, %v4617_v19  ;;  %v2295_v33 = vmul.f32 %v4617_v19, %v4617_v19 }
 0x110   :  { %v2515_v24 = vsel %vm1862_vm4, %v2292_v17, 0.0  ;;  %3702 = vst.msk [vmem:[%s7223_s2 + $0x60] sm:$0xf] %vm3677_vm3, %v4311_v18  ;;  %v1912_v26 = vsel %vm1862_vm4, %v1162_v22, 0.0  ;;  %v2293_v29 = vmul.f32 %v1162_v22, %v1162_v22  ;;  %v4312_v30 = vpack.c.bf16 %v1162_v22, %v1162_v22 }
 0x111   :  { %v1913_v28 = vadd.f32 %v1912_v26, %v1911_v21  ;;  %v2516_v32 = vadd.f32 %v2515_v24, %v2514_v23  ;;  %3705 = vst.msk [vmem:[%s7223_s2 + $0x6c] sm:$0xf] %vm3677_vm3, %v4314_v25  ;;  %v1916_v36 = vsel %vm1862_vm4, %v4617_v19, 0.0  ;;  %v2519_v39 = vsel %vm1862_vm4, %v2294_v27, 0.0  ;;  %v5526_v25 = vpop.f32.mrb[0].mxu1 }
 0x112   :  { %v2517_v35 = vsel %vm1862_vm4, %v2293_v29, 0.0  ;;  %3703 = vst.msk [vmem:[%s7223_s2 + $0x64] sm:$0xf] %vm3677_vm3, %v4312_v30  ;;  %v2521_v48 = vsel %vm1862_vm4, %v2295_v33, 0.0  ;;  %v5533_v29 = vpop.f32.mrb[1].mxu1 }
 0x113   :  { %v1915_v34 = vadd.f32 %v1914_v31, %v1913_v28  ;;  %v2518_v37 = vadd.f32 %v2517_v35, %v2516_v32  ;;  %v5536_v33 = vpop.f32.mrb[2].mxu1 }
 0x114   :  { %v4620_v38 = vpop.f32.mrb[28].mxu0 }
 0x115   :  { %v1917_v40 = vadd.f32 %v1916_v36, %v1915_v34  ;;  %v4317_v41 = vpack.c.bf16 %v4620_v38, %v4620_v38  ;;  %v1175_v42 = vpop.f32.mrb[29].mxu0  ;;  %v2520_v43 = vadd.f32 %v2519_v39, %v2518_v37  ;;  %v2298_v55 = vmul.f32 %v4620_v38, %v4620_v38 }
 0x116   :  { %v1918_v44 = vsel %vm1862_vm4, %v1175_v42, 0.0  ;;  %v2296_v45 = vmul.f32 %v1175_v42, %v1175_v42  ;;  %v4315_v46 = vpack.c.bf16 %v1175_v42, %v1175_v42  ;;  %v4621_v47 = vpop.f32.mrb[30].mxu0  ;;  %v1922_v59 = vsel %vm1862_vm4, %v4620_v38, 0.0  ;;  %v5539_v38 = vpop.f32.mrb[3].mxu1 }
 0x117   :  { %3708 = vst.msk [vmem:[%s7223_s2 + $0x78] sm:$0xf] %vm3677_vm3, %v4317_v41  ;;  %v1919_v49 = vadd.f32 %v1918_v44, %v1917_v40  ;;  %v1178_v50 = vpop.f32.mrb[31].mxu0  ;;  %v2522_v51 = vadd.f32 %v2521_v48, %v2520_v43  ;;  %v4318_v53 = vpack.c.bf16 %v4621_v47, %v4621_v47  ;;  %v2299_v61 = vmul.f32 %v4621_v47, %v4621_v47 }
 0x118   :  { %v2523_v52 = vsel %vm1862_vm4, %v2296_v45, 0.0  ;;  %3706 = vst.msk [vmem:[%s7223_s2 + $0x70] sm:$0xf] %vm3677_vm3, %v4315_v46  ;;  %v1920_v54 = vsel %vm1862_vm4, %v1178_v50, 0.0  ;;  %v2297_v57 = vmul.f32 %v1178_v50, %v1178_v50  ;;  %v4316_v58 = vpack.c.bf16 %v1178_v50, %v1178_v50 }
 0x119   :  { %v1921_v56 = vadd.f32 %v1920_v54, %v1919_v49  ;;  %v2524_v60 = vadd.f32 %v2523_v52, %v2522_v51  ;;  %3709 = vst.msk [vmem:[%s7223_s2 + $0x7c] sm:$0xf] %vm3677_vm3, %v4318_v53  ;;  %v1924_v0 = vsel %vm1862_vm4, %v4621_v47, 0.0  ;;  %v2527_v3 = vsel %vm1862_vm4, %v2298_v55, 0.0 }
 0x11a   :  { %v2525_v63 = vsel %vm1862_vm4, %v2297_v57, 0.0  ;;  %3707 = vst.msk [vmem:[%s7223_s2 + $0x74] sm:$0xf] %vm3677_vm3, %v4316_v58  ;;  %v2529_v12 = vsel %vm1862_vm4, %v2299_v61, 0.0  ;;  %v4389_v57 = vpack.c.bf16 %v5526_v25, %v5526_v25  ;;  %v5560_v58 = vpop.f32.mrb[4].mxu1 }
 0x11b   :  { %v1923_v62 = vadd.f32 %v1922_v59, %v1921_v56  ;;  %v2526_v1 = vadd.f32 %v2525_v63, %v2524_v60 }
 0x11c   :  { %v4624_v2 = vpop.f32.mrb[32].mxu0  ;;  %3780 = vst.msk [vmem:[%s7223_s2 + $0x198] sm:$0xf] %vm3677_vm3, %v4389_v57 }
 0x11d   :  { %v1925_v4 = vadd.f32 %v1924_v0, %v1923_v62  ;;  %v4321_v5 = vpack.c.bf16 %v4624_v2, %v4624_v2  ;;  %v1191_v6 = vpop.f32.mrb[33].mxu0  ;;  %v2528_v7 = vadd.f32 %v2527_v3, %v2526_v1  ;;  %v2302_v19 = vmul.f32 %v4624_v2, %v4624_v2  ;;  %v5567_v62 = vpop.f32.mrb[5].mxu1 }
 0x11e   :  { %v1926_v8 = vsel %vm1862_vm4, %v1191_v6, 0.0  ;;  %v2300_v9 = vmul.f32 %v1191_v6, %v1191_v6  ;;  %v4319_v10 = vpack.c.bf16 %v1191_v6, %v1191_v6  ;;  %v4625_v11 = vpop.f32.mrb[34].mxu0  ;;  %v1930_v23 = vsel %vm1862_vm4, %v4624_v2, 0.0  ;;  %v5576_v3 = vpop.f32.mrb[6].mxu1 }
 0x11f   :  { %3712 = vst.msk [vmem:[%s7223_s2 + $0x88] sm:$0xf] %vm3677_vm3, %v4321_v5  ;;  %v1927_v13 = vadd.f32 %v1926_v8, %v1925_v4  ;;  %v1194_v14 = vpop.f32.mrb[35].mxu0  ;;  %v2530_v15 = vadd.f32 %v2529_v12, %v2528_v7  ;;  %v4322_v17 = vpack.c.bf16 %v4625_v11, %v4625_v11  ;;  %v2303_v26 = vmul.f32 %v4625_v11, %v4625_v11  ;;  %v5579_v8 = vpop.f32.mrb[7].mxu1 }
 0x120   :  { %v2531_v16 = vsel %vm1862_vm4, %v2300_v9, 0.0  ;;  %3710 = vst.msk [vmem:[%s7223_s2 + $0x80] sm:$0xf] %vm3677_vm3, %v4319_v10  ;;  %v1928_v18 = vsel %vm1862_vm4, %v1194_v14, 0.0  ;;  %v2301_v21 = vmul.f32 %v1194_v14, %v1194_v14  ;;  %v4320_v22 = vpack.c.bf16 %v1194_v14, %v1194_v14 }
 0x121   :  { %v1929_v20 = vadd.f32 %v1928_v18, %v1927_v13  ;;  %v2532_v24 = vadd.f32 %v2531_v16, %v2530_v15  ;;  %3713 = vst.msk [vmem:[%s7223_s2 + $0x8c] sm:$0xf] %vm3677_vm3, %v4322_v17  ;;  %v1932_v30 = vsel %vm1862_vm4, %v4625_v11, 0.0  ;;  %v2535_v34 = vsel %vm1862_vm4, %v2302_v19, 0.0 }
 0x122   :  { %v2533_v28 = vsel %vm1862_vm4, %v2301_v21, 0.0  ;;  %3711 = vst.msk [vmem:[%s7223_s2 + $0x84] sm:$0xf] %vm3677_vm3, %v4320_v22  ;;  %v2537_v44 = vsel %vm1862_vm4, %v2303_v26, 0.0  ;;  %v4387_v2 = vpack.c.bf16 %v5533_v29, %v5533_v29 }
 0x123   :  { %v1931_v27 = vadd.f32 %v1930_v23, %v1929_v20  ;;  %v2534_v31 = vadd.f32 %v2533_v28, %v2532_v24  ;;  %v4390_v28 = vpack.c.bf16 %v5536_v33, %v5536_v33 }
 0x124   :  { %v4628_v32 = vpop.f32.mrb[36].mxu0  ;;  %3778 = vst.msk [vmem:[%s7223_s2 + $0x190] sm:$0xf] %vm3677_vm3, %v4387_v2 }
 0x125   :  { %v1933_v35 = vadd.f32 %v1932_v30, %v1931_v27  ;;  %v4325_v36 = vpack.c.bf16 %v4628_v32, %v4628_v32  ;;  %v1207_v37 = vpop.f32.mrb[37].mxu0  ;;  %v2536_v39 = vadd.f32 %v2535_v34, %v2534_v31  ;;  %v2306_v51 = vmul.f32 %v4628_v32, %v4628_v32  ;;  %v5604_v30 = vpop.f32.mrb[8].mxu1  ;;  %3781 = vst.msk [vmem:[%s7223_s2 + $0x19c] sm:$0xf] %vm3677_vm3, %v4390_v28 }
 0x126   :  { %v1934_v40 = vsel %vm1862_vm4, %v1207_v37, 0.0  ;;  %v2304_v41 = vmul.f32 %v1207_v37, %v1207_v37  ;;  %v4323_v42 = vpack.c.bf16 %v1207_v37, %v1207_v37  ;;  %v4629_v43 = vpop.f32.mrb[38].mxu0  ;;  %v1938_v55 = vsel %vm1862_vm4, %v4628_v32, 0.0 }
 0x127   :  { %3716 = vst.msk [vmem:[%s7223_s2 + $0x98] sm:$0xf] %vm3677_vm3, %v4325_v36  ;;  %v1935_v45 = vadd.f32 %v1934_v40, %v1933_v35  ;;  %v1210_v46 = vpop.f32.mrb[39].mxu0  ;;  %v2538_v47 = vadd.f32 %v2537_v44, %v2536_v39  ;;  %v4326_v49 = vpack.c.bf16 %v4629_v43, %v4629_v43  ;;  %v2307_v59 = vmul.f32 %v4629_v43, %v4629_v43  ;;  %v5611_v35 = vpop.f32.mrb[9].mxu1 }
 0x128   :  { %v2539_v48 = vsel %vm1862_vm4, %v2304_v41, 0.0  ;;  %3714 = vst.msk [vmem:[%s7223_s2 + $0x90] sm:$0xf] %vm3677_vm3, %v4323_v42  ;;  %v1936_v50 = vsel %vm1862_vm4, %v1210_v46, 0.0  ;;  %v2305_v53 = vmul.f32 %v1210_v46, %v1210_v46  ;;  %v4324_v54 = vpack.c.bf16 %v1210_v46, %v1210_v46  ;;  %v5620_v41 = vpop.f32.mrb[10].mxu1 }
 0x129   :  { %v1937_v52 = vadd.f32 %v1936_v50, %v1935_v45  ;;  %v2540_v56 = vadd.f32 %v2539_v48, %v2538_v47  ;;  %3717 = vst.msk [vmem:[%s7223_s2 + $0x9c] sm:$0xf] %vm3677_vm3, %v4326_v49  ;;  %v1940_v63 = vsel %vm1862_vm4, %v4629_v43, 0.0  ;;  %v2543_v4 = vsel %vm1862_vm4, %v2306_v51, 0.0  ;;  %v5623_v46 = vpop.f32.mrb[11].mxu1 }
 0x12a   :  { %v2541_v61 = vsel %vm1862_vm4, %v2305_v53, 0.0  ;;  %3715 = vst.msk [vmem:[%s7223_s2 + $0x94] sm:$0xf] %vm3677_vm3, %v4324_v54  ;;  %v2545_v14 = vsel %vm1862_vm4, %v2307_v59, 0.0  ;;  %v4388_v40 = vpack.c.bf16 %v5539_v38, %v5539_v38 }
 0x12b   :  { %v1939_v60 = vadd.f32 %v1938_v55, %v1937_v52  ;;  %v2542_v0 = vadd.f32 %v2541_v61, %v2540_v56 }
 0x12c   :  { %v4632_v1 = vpop.f32.mrb[40].mxu0  ;;  %3779 = vst.msk [vmem:[%s7223_s2 + $0x194] sm:$0xf] %vm3677_vm3, %v4388_v40 }
 0x12d   :  { %v4329_v5 = vpack.c.bf16 %v4632_v1, %v4632_v1  ;;  %v1223_v6 = vpop.f32.mrb[41].mxu0  ;;  %v1941_v7 = vadd.f32 %v1940_v63, %v1939_v60  ;;  %v2544_v9 = vadd.f32 %v2543_v4, %v2542_v0  ;;  %v2310_v21 = vmul.f32 %v4632_v1, %v4632_v1 }
 0x12e   :  { %v1942_v10 = vsel %vm1862_vm4, %v1223_v6, 0.0  ;;  %v2308_v11 = vmul.f32 %v1223_v6, %v1223_v6  ;;  %v4327_v12 = vpack.c.bf16 %v1223_v6, %v1223_v6  ;;  %v4633_v13 = vpop.f32.mrb[42].mxu0  ;;  %v1946_v26 = vsel %vm1862_vm4, %v4632_v1, 0.0 }
 0x12f   :  { %3720 = vst.msk [vmem:[%s7223_s2 + $0xa8] sm:$0xf] %vm3677_vm3, %v4329_v5  ;;  %v1943_v15 = vadd.f32 %v1942_v10, %v1941_v7  ;;  %v1226_v16 = vpop.f32.mrb[43].mxu0  ;;  %v2546_v17 = vadd.f32 %v2545_v14, %v2544_v9  ;;  %v4330_v19 = vpack.c.bf16 %v4633_v13, %v4633_v13  ;;  %v2311_v31 = vmul.f32 %v4633_v13, %v4633_v13  ;;  %v5648_v5 = vpop.f32.mrb[12].mxu1 }
 0x130   :  { %v2547_v18 = vsel %vm1862_vm4, %v2308_v11, 0.0  ;;  %3718 = vst.msk [vmem:[%s7223_s2 + $0xa0] sm:$0xf] %vm3677_vm3, %v4327_v12  ;;  %v1944_v20 = vsel %vm1862_vm4, %v1226_v16, 0.0  ;;  %v2309_v23 = vmul.f32 %v1226_v16, %v1226_v16  ;;  %v4328_v24 = vpack.c.bf16 %v1226_v16, %v1226_v16  ;;  %v5655_v10 = vpop.f32.mrb[13].mxu1 }
 0x131   :  { %v1945_v22 = vadd.f32 %v1944_v20, %v1943_v15  ;;  %v2548_v27 = vadd.f32 %v2547_v18, %v2546_v17  ;;  %3721 = vst.msk [vmem:[%s7223_s2 + $0xac] sm:$0xf] %vm3677_vm3, %v4330_v19  ;;  %v1948_v36 = vsel %vm1862_vm4, %v4633_v13, 0.0  ;;  %v2551_v42 = vsel %vm1862_vm4, %v2310_v21, 0.0  ;;  %v5664_v15 = vpop.f32.mrb[14].mxu1 }
 0x132   :  { %v2549_v34 = vsel %vm1862_vm4, %v2309_v23, 0.0  ;;  %3719 = vst.msk [vmem:[%s7223_s2 + $0xa4] sm:$0xf] %vm3677_vm3, %v4328_v24  ;;  %v2553_v52 = vsel %vm1862_vm4, %v2311_v31, 0.0  ;;  %v4393_v4 = vpack.c.bf16 %v5560_v58, %v5560_v58  ;;  %v4391_v14 = vpack.c.bf16 %v5567_v62, %v5567_v62  ;;  %7290 = vst [vmem:[#allocation2_spill] sm:$0xff] %v5664_v15  ;;  %v5667_v20 = vpop.f32.mrb[15].mxu1 }
 0x133   :  { %v1947_v32 = vadd.f32 %v1946_v26, %v1945_v22  ;;  %v2550_v37 = vadd.f32 %v2549_v34, %v2548_v27 }
 0x134   :  { %v4636_v39 = vpop.f32.mrb[44].mxu0  ;;  %3784 = vst.msk [vmem:[%s7223_s2 + $0x1a8] sm:$0xf] %vm3677_vm3, %v4393_v4  ;;  %3782 = vst.msk [vmem:[%s7223_s2 + $0x1a0] sm:$0xf] %vm3677_vm3, %v4391_v14 }
 0x135   :  { %v4333_v43 = vpack.c.bf16 %v4636_v39, %v4636_v39  ;;  %v1239_v44 = vpop.f32.mrb[45].mxu0  ;;  %v1949_v45 = vadd.f32 %v1948_v36, %v1947_v32  ;;  %v2552_v47 = vadd.f32 %v2551_v42, %v2550_v37  ;;  %v2314_v60 = vmul.f32 %v4636_v39, %v4636_v39 }
 0x136   :  { %v1950_v48 = vsel %vm1862_vm4, %v1239_v44, 0.0  ;;  %v2312_v49 = vmul.f32 %v1239_v44, %v1239_v44  ;;  %v4331_v50 = vpack.c.bf16 %v1239_v44, %v1239_v44  ;;  %v4637_v51 = vpop.f32.mrb[46].mxu0  ;;  %v1954_v1 = vsel %vm1862_vm4, %v4636_v39, 0.0 }
 0x137   :  { %3724 = vst.msk [vmem:[%s7223_s2 + $0xb8] sm:$0xf] %vm3677_vm3, %v4333_v43  ;;  %v1951_v53 = vadd.f32 %v1950_v48, %v1949_v45  ;;  %v1242_v54 = vpop.f32.mrb[47].mxu0  ;;  %v2554_v55 = vadd.f32 %v2553_v52, %v2552_v47  ;;  %v4334_v57 = vpack.c.bf16 %v4637_v51, %v4637_v51  ;;  %v2315_v6 = vmul.f32 %v4637_v51, %v4637_v51  ;;  %v5692_v48 = vpop.f32.mrb[16].mxu1 }
 0x138   :  { %v2555_v56 = vsel %vm1862_vm4, %v2312_v49, 0.0  ;;  %3722 = vst.msk [vmem:[%s7223_s2 + $0xb0] sm:$0xf] %vm3677_vm3, %v4331_v50  ;;  %v1952_v59 = vsel %vm1862_vm4, %v1242_v54, 0.0  ;;  %v2313_v63 = vmul.f32 %v1242_v54, %v1242_v54  ;;  %v4332_v0 = vpack.c.bf16 %v1242_v54, %v1242_v54  ;;  %7291 = vst [vmem:[#allocation3_spill] sm:$0xff] %v5692_v48  ;;  %v5699_v52 = vpop.f32.mrb[17].mxu1 }
 0x139   :  { %v1953_v61 = vadd.f32 %v1952_v59, %v1951_v53  ;;  %v2556_v2 = vadd.f32 %v2555_v56, %v2554_v55  ;;  %3725 = vst.msk [vmem:[%s7223_s2 + $0xbc] sm:$0xf] %vm3677_vm3, %v4334_v57  ;;  %v1956_v11 = vsel %vm1862_vm4, %v4637_v51, 0.0  ;;  %v2559_v16 = vsel %vm1862_vm4, %v2314_v60, 0.0  ;;  %7292 = vst [vmem:[#allocation4_spill] sm:$0xff] %v5699_v52  ;;  %v5708_v57 = vpop.f32.mrb[18].mxu1 }
 0x13a   :  { %v2557_v9 = vsel %vm1862_vm4, %v2313_v63, 0.0  ;;  %3723 = vst.msk [vmem:[%s7223_s2 + $0xb4] sm:$0xf] %vm3677_vm3, %v4332_v0  ;;  %v2561_v27 = vsel %vm1862_vm4, %v2315_v6, 0.0  ;;  %v4394_v47 = vpack.c.bf16 %v5576_v3, %v5576_v3  ;;  %v4392_v56 = vpack.c.bf16 %v5579_v8, %v5579_v8  ;;  %7293 = vst [vmem:[#allocation5_spill] sm:$0xff] %v5708_v57  ;;  %v5711_v0 = vpop.f32.mrb[19].mxu1 }
 0x13b   :  { %v1955_v7 = vadd.f32 %v1954_v1, %v1953_v61  ;;  %v2558_v12 = vadd.f32 %v2557_v9, %v2556_v2  ;;  %7294 = vst [vmem:[#allocation6_spill] sm:$0xff] %v5711_v0 }
 0x13c   :  { %v4640_v13 = vpop.f32.mrb[48].mxu0  ;;  %3785 = vst.msk [vmem:[%s7223_s2 + $0x1ac] sm:$0xf] %vm3677_vm3, %v4394_v47  ;;  %3783 = vst.msk [vmem:[%s7223_s2 + $0x1a4] sm:$0xf] %vm3677_vm3, %v4392_v56 }
 0x13d   :  { %v4337_v17 = vpack.c.bf16 %v4640_v13, %v4640_v13  ;;  %v1255_v18 = vpop.f32.mrb[49].mxu0  ;;  %v1957_v19 = vadd.f32 %v1956_v11, %v1955_v7  ;;  %v2560_v21 = vadd.f32 %v2559_v16, %v2558_v12  ;;  %v2318_v39 = vmul.f32 %v4640_v13, %v4640_v13 }
 0x13e   :  { %v1958_v22 = vsel %vm1862_vm4, %v1255_v18, 0.0  ;;  %v2316_v23 = vmul.f32 %v1255_v18, %v1255_v18  ;;  %v4335_v24 = vpack.c.bf16 %v1255_v18, %v1255_v18  ;;  %v4641_v26 = vpop.f32.mrb[50].mxu0  ;;  %v1962_v44 = vsel %vm1862_vm4, %v4640_v13, 0.0 }
 0x13f   :  { %3728 = vst.msk [vmem:[%s7223_s2 + $0xc8] sm:$0xf] %vm3677_vm3, %v4337_v17  ;;  %v1959_v28 = vadd.f32 %v1958_v22, %v1957_v19  ;;  %v1258_v31 = vpop.f32.mrb[51].mxu0  ;;  %v2562_v32 = vadd.f32 %v2561_v27, %v2560_v21  ;;  %v4338_v36 = vpack.c.bf16 %v4641_v26, %v4641_v26  ;;  %v2319_v49 = vmul.f32 %v4641_v26, %v4641_v26  ;;  %v5736_v27 = vpop.f32.mrb[20].mxu1 }
 0x140   :  { %v2563_v34 = vsel %vm1862_vm4, %v2316_v23, 0.0  ;;  %3726 = vst.msk [vmem:[%s7223_s2 + $0xc0] sm:$0xf] %vm3677_vm3, %v4335_v24  ;;  %v1960_v37 = vsel %vm1862_vm4, %v1258_v31, 0.0  ;;  %v2317_v42 = vmul.f32 %v1258_v31, %v1258_v31  ;;  %v4336_v43 = vpack.c.bf16 %v1258_v31, %v1258_v31  ;;  %7295 = vst [vmem:[#allocation7_spill] sm:$0xff] %v5736_v27 }
 0x141   :  { %v1961_v40 = vadd.f32 %v1960_v37, %v1959_v28  ;;  %v2564_v45 = vadd.f32 %v2563_v34, %v2562_v32  ;;  %3729 = vst.msk [vmem:[%s7223_s2 + $0xcc] sm:$0xf] %vm3677_vm3, %v4338_v36  ;;  %v1964_v53 = vsel %vm1862_vm4, %v4641_v26, 0.0  ;;  %v2567_v59 = vsel %vm1862_vm4, %v2318_v39, 0.0  ;;  %v5743_v34 = vpop.f32.mrb[21].mxu1 }
 0x142   :  { %v2565_v51 = vsel %vm1862_vm4, %v2317_v42, 0.0  ;;  %3727 = vst.msk [vmem:[%s7223_s2 + $0xc4] sm:$0xf] %vm3677_vm3, %v4336_v43  ;;  %v2569_v9 = vsel %vm1862_vm4, %v2319_v49, 0.0  ;;  %v4397_v26 = vpack.c.bf16 %v5604_v30, %v5604_v30  ;;  %7296 = vst [vmem:[#allocation8_spill] sm:$0xff] %v5743_v34  ;;  %v5752_v42 = vpop.f32.mrb[22].mxu1 }
 0x143   :  { %v1963_v50 = vadd.f32 %v1962_v44, %v1961_v40  ;;  %v2566_v54 = vadd.f32 %v2565_v51, %v2564_v45  ;;  %v4395_v40 = vpack.c.bf16 %v5611_v35, %v5611_v35  ;;  %7297 = vst [vmem:[#allocation9_spill] sm:$0xff] %v5752_v42  ;;  %v5755_v49 = vpop.f32.mrb[23].mxu1 }
 0x144   :  { %v4644_v55 = vpop.f32.mrb[52].mxu0  ;;  %3788 = vst.msk [vmem:[%s7223_s2 + $0x1b8] sm:$0xf] %vm3677_vm3, %v4397_v26  ;;  %7298 = vst [vmem:[#allocation10_spill] sm:$0xff] %v5755_v49 }
 0x145   :  { %v4341_v60 = vpack.c.bf16 %v4644_v55, %v4644_v55  ;;  %v1271_v61 = vpop.f32.mrb[53].mxu0  ;;  %v1965_v63 = vadd.f32 %v1964_v53, %v1963_v50  ;;  %v2568_v1 = vadd.f32 %v2567_v59, %v2566_v54  ;;  %v2322_v18 = vmul.f32 %v4644_v55, %v4644_v55  ;;  %3786 = vst.msk [vmem:[%s7223_s2 + $0x1b0] sm:$0xf] %vm3677_vm3, %v4395_v40 }
 0x146   :  { %v1966_v2 = vsel %vm1862_vm4, %v1271_v61, 0.0  ;;  %v2320_v4 = vmul.f32 %v1271_v61, %v1271_v61  ;;  %v4339_v6 = vpack.c.bf16 %v1271_v61, %v1271_v61  ;;  %v4645_v7 = vpop.f32.mrb[54].mxu0  ;;  %v1970_v23 = vsel %vm1862_vm4, %v4644_v55, 0.0 }
 0x147   :  { %3732 = vst.msk [vmem:[%s7223_s2 + $0xd8] sm:$0xf] %vm3677_vm3, %v4341_v60  ;;  %v1967_v11 = vadd.f32 %v1966_v2, %v1965_v63  ;;  %v1274_v12 = vpop.f32.mrb[55].mxu0  ;;  %v2570_v13 = vadd.f32 %v2569_v9, %v2568_v1  ;;  %v4342_v16 = vpack.c.bf16 %v4645_v7, %v4645_v7  ;;  %v2323_v28 = vmul.f32 %v4645_v7, %v4645_v7 }
 0x148   :  { %v2571_v14 = vsel %vm1862_vm4, %v2320_v4, 0.0  ;;  %3730 = vst.msk [vmem:[%s7223_s2 + $0xd0] sm:$0xf] %vm3677_vm3, %v4339_v6  ;;  %v1968_v17 = vsel %vm1862_vm4, %v1274_v12, 0.0  ;;  %v2321_v21 = vmul.f32 %v1274_v12, %v1274_v12  ;;  %v4340_v22 = vpack.c.bf16 %v1274_v12, %v1274_v12 }
 0x149   :  { %v1969_v19 = vadd.f32 %v1968_v17, %v1967_v11  ;;  %v2572_v24 = vadd.f32 %v2571_v14, %v2570_v13  ;;  %3733 = vst.msk [vmem:[%s7223_s2 + $0xdc] sm:$0xf] %vm3677_vm3, %v4342_v16  ;;  %v1972_v36 = vsel %vm1862_vm4, %v4645_v7, 0.0  ;;  %v2575_v43 = vsel %vm1862_vm4, %v2322_v18, 0.0  ;;  %v5780_v14 = vpop.f32.mrb[24].mxu1 }
 0x14a   :  { %v2573_v32 = vsel %vm1862_vm4, %v2321_v21, 0.0  ;;  %3731 = vst.msk [vmem:[%s7223_s2 + $0xd4] sm:$0xf] %vm3677_vm3, %v4340_v22  ;;  %v2577_v56 = vsel %vm1862_vm4, %v2323_v28, 0.0  ;;  %v4398_v13 = vpack.c.bf16 %v5620_v41, %v5620_v41  ;;  %7299 = vst [vmem:[#allocation11_spill] sm:$0xff] %v5780_v14 }
 0x14b   :  { %v1971_v31 = vadd.f32 %v1970_v23, %v1969_v19  ;;  %v2574_v37 = vadd.f32 %v2573_v32, %v2572_v24  ;;  %v5787_v19 = vpop.f32.mrb[25].mxu1  ;;  %v4396_v24 = vpack.c.bf16 %v5623_v46, %v5623_v46 }
 0x14c   :  { %v4648_v39 = vpop.f32.mrb[56].mxu0  ;;  %7300 = vst [vmem:[#allocation12_spill] sm:$0xff] %v5787_v19  ;;  %3789 = vst.msk [vmem:[%s7223_s2 + $0x1bc] sm:$0xf] %vm3677_vm3, %v4398_v13  ;;  %v5796_v26 = vpop.f32.mrb[26].mxu1 }
 0x14d   :  { %v4345_v44 = vpack.c.bf16 %v4648_v39, %v4648_v39  ;;  %v1287_v45 = vpop.f32.mrb[57].mxu0  ;;  %v1973_v47 = vadd.f32 %v1972_v36, %v1971_v31  ;;  %v2576_v50 = vadd.f32 %v2575_v43, %v2574_v37  ;;  %v2326_v4 = vmul.f32 %v4648_v39, %v4648_v39  ;;  %7301 = vst [vmem:[#allocation13_spill] sm:$0xff] %v5796_v26  ;;  %v5799_v37 = vpop.f32.mrb[27].mxu1 }
 0x14e   :  { %v1974_v51 = vsel %vm1862_vm4, %v1287_v45, 0.0  ;;  %v2324_v53 = vmul.f32 %v1287_v45, %v1287_v45  ;;  %v4343_v54 = vpack.c.bf16 %v1287_v45, %v1287_v45  ;;  %v4649_v55 = vpop.f32.mrb[58].mxu0  ;;  %v1978_v11 = vsel %vm1862_vm4, %v4648_v39, 0.0  ;;  %7302 = vst [vmem:[#allocation14_spill] sm:$0xff] %v5799_v37  ;;  %3787 = vst.msk [vmem:[%s7223_s2 + $0x1b4] sm:$0xf] %vm3677_vm3, %v4396_v24 }
 0x14f   :  { %3736 = vst.msk [vmem:[%s7223_s2 + $0xe8] sm:$0xf] %vm3677_vm3, %v4345_v44  ;;  %v1975_v59 = vadd.f32 %v1974_v51, %v1973_v47  ;;  %v1290_v60 = vpop.f32.mrb[59].mxu0  ;;  %v2578_v61 = vadd.f32 %v2577_v56, %v2576_v50  ;;  %v4346_v1 = vpack.c.bf16 %v4649_v55, %v4649_v55  ;;  %v2327_v16 = vmul.f32 %v4649_v55, %v4649_v55 }
 0x150   :  { %v2579_v63 = vsel %vm1862_vm4, %v2324_v53, 0.0  ;;  %3734 = vst.msk [vmem:[%s7223_s2 + $0xe0] sm:$0xf] %vm3677_vm3, %v4343_v54  ;;  %v1976_v2 = vsel %vm1862_vm4, %v1290_v60, 0.0  ;;  %v2325_v7 = vmul.f32 %v1290_v60, %v1290_v60  ;;  %v4344_v9 = vpack.c.bf16 %v1290_v60, %v1290_v60 }
 0x151   :  { %v1977_v6 = vadd.f32 %v1976_v2, %v1975_v59  ;;  %v2580_v12 = vadd.f32 %v2579_v63, %v2578_v61  ;;  %3737 = vst.msk [vmem:[%s7223_s2 + $0xec] sm:$0xf] %vm3677_vm3, %v4346_v1  ;;  %v1980_v21 = vsel %vm1862_vm4, %v4649_v55, 0.0  ;;  %v2583_v28 = vsel %vm1862_vm4, %v2326_v4, 0.0 }
 0x152   :  { %v2581_v18 = vsel %vm1862_vm4, %v2325_v7, 0.0  ;;  %3735 = vst.msk [vmem:[%s7223_s2 + $0xe4] sm:$0xf] %vm3677_vm3, %v4344_v9  ;;  %v2585_v47 = vsel %vm1862_vm4, %v2327_v16, 0.0  ;;  %v4401_v4 = vpack.c.bf16 %v5648_v5, %v5648_v5 }
 0x153   :  { %v1979_v17 = vadd.f32 %v1978_v11, %v1977_v6  ;;  %v2582_v22 = vadd.f32 %v2581_v18, %v2580_v12  ;;  %v5824_v6 = vpop.f32.mrb[28].mxu1  ;;  %v4399_v18 = vpack.c.bf16 %v5655_v10, %v5655_v10 }
 0x154   :  { %v4652_v23 = vpop.f32.mrb[60].mxu0  ;;  %7303 = vst [vmem:[#allocation15_spill] sm:$0xff] %v5824_v6  ;;  %v5831_v12 = vpop.f32.mrb[29].mxu1  ;;  %3792 = vst.msk [vmem:[%s7223_s2 + $0x1c8] sm:$0xf] %vm3677_vm3, %v4401_v4 }
 0x155   :  { %v4349_v31 = vpack.c.bf16 %v4652_v23, %v4652_v23  ;;  %v1303_v32 = vpop.f32.mrb[61].mxu0  ;;  %v1981_v36 = vadd.f32 %v1980_v21, %v1979_v17  ;;  %v2584_v39 = vadd.f32 %v2583_v28, %v2582_v22  ;;  %v2330_v59 = vmul.f32 %v4652_v23, %v4652_v23  ;;  %7304 = vst [vmem:[#allocation16_spill] sm:$0xff] %v5831_v12  ;;  %v5840_v21 = vpop.f32.mrb[30].mxu1 }
 0x156   :  { %v1982_v40 = vsel %vm1862_vm4, %v1303_v32, 0.0  ;;  %v2328_v43 = vmul.f32 %v1303_v32, %v1303_v32  ;;  %v4347_v44 = vpack.c.bf16 %v1303_v32, %v1303_v32  ;;  %v4653_v45 = vpop.f32.mrb[62].mxu0  ;;  %v1986_v1 = vsel %vm1862_vm4, %v4652_v23, 0.0  ;;  %3790 = vst.msk [vmem:[%s7223_s2 + $0x1c0] sm:$0xf] %vm3677_vm3, %v4399_v18 }
 0x157   :  { %3740 = vst.msk [vmem:[%s7223_s2 + $0xf8] sm:$0xf] %vm3677_vm3, %v4349_v31  ;;  %v1983_v50 = vadd.f32 %v1982_v40, %v1981_v36  ;;  %v1306_v51 = vpop.f32.mrb[63].mxu0  ;;  %v2586_v53 = vadd.f32 %v2585_v47, %v2584_v39  ;;  %v4350_v55 = vpack.c.bf16 %v4653_v45, %v4653_v45  ;;  %v2331_v7 = vmul.f32 %v4653_v45, %v4653_v45  ;;  %v5843_v31 = vpop.f32.mrb[31].mxu1 }
 0x158   :  { %v2587_v54 = vsel %vm1862_vm4, %v2328_v43, 0.0  ;;  %3738 = vst.msk [vmem:[%s7223_s2 + $0xf0] sm:$0xf] %vm3677_vm3, %v4347_v44  ;;  %v1984_v56 = vsel %vm1862_vm4, %v1306_v51, 0.0  ;;  %v2329_v61 = vmul.f32 %v1306_v51, %v1306_v51  ;;  %v4348_v63 = vpack.c.bf16 %v1306_v51, %v1306_v51 }
 0x159   :  { %v1985_v60 = vadd.f32 %v1984_v56, %v1983_v50  ;;  %v2588_v2 = vadd.f32 %v2587_v54, %v2586_v53  ;;  %3741 = vst.msk [vmem:[%s7223_s2 + $0xfc] sm:$0xf] %vm3677_vm3, %v4350_v55  ;;  %v1988_v13 = vsel %vm1862_vm4, %v4653_v45, 0.0  ;;  %v2591_v22 = vsel %vm1862_vm4, %v2330_v59, 0.0 }
 0x15a   :  { %v2589_v11 = vsel %vm1862_vm4, %v2329_v61, 0.0  ;;  %3739 = vst.msk [vmem:[%s7223_s2 + $0xf4] sm:$0xf] %vm3677_vm3, %v4348_v63  ;;  %v2593_v44 = vsel %vm1862_vm4, %v2331_v7, 0.0  ;;  %v4400_v18 = vpack.c.bf16 %v5667_v20, %v5667_v20 }
 0x15b   :  { %v1987_v9 = vadd.f32 %v1986_v1, %v1985_v60  ;;  %v2590_v16 = vadd.f32 %v2589_v11, %v2588_v2  ;;  %v4402_v1 = vpack.c.bf16 %v5664_v15, %v5664_v15  ;;  %v5868_v2 = vpop.f32.mrb[32].mxu1 }
 0x15c   :  { %v4656_v17 = vpop.f32.mrb[64].mxu0  ;;  %v5875_v11 = vpop.f32.mrb[33].mxu1  ;;  %3791 = vst.msk [vmem:[%s7223_s2 + $0x1c4] sm:$0xf] %vm3677_vm3, %v4400_v18 }
 0x15d   :  { %v4353_v23 = vpack.c.bf16 %v4656_v17, %v4656_v17  ;;  %v1319_v24 = vpop.f32.mrb[65].mxu0  ;;  %v1989_v28 = vadd.f32 %v1988_v13, %v1987_v9  ;;  %v2592_v32 = vadd.f32 %v2591_v22, %v2590_v16  ;;  %v2334_v55 = vmul.f32 %v4656_v17, %v4656_v17  ;;  %3793 = vst.msk [vmem:[%s7223_s2 + $0x1cc] sm:$0xf] %vm3677_vm3, %v4402_v1  ;;  %v5884_v22 = vpop.f32.mrb[34].mxu1 }
 0x15e   :  { %v1990_v36 = vsel %vm1862_vm4, %v1319_v24, 0.0  ;;  %v2332_v39 = vmul.f32 %v1319_v24, %v1319_v24  ;;  %v4351_v40 = vpack.c.bf16 %v1319_v24, %v1319_v24  ;;  %v4657_v43 = vpop.f32.mrb[66].mxu0  ;;  %v1994_v61 = vsel %vm1862_vm4, %v4656_v17, 0.0 }
 0x15f   :  { %3744 = vst.msk [vmem:[%s7223_s2 + $0x108] sm:$0xf] %vm3677_vm3, %v4353_v23  ;;  %v1991_v45 = vadd.f32 %v1990_v36, %v1989_v28  ;;  %v1322_v47 = vpop.f32.mrb[67].mxu0  ;;  %v2594_v50 = vadd.f32 %v2593_v44, %v2592_v32  ;;  %v4354_v53 = vpack.c.bf16 %v4657_v43, %v4657_v43  ;;  %v2335_v4 = vmul.f32 %v4657_v43, %v4657_v43  ;;  %v5887_v36 = vpop.f32.mrb[35].mxu1 }
 0x160   :  { %v2595_v51 = vsel %vm1862_vm4, %v2332_v39, 0.0  ;;  %3742 = vst.msk [vmem:[%s7223_s2 + $0x100] sm:$0xf] %vm3677_vm3, %v4351_v40  ;;  %v1992_v54 = vsel %vm1862_vm4, %v1322_v47, 0.0  ;;  %v2333_v59 = vmul.f32 %v1322_v47, %v1322_v47  ;;  %v4352_v60 = vpack.c.bf16 %v1322_v47, %v1322_v47 }
 0x161   :  { %v1993_v56 = vadd.f32 %v1992_v54, %v1991_v45  ;;  %v2596_v63 = vadd.f32 %v2595_v51, %v2594_v50  ;;  %3745 = vst.msk [vmem:[%s7223_s2 + $0x10c] sm:$0xf] %vm3677_vm3, %v4354_v53  ;;  %v1996_v13 = vsel %vm1862_vm4, %v4657_v43, 0.0  ;;  %v2599_v23 = vsel %vm1862_vm4, %v2334_v55, 0.0 }
 0x162   :  { %v2597_v9 = vsel %vm1862_vm4, %v2333_v59, 0.0  ;;  %3743 = vst.msk [vmem:[%s7223_s2 + $0x104] sm:$0xf] %vm3677_vm3, %v4352_v60  ;;  %v2601_v47 = vsel %vm1862_vm4, %v2335_v4, 0.0 }
 0x163   :  { %v1995_v7 = vadd.f32 %v1994_v61, %v1993_v56  ;;  %v2598_v16 = vadd.f32 %v2597_v9, %v2596_v63  ;;  %v5912_v9 = vpop.f32.mrb[36].mxu1 }
 0x164   :  { %v4660_v17 = vpop.f32.mrb[68].mxu0 }
 0x165   :  { %v4357_v24 = vpack.c.bf16 %v4660_v17, %v4660_v17  ;;  %v1335_v28 = vpop.f32.mrb[69].mxu0  ;;  %v1997_v32 = vadd.f32 %v1996_v13, %v1995_v7  ;;  %v2600_v39 = vadd.f32 %v2599_v23, %v2598_v16  ;;  %v2338_v59 = vmul.f32 %v4660_v17, %v4660_v17 }
 0x166   :  { %v1998_v40 = vsel %vm1862_vm4, %v1335_v28, 0.0  ;;  %v2336_v43 = vmul.f32 %v1335_v28, %v1335_v28  ;;  %v4355_v44 = vpack.c.bf16 %v1335_v28, %v1335_v28  ;;  %v4661_v45 = vpop.f32.mrb[70].mxu0  ;;  %v2002_v1 = vsel %vm1862_vm4, %v4660_v17, 0.0  ;;  %v5919_v17 = vpop.f32.mrb[37].mxu1 }
 0x167   :  { %3748 = vst.msk [vmem:[%s7223_s2 + $0x118] sm:$0xf] %vm3677_vm3, %v4357_v24  ;;  %v1999_v50 = vadd.f32 %v1998_v40, %v1997_v32  ;;  %v1338_v51 = vpop.f32.mrb[71].mxu0  ;;  %v2602_v53 = vadd.f32 %v2601_v47, %v2600_v39  ;;  %v4358_v55 = vpack.c.bf16 %v4661_v45, %v4661_v45  ;;  %v4405_v7 = vpack.c.bf16 %v5692_v48, %v5692_v48  ;;  %v5928_v39 = vpop.f32.mrb[38].mxu1 }
 0x168   :  { %v2603_v54 = vsel %vm1862_vm4, %v2336_v43, 0.0  ;;  %3746 = vst.msk [vmem:[%s7223_s2 + $0x110] sm:$0xf] %vm3677_vm3, %v4355_v44  ;;  %v2000_v56 = vsel %vm1862_vm4, %v1338_v51, 0.0  ;;  %v2337_v61 = vmul.f32 %v1338_v51, %v1338_v51  ;;  %v4356_v63 = vpack.c.bf16 %v1338_v51, %v1338_v51 }
 0x169   :  { %v2001_v60 = vadd.f32 %v2000_v56, %v1999_v50  ;;  %v2604_v4 = vadd.f32 %v2603_v54, %v2602_v53  ;;  %3749 = vst.msk [vmem:[%s7223_s2 + $0x11c] sm:$0xf] %vm3677_vm3, %v4358_v55  ;;  %v2339_v13 = vmul.f32 %v4661_v45, %v4661_v45  ;;  %v2004_v23 = vsel %vm1862_vm4, %v4661_v45, 0.0  ;;  %3796 = vst.msk [vmem:[%s7223_s2 + $0x1d8] sm:$0xf] %vm3677_vm3, %v4405_v7  ;;  %v5931_v50 = vpop.f32.mrb[39].mxu1 }
 0x16a   :  { %v2605_v18 = vsel %vm1862_vm4, %v2337_v61, 0.0  ;;  %3747 = vst.msk [vmem:[%s7223_s2 + $0x114] sm:$0xf] %vm3677_vm3, %v4356_v63  ;;  %v4403_v32 = vpack.c.bf16 %v5699_v52, %v5699_v52  ;;  %v2607_v40 = vsel %vm1862_vm4, %v2338_v59, 0.0 }
 0x16b   :  { %v2003_v16 = vadd.f32 %v2002_v1, %v2001_v60  ;;  %v2606_v24 = vadd.f32 %v2605_v18, %v2604_v4  ;;  %v2609_v56 = vsel %vm1862_vm4, %v2339_v13, 0.0 }
 0x16c   :  { %v4664_v28 = vpop.f32.mrb[72].mxu0  ;;  %3794 = vst.msk [vmem:[%s7223_s2 + $0x1d0] sm:$0xf] %vm3677_vm3, %v4403_v32  ;;  %v4406_v32 = vpack.c.bf16 %v5708_v57, %v5708_v57 }
 0x16d   :  { %v4361_v43 = vpack.c.bf16 %v4664_v28, %v4664_v28  ;;  %v1351_v44 = vpop.f32.mrb[73].mxu0  ;;  %v2005_v47 = vadd.f32 %v2004_v23, %v2003_v16  ;;  %v2608_v45 = vadd.f32 %v2607_v40, %v2606_v24  ;;  %v2342_v7 = vmul.f32 %v4664_v28, %v4664_v28  ;;  %v5956_v40 = vpop.f32.mrb[40].mxu1 }
 0x16e   :  { %v2006_v51 = vsel %vm1862_vm4, %v1351_v44, 0.0  ;;  %v2340_v53 = vmul.f32 %v1351_v44, %v1351_v44  ;;  %v4359_v54 = vpack.c.bf16 %v1351_v44, %v1351_v44  ;;  %v4665_v55 = vpop.f32.mrb[74].mxu0  ;;  %v2010_v23 = vsel %vm1862_vm4, %v4664_v28, 0.0  ;;  %v5963_v28 = vpop.f32.mrb[41].mxu1  ;;  %3797 = vst.msk [vmem:[%s7223_s2 + $0x1dc] sm:$0xf] %vm3677_vm3, %v4406_v32 }
 0x16f   :  { %3752 = vst.msk [vmem:[%s7223_s2 + $0x128] sm:$0xf] %vm3677_vm3, %v4361_v43  ;;  %v2007_v59 = vadd.f32 %v2006_v51, %v2005_v47  ;;  %v1354_v60 = vpop.f32.mrb[75].mxu0  ;;  %v2610_v61 = vadd.f32 %v2609_v56, %v2608_v45  ;;  %v4362_v1 = vpack.c.bf16 %v4665_v55, %v4665_v55  ;;  %v2343_v43 = vmul.f32 %v4665_v55, %v4665_v55  ;;  %v5972_v56 = vpop.f32.mrb[42].mxu1 }
 0x170   :  { %v2611_v63 = vsel %vm1862_vm4, %v2340_v53, 0.0  ;;  %3750 = vst.msk [vmem:[%s7223_s2 + $0x120] sm:$0xf] %vm3677_vm3, %v4359_v54  ;;  %v2008_v4 = vsel %vm1862_vm4, %v1354_v60, 0.0  ;;  %v2341_v16 = vmul.f32 %v1354_v60, %v1354_v60  ;;  %v4360_v18 = vpack.c.bf16 %v1354_v60, %v1354_v60 }
 0x171   :  { %v2009_v13 = vadd.f32 %v2008_v4, %v2007_v59  ;;  %v2612_v24 = vadd.f32 %v2611_v63, %v2610_v61  ;;  %3753 = vst.msk [vmem:[%s7223_s2 + $0x12c] sm:$0xf] %vm3677_vm3, %v4362_v1  ;;  %v2012_v45 = vsel %vm1862_vm4, %v4665_v55, 0.0  ;;  %v4404_v54 = vpack.c.bf16 %v5711_v0, %v5711_v0  ;;  %v5975_v1 = vpop.f32.mrb[43].mxu1 }
 0x172   :  { %v2613_v47 = vsel %vm1862_vm4, %v2341_v16, 0.0  ;;  %3751 = vst.msk [vmem:[%s7223_s2 + $0x124] sm:$0xf] %vm3677_vm3, %v4360_v18  ;;  %v2615_v59 = vsel %vm1862_vm4, %v2342_v7, 0.0 }
 0x173   :  { %v2011_v44 = vadd.f32 %v2010_v23, %v2009_v13  ;;  %v2614_v51 = vadd.f32 %v2613_v47, %v2612_v24  ;;  %3795 = vst.msk [vmem:[%s7223_s2 + $0x1d4] sm:$0xf] %vm3677_vm3, %v4404_v54  ;;  %v2617_v23 = vsel %vm1862_vm4, %v2343_v43, 0.0 }
 0x174   :  { %v4668_v53 = vpop.f32.mrb[76].mxu0 }
 0x175   :  { %v4365_v60 = vpack.c.bf16 %v4668_v53, %v4668_v53  ;;  %v1367_v61 = vpop.f32.mrb[77].mxu0  ;;  %v2013_v63 = vadd.f32 %v2012_v45, %v2011_v44  ;;  %v2616_v55 = vadd.f32 %v2615_v59, %v2614_v51  ;;  %v2346_v51 = vmul.f32 %v4668_v53, %v4668_v53 }
 0x176   :  { %v2014_v4 = vsel %vm1862_vm4, %v1367_v61, 0.0  ;;  %v2344_v13 = vmul.f32 %v1367_v61, %v1367_v61  ;;  %v4363_v16 = vpack.c.bf16 %v1367_v61, %v1367_v61  ;;  %v4669_v18 = vpop.f32.mrb[78].mxu0  ;;  %v2018_v61 = vsel %vm1862_vm4, %v4668_v53, 0.0 }
 0x177   :  { %3756 = vst.msk [vmem:[%s7223_s2 + $0x138] sm:$0xf] %vm3677_vm3, %v4365_v60  ;;  %v2015_v7 = vadd.f32 %v2014_v4, %v2013_v63  ;;  %v1370_v24 = vpop.f32.mrb[79].mxu0  ;;  %v2618_v32 = vadd.f32 %v2617_v23, %v2616_v55  ;;  %v4366_v47 = vpack.c.bf16 %v4669_v18, %v4669_v18  ;;  %v4409_v63 = vpack.c.bf16 %v5736_v27, %v5736_v27  ;;  %v6000_v55 = vpop.f32.mrb[44].mxu1 }
 0x178   :  { %v2619_v44 = vsel %vm1862_vm4, %v2344_v13, 0.0  ;;  %3754 = vst.msk [vmem:[%s7223_s2 + $0x130] sm:$0xf] %vm3677_vm3, %v4363_v16  ;;  %v2016_v45 = vsel %vm1862_vm4, %v1370_v24, 0.0  ;;  %v2345_v54 = vmul.f32 %v1370_v24, %v1370_v24  ;;  %v4364_v59 = vpack.c.bf16 %v1370_v24, %v1370_v24  ;;  %v6007_v53 = vpop.f32.mrb[45].mxu1 }
 0x179   :  { %v2017_v43 = vadd.f32 %v2016_v45, %v2015_v7  ;;  %v2620_v60 = vadd.f32 %v2619_v44, %v2618_v32  ;;  %3757 = vst.msk [vmem:[%s7223_s2 + $0x13c] sm:$0xf] %vm3677_vm3, %v4366_v47  ;;  %v2347_v4 = vmul.f32 %v4669_v18, %v4669_v18  ;;  %v2020_v23 = vsel %vm1862_vm4, %v4669_v18, 0.0  ;;  %3800 = vst.msk [vmem:[%s7223_s2 + $0x1e8] sm:$0xf] %vm3677_vm3, %v4409_v63  ;;  %v6016_v44 = vpop.f32.mrb[46].mxu1 }
 0x17a   :  { %v2621_v16 = vsel %vm1862_vm4, %v2345_v54, 0.0  ;;  %3755 = vst.msk [vmem:[%s7223_s2 + $0x134] sm:$0xf] %vm3677_vm3, %v4364_v59  ;;  %v4407_v32 = vpack.c.bf16 %v5743_v34, %v5743_v34  ;;  %v2623_v47 = vsel %vm1862_vm4, %v2346_v51, 0.0  ;;  %v6019_v59 = vpop.f32.mrb[47].mxu1 }
 0x17b   :  { %v2019_v13 = vadd.f32 %v2018_v61, %v2017_v43  ;;  %v2622_v7 = vadd.f32 %v2621_v16, %v2620_v60  ;;  %v2625_v63 = vsel %vm1862_vm4, %v2347_v4, 0.0 }
 0x17c   :  { %v4672_v24 = vpop.f32.mrb[80].mxu0  ;;  %3798 = vst.msk [vmem:[%s7223_s2 + $0x1e0] sm:$0xf] %vm3677_vm3, %v4407_v32 }
 0x17d   :  { %v4369_v45 = vpack.c.bf16 %v4672_v24, %v4672_v24  ;;  %v1383_v43 = vpop.f32.mrb[81].mxu0  ;;  %v2021_v54 = vadd.f32 %v2020_v23, %v2019_v13  ;;  %v2624_v18 = vadd.f32 %v2623_v47, %v2622_v7  ;;  %v2026_v48 = vsel %vm1862_vm4, %v4672_v24, 0.0 }
 0x17e   :  { %v2022_v61 = vsel %vm1862_vm4, %v1383_v43, 0.0  ;;  %v2348_v60 = vmul.f32 %v1383_v43, %v1383_v43  ;;  %v4367_v16 = vpack.c.bf16 %v1383_v43, %v1383_v43  ;;  %v4673_v27 = vpop.f32.mrb[82].mxu0  ;;  %v2350_v43 = vmul.f32 %v4672_v24, %v4672_v24 }
 0x17f   :  { %3760 = vst.msk [vmem:[%s7223_s2 + $0x148] sm:$0xf] %vm3677_vm3, %v4369_v45  ;;  %v2023_v51 = vadd.f32 %v2022_v61, %v2021_v54  ;;  %v1386_v13 = vpop.f32.mrb[83].mxu0  ;;  %v2626_v23 = vadd.f32 %v2625_v63, %v2624_v18  ;;  %v4370_v47 = vpack.c.bf16 %v4673_v27, %v4673_v27  ;;  %v4410_v54 = vpack.c.bf16 %v5752_v42, %v5752_v42  ;;  %v6044_v18 = vpop.f32.mrb[48].mxu1 }
 0x180   :  { %v2627_v7 = vsel %vm1862_vm4, %v2348_v60, 0.0  ;;  %3758 = vst.msk [vmem:[%s7223_s2 + $0x140] sm:$0xf] %vm3677_vm3, %v4367_v16  ;;  %v2024_v32 = vsel %vm1862_vm4, %v1386_v13, 0.0  ;;  %v2349_v34 = vmul.f32 %v1386_v13, %v1386_v13  ;;  %v4368_v57 = vpack.c.bf16 %v1386_v13, %v1386_v13  ;;  %v6051_v24 = vpop.f32.mrb[49].mxu1 }
 0x181   :  { %v2025_v4 = vadd.f32 %v2024_v32, %v2023_v51  ;;  %v2628_v45 = vadd.f32 %v2627_v7, %v2626_v23  ;;  %3761 = vst.msk [vmem:[%s7223_s2 + $0x14c] sm:$0xf] %vm3677_vm3, %v4370_v47  ;;  %v2351_v61 = vmul.f32 %v4673_v27, %v4673_v27  ;;  %v2028_v63 = vsel %vm1862_vm4, %v4673_v27, 0.0  ;;  %3801 = vst.msk [vmem:[%s7223_s2 + $0x1ec] sm:$0xf] %vm3677_vm3, %v4410_v54 }
 0x182   :  { %v2629_v16 = vsel %vm1862_vm4, %v2349_v34, 0.0  ;;  %3759 = vst.msk [vmem:[%s7223_s2 + $0x144] sm:$0xf] %vm3677_vm3, %v4368_v57  ;;  %v6060_v34 = vpop.f32.mrb[50].mxu1  ;;  %v2631_v23 = vsel %vm1862_vm4, %v2350_v43, 0.0 }
 0x183   :  { %v2027_v60 = vadd.f32 %v2026_v48, %v2025_v4  ;;  %v2630_v51 = vadd.f32 %v2629_v16, %v2628_v45  ;;  %v4408_v48 = vpack.c.bf16 %v5755_v49, %v5755_v49  ;;  %v6063_v32 = vpop.f32.mrb[51].mxu1  ;;  %v2633_v54 = vsel %vm1862_vm4, %v2351_v61, 0.0 }
 0x184   :  { %v4676_v13 = vpop.f32.mrb[84].mxu0 }
 0x185   :  { %v4373_v7 = vpack.c.bf16 %v4676_v13, %v4676_v13  ;;  %v1399_v57 = vpop.f32.mrb[85].mxu0  ;;  %v2029_v47 = vadd.f32 %v2028_v63, %v2027_v60  ;;  %v2632_v27 = vadd.f32 %v2631_v23, %v2630_v51  ;;  %3799 = vst.msk [vmem:[%s7223_s2 + $0x1e4] sm:$0xf] %vm3677_vm3, %v4408_v48  ;;  %v2034_v52 = vsel %vm1862_vm4, %v4676_v13, 0.0 }
 0x186   :  { %v2030_v4 = vsel %vm1862_vm4, %v1399_v57, 0.0  ;;  %v2352_v45 = vmul.f32 %v1399_v57, %v1399_v57  ;;  %v4371_v16 = vpack.c.bf16 %v1399_v57, %v1399_v57  ;;  %v4677_v42 = vpop.f32.mrb[86].mxu0  ;;  %v2354_v57 = vmul.f32 %v4676_v13, %v4676_v13 }
 0x187   :  { %3764 = vst.msk [vmem:[%s7223_s2 + $0x158] sm:$0xf] %vm3677_vm3, %v4373_v7  ;;  %v2031_v43 = vadd.f32 %v2030_v4, %v2029_v47  ;;  %v1402_v60 = vpop.f32.mrb[87].mxu0  ;;  %v2634_v63 = vadd.f32 %v2633_v54, %v2632_v27  ;;  %v4374_v23 = vpack.c.bf16 %v4677_v42, %v4677_v42  ;;  %v4413_v47 = vpack.c.bf16 %v5780_v14, %v5780_v14  ;;  %v6088_v27 = vpop.f32.mrb[52].mxu1 }
 0x188   :  { %v2635_v51 = vsel %vm1862_vm4, %v2352_v45, 0.0  ;;  %3762 = vst.msk [vmem:[%s7223_s2 + $0x150] sm:$0xf] %vm3677_vm3, %v4371_v16  ;;  %v2032_v48 = vsel %vm1862_vm4, %v1402_v60, 0.0  ;;  %v2353_v49 = vmul.f32 %v1402_v60, %v1402_v60  ;;  %v4372_v0 = vpack.c.bf16 %v1402_v60, %v1402_v60  ;;  %7305 = vst [vmem:[#allocation17_spill] sm:$0xff] %v6088_v27  ;;  %v6095_v13 = vpop.f32.mrb[53].mxu1 }
 0x189   :  { %v2033_v61 = vadd.f32 %v2032_v48, %v2031_v43  ;;  %v2636_v7 = vadd.f32 %v2635_v51, %v2634_v63  ;;  %3765 = vst.msk [vmem:[%s7223_s2 + $0x15c] sm:$0xf] %vm3677_vm3, %v4374_v23  ;;  %v2355_v4 = vmul.f32 %v4677_v42, %v4677_v42  ;;  %v2036_v54 = vsel %vm1862_vm4, %v4677_v42, 0.0  ;;  %3804 = vst.msk [vmem:[%s7223_s2 + $0x1f8] sm:$0xf] %vm3677_vm3, %v4413_v47 }
 0x18a   :  { %v2637_v16 = vsel %vm1862_vm4, %v2353_v49, 0.0  ;;  %3763 = vst.msk [vmem:[%s7223_s2 + $0x154] sm:$0xf] %vm3677_vm3, %v4372_v0  ;;  %v6104_v49 = vpop.f32.mrb[54].mxu1  ;;  %v2639_v63 = vsel %vm1862_vm4, %v2354_v57, 0.0 }
 0x18b   :  { %v2035_v45 = vadd.f32 %v2034_v52, %v2033_v61  ;;  %v2638_v43 = vadd.f32 %v2637_v16, %v2636_v7  ;;  %v4411_v52 = vpack.c.bf16 %v5787_v19, %v5787_v19  ;;  %7306 = vst [vmem:[#allocation18_spill] sm:$0xff] %v6104_v49  ;;  %v6107_v48 = vpop.f32.mrb[55].mxu1  ;;  %v2641_v47 = vsel %vm1862_vm4, %v2355_v4, 0.0 }
 0x18c   :  { %v4680_v60 = vpop.f32.mrb[88].mxu0  ;;  %7307 = vst [vmem:[#allocation19_spill] sm:$0xff] %v6107_v48 }
 0x18d   :  { %v4377_v51 = vpack.c.bf16 %v4680_v60, %v4680_v60  ;;  %v1415_v0 = vpop.f32.mrb[89].mxu0  ;;  %v2037_v23 = vadd.f32 %v2036_v54, %v2035_v45  ;;  %v2640_v42 = vadd.f32 %v2639_v63, %v2638_v43  ;;  %3802 = vst.msk [vmem:[%s7223_s2 + $0x1f0] sm:$0xf] %vm3677_vm3, %v4411_v52  ;;  %v2042_v15 = vsel %vm1862_vm4, %v4680_v60, 0.0 }
 0x18e   :  { %v2038_v61 = vsel %vm1862_vm4, %v1415_v0, 0.0  ;;  %v2356_v7 = vmul.f32 %v1415_v0, %v1415_v0  ;;  %v4375_v16 = vpack.c.bf16 %v1415_v0, %v1415_v0  ;;  %v4681_v14 = vpop.f32.mrb[90].mxu0  ;;  %v2358_v0 = vmul.f32 %v4680_v60, %v4680_v60 }
 0x18f   :  { %3768 = vst.msk [vmem:[%s7223_s2 + $0x168] sm:$0xf] %vm3677_vm3, %v4377_v51  ;;  %v2039_v57 = vadd.f32 %v2038_v61, %v2037_v23  ;;  %v1418_v45 = vpop.f32.mrb[91].mxu0  ;;  %v2642_v54 = vadd.f32 %v2641_v47, %v2640_v42  ;;  %v4378_v63 = vpack.c.bf16 %v4681_v14, %v4681_v14  ;;  %v4414_v23 = vpack.c.bf16 %v5796_v26, %v5796_v26  ;;  %v6132_v42 = vpop.f32.mrb[56].mxu1 }
 0x190   :  { %v2643_v43 = vsel %vm1862_vm4, %v2356_v7, 0.0  ;;  %3766 = vst.msk [vmem:[%s7223_s2 + $0x160] sm:$0xf] %vm3677_vm3, %v4375_v16  ;;  %v2040_v52 = vsel %vm1862_vm4, %v1418_v45, 0.0  ;;  %v2357_v19 = vmul.f32 %v1418_v45, %v1418_v45  ;;  %v4376_v48 = vpack.c.bf16 %v1418_v45, %v1418_v45  ;;  %7308 = vst [vmem:[#allocation20_spill] sm:$0xff] %v6132_v42  ;;  %v6139_v60 = vpop.f32.mrb[57].mxu1 }
 0x191   :  { %v2041_v4 = vadd.f32 %v2040_v52, %v2039_v57  ;;  %v2644_v51 = vadd.f32 %v2643_v43, %v2642_v54  ;;  %3769 = vst.msk [vmem:[%s7223_s2 + $0x16c] sm:$0xf] %vm3677_vm3, %v4378_v63  ;;  %v2359_v61 = vmul.f32 %v4681_v14, %v4681_v14  ;;  %7309 = vst [vmem:[#allocation21_spill] sm:$0xff] %v6139_v60  ;;  %v2044_v47 = vsel %vm1862_vm4, %v4681_v14, 0.0 }
 0x192   :  { %v2645_v16 = vsel %vm1862_vm4, %v2357_v19, 0.0  ;;  %3767 = vst.msk [vmem:[%s7223_s2 + $0x164] sm:$0xf] %vm3677_vm3, %v4376_v48  ;;  %3805 = vst.msk [vmem:[%s7223_s2 + $0x1fc] sm:$0xf] %vm3677_vm3, %v4414_v23  ;;  %v6148_v19 = vpop.f32.mrb[58].mxu1 }
 0x193   :  { %v2043_v7 = vadd.f32 %v2042_v15, %v2041_v4  ;;  %v2646_v57 = vadd.f32 %v2645_v16, %v2644_v51  ;;  %v4412_v15 = vpack.c.bf16 %v5799_v37, %v5799_v37  ;;  %7310 = vst [vmem:[#allocation22_spill] sm:$0xff] %v6148_v19  ;;  %v2647_v54 = vsel %vm1862_vm4, %v2358_v0, 0.0  ;;  %v6151_v52 = vpop.f32.mrb[59].mxu1 }
 0x194   :  { %v4684_v45 = vpop.f32.mrb[92].mxu0  ;;  %7311 = vst [vmem:[#allocation23_spill] sm:$0xff] %v6151_v52  ;;  %v2649_v23 = vsel %vm1862_vm4, %v2359_v61, 0.0 }
 0x195   :  { %v4381_v43 = vpack.c.bf16 %v4684_v45, %v4684_v45  ;;  %v1431_v48 = vpop.f32.mrb[93].mxu0  ;;  %v2045_v63 = vadd.f32 %v2044_v47, %v2043_v7  ;;  %v2648_v14 = vadd.f32 %v2647_v54, %v2646_v57  ;;  %3803 = vst.msk [vmem:[%s7223_s2 + $0x1f4] sm:$0xf] %vm3677_vm3, %v4412_v15  ;;  %v2050_v19 = vsel %vm1862_vm4, %v4684_v45, 0.0 }
 0x196   :  { %v2046_v4 = vsel %vm1862_vm4, %v1431_v48, 0.0  ;;  %v2360_v51 = vmul.f32 %v1431_v48, %v1431_v48  ;;  %v4379_v16 = vpack.c.bf16 %v1431_v48, %v1431_v48  ;;  %v4685_v26 = vpop.f32.mrb[94].mxu0  ;;  %v2362_v48 = vmul.f32 %v4684_v45, %v4684_v45 }
 0x197   :  { %3772 = vst.msk [vmem:[%s7223_s2 + $0x178] sm:$0xf] %vm3677_vm3, %v4381_v43  ;;  %v2047_v0 = vadd.f32 %v2046_v4, %v2045_v63  ;;  %v1434_v7 = vpop.f32.mrb[95].mxu0  ;;  %v2650_v47 = vadd.f32 %v2649_v23, %v2648_v14  ;;  %v4382_v54 = vpack.c.bf16 %v4685_v26, %v4685_v26  ;;  %v4417_v63 = vpack.c.bf16 %v5824_v6, %v5824_v6  ;;  %v6176_v14 = vpop.f32.mrb[60].mxu1 }
 0x198   :  { %v2651_v57 = vsel %vm1862_vm4, %v2360_v51, 0.0  ;;  %3770 = vst.msk [vmem:[%s7223_s2 + $0x170] sm:$0xf] %vm3677_vm3, %v4379_v16  ;;  %v2048_v15 = vsel %vm1862_vm4, %v1434_v7, 0.0  ;;  %v2361_v37 = vmul.f32 %v1434_v7, %v1434_v7  ;;  %v4380_v52 = vpack.c.bf16 %v1434_v7, %v1434_v7  ;;  %7312 = vst [vmem:[#allocation24_spill] sm:$0xff] %v6176_v14  ;;  %v6183_v45 = vpop.f32.mrb[61].mxu1 }
 0x199   :  { %v2049_v61 = vadd.f32 %v2048_v15, %v2047_v0  ;;  %v2652_v43 = vadd.f32 %v2651_v57, %v2650_v47  ;;  %3773 = vst.msk [vmem:[%s7223_s2 + $0x17c] sm:$0xf] %vm3677_vm3, %v4382_v54  ;;  %v2363_v4 = vmul.f32 %v4685_v26, %v4685_v26  ;;  %7313 = vst [vmem:[#allocation25_spill] sm:$0xff] %v6183_v45  ;;  %v2052_v23 = vsel %vm1862_vm4, %v4685_v26, 0.0 }
 0x19a   :  { %v2653_v16 = vsel %vm1862_vm4, %v2361_v37, 0.0  ;;  %3771 = vst.msk [vmem:[%s7223_s2 + $0x174] sm:$0xf] %vm3677_vm3, %v4380_v52  ;;  %3808 = vst.msk [vmem:[%s7223_s2 + $0x208] sm:$0xf] %vm3677_vm3, %v4417_v63  ;;  %v6192_v37 = vpop.f32.mrb[62].mxu1 }
 0x19b   :  { %v2051_v51 = vadd.f32 %v2050_v19, %v2049_v61  ;;  %v2654_v0 = vadd.f32 %v2653_v16, %v2652_v43  ;;  %v4415_v19 = vpack.c.bf16 %v5831_v12, %v5831_v12  ;;  %7314 = vst [vmem:[#allocation26_spill] sm:$0xff] %v6192_v37  ;;  %v2655_v47 = vsel %vm1862_vm4, %v2362_v48, 0.0  ;;  %v6195_v15 = vpop.f32.mrb[63].mxu1 }
 0x19c   :  { %v4688_v7 = vpop.f32.mrb[96].mxu0  ;;  %7315 = vst [vmem:[#allocation27_spill] sm:$0xff] %v6195_v15  ;;  %v2657_v63 = vsel %vm1862_vm4, %v2363_v4, 0.0 }
 0x19d   :  { %v4385_v57 = vpack.c.bf16 %v4688_v7, %v4688_v7  ;;  %v1447_v52 = vpop.f32.mrb[97].mxu0  ;;  %v2053_v54 = vadd.f32 %v2052_v23, %v2051_v51  ;;  %v2656_v26 = vadd.f32 %v2655_v47, %v2654_v0  ;;  %3806 = vst.msk [vmem:[%s7223_s2 + $0x200] sm:$0xf] %vm3677_vm3, %v4415_v19  ;;  %v2058_v37 = vsel %vm1862_vm4, %v4688_v7, 0.0 }
 0x19e   :  { %v2054_v61 = vsel %vm1862_vm4, %v1447_v52, 0.0  ;;  %v2364_v43 = vmul.f32 %v1447_v52, %v1447_v52  ;;  %v4383_v16 = vpack.c.bf16 %v1447_v52, %v1447_v52  ;;  %v4689_v6 = vpop.f32.mrb[98].mxu0  ;;  %v2366_v52 = vmul.f32 %v4688_v7, %v4688_v7 }
 0x19f   :  { %3776 = vst.msk [vmem:[%s7223_s2 + $0x188] sm:$0xf] %vm3677_vm3, %v4385_v57  ;;  %v2055_v48 = vadd.f32 %v2054_v61, %v2053_v54  ;;  %v1450_v51 = vpop.f32.mrb[99].mxu0  ;;  %v2658_v23 = vadd.f32 %v2657_v63, %v2656_v26  ;;  %v4386_v47 = vpack.c.bf16 %v4689_v6, %v4689_v6  ;;  %v4418_v54 = vpack.c.bf16 %v5840_v21, %v5840_v21  ;;  %v6220_v26 = vpop.f32.mrb[64].mxu1 }
 0x1a0   :  { %v2659_v0 = vsel %vm1862_vm4, %v2364_v43, 0.0  ;;  %3774 = vst.msk [vmem:[%s7223_s2 + $0x180] sm:$0xf] %vm3677_vm3, %v4383_v16  ;;  %v2056_v19 = vsel %vm1862_vm4, %v1450_v51, 0.0  ;;  %v2365_v12 = vmul.f32 %v1450_v51, %v1450_v51  ;;  %v4384_v15 = vpack.c.bf16 %v1450_v51, %v1450_v51  ;;  %7316 = vst [vmem:[#allocation28_spill] sm:$0xff] %v6220_v26  ;;  %v6229_v63 = vpop.f32.mrb[65].mxu1 }
 0x1a1   :  { %v2057_v4 = vadd.f32 %v2056_v19, %v2055_v48  ;;  %v2660_v57 = vadd.f32 %v2659_v0, %v2658_v23  ;;  %3777 = vst.msk [vmem:[%s7223_s2 + $0x18c] sm:$0xf] %vm3677_vm3, %v4386_v47  ;;  %v2367_v61 = vmul.f32 %v4689_v6, %v4689_v6  ;;  %v2368_v7 = vmul.f32 %v5533_v29, %v5533_v29 }
 0x1a2   :  { %v2661_v16 = vsel %vm1862_vm4, %v2365_v12, 0.0  ;;  %3775 = vst.msk [vmem:[%s7223_s2 + $0x184] sm:$0xf] %vm3677_vm3, %v4384_v15  ;;  %7317 = vst [vmem:[#allocation29_spill] sm:$0xff] %v6229_v63  ;;  %v2060_v48 = vsel %vm1862_vm4, %v4689_v6, 0.0  ;;  %v2062_v23 = vsel %vm1862_vm4, %v5533_v29, 0.0  ;;  %v4416_v12 = vpack.c.bf16 %v5843_v31, %v5843_v31 }
 0x1a3   :  { %v2059_v43 = vadd.f32 %v2058_v37, %v2057_v4  ;;  %v2662_v51 = vadd.f32 %v2661_v16, %v2660_v57  ;;  %3809 = vst.msk [vmem:[%s7223_s2 + $0x20c] sm:$0xf] %vm3677_vm3, %v4418_v54  ;;  %v6240_v37 = vpop.f32.mrb[66].mxu1  ;;  %v2663_v15 = vsel %vm1862_vm4, %v2366_v52, 0.0  ;;  %v4421_v6 = vpack.c.bf16 %v5868_v2, %v5868_v2 }
 0x1a4   :  { %7318 = vst [vmem:[#allocation30_spill] sm:$0xff] %v6240_v37  ;;  %v6245_v47 = vpop.f32.mrb[67].mxu1  ;;  %3807 = vst.msk [vmem:[%s7223_s2 + $0x204] sm:$0xf] %vm3677_vm3, %v4416_v12  ;;  %v4419_v29 = vpack.c.bf16 %v5875_v11, %v5875_v11  ;;  %v2665_v4 = vsel %vm1862_vm4, %v2367_v61, 0.0  ;;  %v2667_v52 = vsel %vm1862_vm4, %v2368_v7, 0.0  ;;  %v2369_v54 = vmul.f32 %v5539_v38, %v5539_v38 }
 0x1a5   :  { %v2061_v0 = vadd.f32 %v2060_v48, %v2059_v43  ;;  %7319 = vst [vmem:[#allocation31_spill] sm:$0xff] %v6245_v47  ;;  %v2664_v19 = vadd.f32 %v2663_v15, %v2662_v51  ;;  %3812 = vst.msk [vmem:[%s7223_s2 + $0x218] sm:$0xf] %vm3677_vm3, %v4421_v6  ;;  %v2064_v16 = vsel %vm1862_vm4, %v5539_v38, 0.0  ;;  %v4422_v61 = vpack.c.bf16 %v5884_v22, %v5884_v22  ;;  %v6281_v15 = vpop.f32.mrb[68].mxu1 }
 0x1a6   :  { %3810 = vst.msk [vmem:[%s7223_s2 + $0x210] sm:$0xf] %vm3677_vm3, %v4419_v29  ;;  %v2370_v7 = vmul.f32 %v5526_v25, %v5526_v25  ;;  %v4420_v51 = vpack.c.bf16 %v5887_v36, %v5887_v36  ;;  %v4425_v38 = vpack.c.bf16 %v5912_v9, %v5912_v9  ;;  %7320 = vst [vmem:[#allocation32_spill] sm:$0xff] %v6281_v15  ;;  %v6292_v29 = vpop.f32.mrb[69].mxu1 }
 0x1a7   :  { %v2063_v57 = vadd.f32 %v2062_v23, %v2061_v0  ;;  %v2666_v43 = vadd.f32 %v2665_v4, %v2664_v19  ;;  %v2066_v23 = vsel %vm1862_vm4, %v5526_v25, 0.0  ;;  %3813 = vst.msk [vmem:[%s7223_s2 + $0x21c] sm:$0xf] %vm3677_vm3, %v4422_v61  ;;  %v2371_v0 = vmul.f32 %v5536_v33, %v5536_v33 }
 0x1a8   :  { %v2669_v19 = vsel %vm1862_vm4, %v2369_v54, 0.0  ;;  %v2372_v25 = vmul.f32 %v5567_v62, %v5567_v62  ;;  %3811 = vst.msk [vmem:[%s7223_s2 + $0x214] sm:$0xf] %vm3677_vm3, %v4420_v51  ;;  %v2068_v4 = vsel %vm1862_vm4, %v5536_v33, 0.0  ;;  %3816 = vst.msk [vmem:[%s7223_s2 + $0x228] sm:$0xf] %vm3677_vm3, %v4425_v38  ;;  %v4423_v54 = vpack.c.bf16 %v5919_v17, %v5919_v17 }
 0x1a9   :  { %v2065_v48 = vadd.f32 %v2064_v16, %v2063_v57  ;;  %v2668_v12 = vadd.f32 %v2667_v52, %v2666_v43  ;;  %v2070_v52 = vsel %vm1862_vm4, %v5567_v62, 0.0  ;;  %v6304_v43 = vpop.f32.mrb[70].mxu1  ;;  %v2671_v16 = vsel %vm1862_vm4, %v2370_v7, 0.0 }
 0x1aa   :  { %7321 = vst [vmem:[#allocation33_spill] sm:$0xff] %v6304_v43  ;;  %v4426_v33 = vpack.c.bf16 %v5928_v39, %v5928_v39  ;;  %3814 = vst.msk [vmem:[%s7223_s2 + $0x220] sm:$0xf] %vm3677_vm3, %v4423_v54  ;;  %v4424_v62 = vpack.c.bf16 %v5931_v50, %v5931_v50  ;;  %v2675_v7 = vsel %vm1862_vm4, %v2372_v25, 0.0  ;;  %v2373_v38 = vmul.f32 %v5579_v8, %v5579_v8 }
 0x1ab   :  { %v2067_v6 = vadd.f32 %v2066_v23, %v2065_v48  ;;  %v2670_v57 = vadd.f32 %v2669_v19, %v2668_v12  ;;  %v6309_v48 = vpop.f32.mrb[71].mxu1  ;;  %v2673_v23 = vsel %vm1862_vm4, %v2371_v0, 0.0  ;;  %v2072_v19 = vsel %vm1862_vm4, %v5579_v8, 0.0 }
 0x1ac   :  { %3817 = vst.msk [vmem:[%s7223_s2 + $0x22c] sm:$0xf] %vm3677_vm3, %v4426_v33  ;;  %3815 = vst.msk [vmem:[%s7223_s2 + $0x224] sm:$0xf] %vm3677_vm3, %v4424_v62  ;;  %v4429_v0 = vpack.c.bf16 %v5956_v40, %v5956_v40  ;;  %v2374_v25 = vmul.f32 %v5560_v58, %v5560_v58  ;;  %v4430_v8 = vpack.c.bf16 %v5972_v56, %v5972_v56 }
 0x1ad   :  { %v2069_v61 = vadd.f32 %v2068_v4, %v2067_v6  ;;  %v2672_v51 = vadd.f32 %v2671_v16, %v2670_v57  ;;  %v4427_v57 = vpack.c.bf16 %v5963_v28, %v5963_v28  ;;  %v6345_v16 = vpop.f32.mrb[72].mxu1 }
 0x1ae   :  { %3820 = vst.msk [vmem:[%s7223_s2 + $0x238] sm:$0xf] %vm3677_vm3, %v4429_v0  ;;  %7322 = vst [vmem:[#allocation34_spill] sm:$0xff] %v6345_v16  ;;  %v6356_v62 = vpop.f32.mrb[73].mxu1 }
 0x1af   :  { %v2071_v12 = vadd.f32 %v2070_v52, %v2069_v61  ;;  %v2674_v6 = vadd.f32 %v2673_v23, %v2672_v51  ;;  %v2074_v52 = vsel %vm1862_vm4, %v5560_v58, 0.0  ;;  %v2375_v61 = vmul.f32 %v5576_v3, %v5576_v3  ;;  %3818 = vst.msk [vmem:[%s7223_s2 + $0x230] sm:$0xf] %vm3677_vm3, %v4427_v57  ;;  %7323 = vst [vmem:[#allocation35_spill] sm:$0xff] %v6356_v62 }
 0x1b0   :  { %v2677_v51 = vsel %vm1862_vm4, %v2373_v38, 0.0  ;;  %v2376_v58 = vmul.f32 %v5611_v35, %v5611_v35  ;;  %v2076_v23 = vsel %vm1862_vm4, %v5576_v3, 0.0  ;;  %3821 = vst.msk [vmem:[%s7223_s2 + $0x23c] sm:$0xf] %vm3677_vm3, %v4430_v8  ;;  %v4428_v38 = vpack.c.bf16 %v5975_v1, %v5975_v1 }
 0x1b1   :  { %v2073_v4 = vadd.f32 %v2072_v19, %v2071_v12  ;;  %v2676_v54 = vadd.f32 %v2675_v7, %v2674_v6  ;;  %v2078_v7 = vsel %vm1862_vm4, %v5611_v35, 0.0  ;;  %v6368_v6 = vpop.f32.mrb[74].mxu1  ;;  %v2679_v19 = vsel %vm1862_vm4, %v2374_v25, 0.0 }
 0x1b2   :  { %v4433_v3 = vpack.c.bf16 %v6000_v55, %v6000_v55  ;;  %3819 = vst.msk [vmem:[%s7223_s2 + $0x234] sm:$0xf] %vm3677_vm3, %v4428_v38  ;;  %v4431_v35 = vpack.c.bf16 %v6007_v53, %v6007_v53  ;;  %v2683_v25 = vsel %vm1862_vm4, %v2376_v58, 0.0  ;;  %v2377_v8 = vmul.f32 %v5623_v46, %v5623_v46 }
 0x1b3   :  { %v2075_v33 = vadd.f32 %v2074_v52, %v2073_v4  ;;  %v2678_v12 = vadd.f32 %v2677_v51, %v2676_v54  ;;  %v6373_v4 = vpop.f32.mrb[75].mxu1  ;;  %v2681_v52 = vsel %vm1862_vm4, %v2375_v61, 0.0  ;;  %v2080_v51 = vsel %vm1862_vm4, %v5623_v46, 0.0 }
 0x1b4   :  { %3824 = vst.msk [vmem:[%s7223_s2 + $0x248] sm:$0xf] %vm3677_vm3, %v4433_v3  ;;  %3822 = vst.msk [vmem:[%s7223_s2 + $0x240] sm:$0xf] %vm3677_vm3, %v4431_v35  ;;  %v4434_v61 = vpack.c.bf16 %v6016_v44, %v6016_v44  ;;  %v2378_v58 = vmul.f32 %v5604_v30, %v5604_v30  ;;  %v4437_v46 = vpack.c.bf16 %v6044_v18, %v6044_v18 }
 0x1b5   :  { %v2077_v0 = vadd.f32 %v2076_v23, %v2075_v33  ;;  %v2680_v57 = vadd.f32 %v2679_v19, %v2678_v12  ;;  %v4432_v12 = vpack.c.bf16 %v6019_v59, %v6019_v59  ;;  %v6409_v19 = vpop.f32.mrb[76].mxu1 }
 0x1b6   :  { %3825 = vst.msk [vmem:[%s7223_s2 + $0x24c] sm:$0xf] %vm3677_vm3, %v4434_v61  ;;  %v6420_v35 = vpop.f32.mrb[77].mxu1  ;;  %3828 = vst.msk [vmem:[%s7223_s2 + $0x258] sm:$0xf] %vm3677_vm3, %v4437_v46  ;;  %v2381_v46 = vmul.f32 %v5667_v20, %v5667_v20 }
 0x1b7   :  { %v2079_v54 = vadd.f32 %v2078_v7, %v2077_v0  ;;  %v2682_v33 = vadd.f32 %v2681_v52, %v2680_v57  ;;  %v2082_v7 = vsel %vm1862_vm4, %v5604_v30, 0.0  ;;  %v2379_v0 = vmul.f32 %v5620_v41, %v5620_v41  ;;  %3823 = vst.msk [vmem:[%s7223_s2 + $0x244] sm:$0xf] %vm3677_vm3, %v4432_v12 }
 0x1b8   :  { %v2685_v57 = vsel %vm1862_vm4, %v2377_v8, 0.0  ;;  %v2380_v30 = vmul.f32 %v5655_v10, %v5655_v10  ;;  %v2084_v52 = vsel %vm1862_vm4, %v5620_v41, 0.0  ;;  %v4435_v8 = vpack.c.bf16 %v6051_v24, %v6051_v24 }
 0x1b9   :  { %v2081_v23 = vadd.f32 %v2080_v51, %v2079_v54  ;;  %v2684_v38 = vadd.f32 %v2683_v25, %v2682_v33  ;;  %v2086_v25 = vsel %vm1862_vm4, %v5655_v10, 0.0  ;;  %v6432_v33 = vpop.f32.mrb[78].mxu1  ;;  %v2687_v51 = vsel %vm1862_vm4, %v2378_v58, 0.0 }
 0x1ba   :  { %7324 = vst [vmem:[#allocation36_spill] sm:$0xff] %v6432_v33  ;;  %v4438_v41 = vpack.c.bf16 %v6060_v34, %v6060_v34  ;;  %3826 = vst.msk [vmem:[%s7223_s2 + $0x250] sm:$0xf] %vm3677_vm3, %v4435_v8  ;;  %v4436_v10 = vpack.c.bf16 %v6063_v32, %v6063_v32  ;;  %v2691_v58 = vsel %vm1862_vm4, %v2380_v30, 0.0  ;;  %v2382_v30 = vmul.f32 %v5648_v5, %v5648_v5 }
 0x1bb   :  { %v2083_v3 = vadd.f32 %v2082_v7, %v2081_v23  ;;  %v2686_v54 = vadd.f32 %v2685_v57, %v2684_v38  ;;  %v6437_v23 = vpop.f32.mrb[79].mxu1  ;;  %v2689_v7 = vsel %vm1862_vm4, %v2379_v0, 0.0  ;;  %v2088_v57 = vsel %vm1862_vm4, %v5667_v20, 0.0 }
 0x1bc   :  { %3829 = vst.msk [vmem:[%s7223_s2 + $0x25c] sm:$0xf] %vm3677_vm3, %v4438_v41  ;;  %3827 = vst.msk [vmem:[%s7223_s2 + $0x254] sm:$0xf] %vm3677_vm3, %v4436_v10  ;;  %v4441_v0 = vpack.c.bf16 %v6088_v27, %v6088_v27  ;;  %v4442_v20 = vpack.c.bf16 %v6104_v49, %v6104_v49  ;;  %v2693_v10 = vsel %vm1862_vm4, %v2381_v46, 0.0  ;;  %v7327_v46 = vld [vmem:[#allocation19_spill] sm:$0xff] }
 0x1bd   :  { %v2085_v61 = vadd.f32 %v2084_v52, %v2083_v3  ;;  %v2688_v12 = vadd.f32 %v2687_v51, %v2686_v54  ;;  %v4439_v54 = vpack.c.bf16 %v6095_v13, %v6095_v13  ;;  %v6473_v51 = vpop.f32.mrb[80].mxu1  ;;  %v7334_v27 = vld [vmem:[#allocation26_spill] sm:$0xff] }
 0x1be   :  { %3832 = vst.msk [vmem:[%s7223_s2 + $0x268] sm:$0xf] %vm3677_vm3, %v4441_v0  ;;  %3833 = vst.msk [vmem:[%s7223_s2 + $0x26c] sm:$0xf] %vm3677_vm3, %v4442_v20  ;;  %v4440_v0 = vpack.c.bf16 %v7327_v46, %v7327_v46  ;;  %v4443_v20 = vpack.c.bf16 %v6139_v60, %v6139_v60 }
 0x1bf   :  { %v2087_v38 = vadd.f32 %v2086_v25, %v2085_v61  ;;  %v2690_v3 = vadd.f32 %v2689_v7, %v2688_v12  ;;  %v2090_v25 = vsel %vm1862_vm4, %v5648_v5, 0.0  ;;  %v7325_v61 = vld [vmem:[#allocation2_spill] sm:$0xff]  ;;  %v7326_v7 = vld [vmem:[#allocation4_spill] sm:$0xff]  ;;  %3830 = vst.msk [vmem:[%s7223_s2 + $0x260] sm:$0xf] %vm3677_vm3, %v4439_v54  ;;  %v2695_v54 = vsel %vm1862_vm4, %v2382_v30, 0.0 }
 0x1c0   :  { %v2383_v41 = vmul.f32 %v7325_v61, %v7325_v61  ;;  %v2384_v5 = vmul.f32 %v7326_v7, %v7326_v7  ;;  %3831 = vst.msk [vmem:[%s7223_s2 + $0x264] sm:$0xf] %vm3677_vm3, %v4440_v0  ;;  %3834 = vst.msk [vmem:[%s7223_s2 + $0x270] sm:$0xf] %vm3677_vm3, %v4443_v20  ;;  %v4449_v20 = vpack.c.bf16 %v6176_v14, %v6176_v14 }
 0x1c1   :  { %v2089_v52 = vadd.f32 %v2088_v57, %v2087_v38  ;;  %v2692_v8 = vadd.f32 %v2691_v58, %v2690_v3  ;;  %v6484_v38 = vpop.f32.mrb[81].mxu1  ;;  %v2092_v58 = vsel %vm1862_vm4, %v7325_v61, 0.0  ;;  %v2094_v57 = vsel %vm1862_vm4, %v7326_v7, 0.0 }
 0x1c2   :  { %v4445_v61 = vpack.c.bf16 %v6132_v42, %v6132_v42  ;;  %v2697_v7 = vsel %vm1862_vm4, %v2383_v41, 0.0  ;;  %v2699_v30 = vsel %vm1862_vm4, %v2384_v5, 0.0  ;;  %v7329_v41 = vld [vmem:[#allocation22_spill] sm:$0xff]  ;;  %v7331_v42 = vld [vmem:[#allocation23_spill] sm:$0xff]  ;;  %3840 = vst.msk [vmem:[%s7223_s2 + $0x288] sm:$0xf] %vm3677_vm3, %v4449_v20 }
 0x1c3   :  { %v2091_v12 = vadd.f32 %v2090_v25, %v2089_v52  ;;  %v2694_v3 = vadd.f32 %v2693_v10, %v2692_v8  ;;  %v6496_v52 = vpop.f32.mrb[82].mxu1  ;;  %v4446_v5 = vpack.c.bf16 %v7329_v41, %v7329_v41  ;;  %v4444_v60 = vpack.c.bf16 %v7331_v42, %v7331_v42  ;;  %v7333_v42 = vld [vmem:[#allocation8_spill] sm:$0xff] }
 0x1c4   :  { %v6501_v8 = vpop.f32.mrb[83].mxu1  ;;  %3836 = vst.msk [vmem:[%s7223_s2 + $0x278] sm:$0xf] %vm3677_vm3, %v4445_v61  ;;  %v2102_v14 = vsel %vm1862_vm4, %v7333_v42, 0.0 }
 0x1c5   :  { %v2093_v25 = vadd.f32 %v2092_v58, %v2091_v12  ;;  %v2696_v10 = vadd.f32 %v2695_v54, %v2694_v3  ;;  %v7328_v12 = vld [vmem:[#allocation6_spill] sm:$0xff]  ;;  %3837 = vst.msk [vmem:[%s7223_s2 + $0x27c] sm:$0xf] %vm3677_vm3, %v4446_v5  ;;  %3835 = vst.msk [vmem:[%s7223_s2 + $0x274] sm:$0xf] %vm3677_vm3, %v4444_v60 }
 0x1c6   :  { %v2385_v58 = vmul.f32 %v7328_v12, %v7328_v12  ;;  %v2096_v0 = vsel %vm1862_vm4, %v7328_v12, 0.0  ;;  %v7332_v12 = vld [vmem:[#allocation5_spill] sm:$0xff] }
 0x1c7   :  { %v2095_v49 = vadd.f32 %v2094_v57, %v2093_v25  ;;  %v2698_v3 = vadd.f32 %v2697_v7, %v2696_v10  ;;  %v7330_v57 = vld [vmem:[#allocation3_spill] sm:$0xff]  ;;  %v6537_v7 = vpop.f32.mrb[84].mxu1 }
 0x1c8   :  { %v2386_v54 = vmul.f32 %v7330_v57, %v7330_v57  ;;  %v2098_v61 = vsel %vm1862_vm4, %v7330_v57, 0.0  ;;  %v2701_v41 = vsel %vm1862_vm4, %v2385_v58, 0.0  ;;  %v2388_v57 = vmul.f32 %v7333_v42, %v7333_v42  ;;  %v7335_v42 = vld [vmem:[#allocation27_spill] sm:$0xff] }
 0x1c9   :  { %v2097_v25 = vadd.f32 %v2096_v0, %v2095_v49  ;;  %v2700_v10 = vadd.f32 %v2699_v30, %v2698_v3  ;;  %v2387_v49 = vmul.f32 %v7332_v12, %v7332_v12  ;;  %v6548_v30 = vpop.f32.mrb[85].mxu1  ;;  %v2100_v3 = vsel %vm1862_vm4, %v7332_v12, 0.0 }
 0x1ca   :  { %v4447_v58 = vpack.c.bf16 %v6183_v45, %v6183_v45  ;;  %v2703_v60 = vsel %vm1862_vm4, %v2386_v54, 0.0  ;;  %v4450_v12 = vpack.c.bf16 %v7334_v27, %v7334_v27  ;;  %v4448_v20 = vpack.c.bf16 %v7335_v42, %v7335_v42 }
 0x1cb   :  { %v2099_v0 = vadd.f32 %v2098_v61, %v2097_v25  ;;  %v2702_v5 = vadd.f32 %v2701_v41, %v2700_v10  ;;  %v6560_v25 = vpop.f32.mrb[86].mxu1  ;;  %v2705_v45 = vsel %vm1862_vm4, %v2387_v49, 0.0  ;;  %v2707_v54 = vsel %vm1862_vm4, %v2388_v57, 0.0  ;;  %v7337_v49 = vld [vmem:[#allocation7_spill] sm:$0xff] }
 0x1cc   :  { %v6565_v41 = vpop.f32.mrb[87].mxu1  ;;  %3838 = vst.msk [vmem:[%s7223_s2 + $0x280] sm:$0xf] %vm3677_vm3, %v4447_v58  ;;  %3841 = vst.msk [vmem:[%s7223_s2 + $0x28c] sm:$0xf] %vm3677_vm3, %v4450_v12  ;;  %v2390_v57 = vmul.f32 %v7337_v49, %v7337_v49 }
 0x1cd   :  { %v2101_v61 = vadd.f32 %v2100_v3, %v2099_v0  ;;  %v2704_v10 = vadd.f32 %v2703_v60, %v2702_v5  ;;  %v7336_v0 = vld [vmem:[#allocation10_spill] sm:$0xff]  ;;  %3839 = vst.msk [vmem:[%s7223_s2 + $0x284] sm:$0xf] %vm3677_vm3, %v4448_v20  ;;  %v6601_v20 = vpop.f32.mrb[88].mxu1 }
 0x1ce   :  { %v2389_v3 = vmul.f32 %v7336_v0, %v7336_v0  ;;  %v2104_v58 = vsel %vm1862_vm4, %v7336_v0, 0.0  ;;  %v7338_v0 = vld [vmem:[#allocation9_spill] sm:$0xff] }
 0x1cf   :  { %v2103_v46 = vadd.f32 %v2102_v14, %v2101_v61  ;;  %v2706_v5 = vadd.f32 %v2705_v45, %v2704_v10  ;;  %v4453_v14 = vpack.c.bf16 %v6220_v26, %v6220_v26  ;;  %v4451_v61 = vpack.c.bf16 %v6229_v63, %v6229_v63  ;;  %v7339_v63 = vld [vmem:[#allocation12_spill] sm:$0xff] }
 0x1d0   :  { %v2106_v45 = vsel %vm1862_vm4, %v7337_v49, 0.0  ;;  %v4454_v10 = vpack.c.bf16 %v6240_v37, %v6240_v37  ;;  %v2709_v26 = vsel %vm1862_vm4, %v2389_v3, 0.0  ;;  %v2392_v49 = vmul.f32 %v7339_v63, %v7339_v63 }
 0x1d1   :  { %v2105_v60 = vadd.f32 %v2104_v58, %v2103_v46  ;;  %v2708_v12 = vadd.f32 %v2707_v54, %v2706_v5  ;;  %3844 = vst.msk [vmem:[%s7223_s2 + $0x298] sm:$0xf] %vm3677_vm3, %v4453_v14  ;;  %v2391_v46 = vmul.f32 %v7338_v0, %v7338_v0  ;;  %3842 = vst.msk [vmem:[%s7223_s2 + $0x290] sm:$0xf] %vm3677_vm3, %v4451_v61  ;;  %v6612_v54 = vpop.f32.mrb[89].mxu1  ;;  %v2108_v5 = vsel %vm1862_vm4, %v7338_v0, 0.0 }
 0x1d2   :  { %v2110_v37 = vsel %vm1862_vm4, %v7339_v63, 0.0  ;;  %3845 = vst.msk [vmem:[%s7223_s2 + $0x29c] sm:$0xf] %vm3677_vm3, %v4454_v10  ;;  %v4452_v3 = vpack.c.bf16 %v6245_v47, %v6245_v47  ;;  %v2711_v61 = vsel %vm1862_vm4, %v2390_v57, 0.0  ;;  %v4457_v0 = vpack.c.bf16 %v6281_v15, %v6281_v15  ;;  %v7343_v15 = vld [vmem:[#allocation16_spill] sm:$0xff] }
 0x1d3   :  { %v2107_v58 = vadd.f32 %v2106_v45, %v2105_v60  ;;  %v2710_v14 = vadd.f32 %v2709_v26, %v2708_v12  ;;  %v6624_v60 = vpop.f32.mrb[90].mxu1  ;;  %v4455_v63 = vpack.c.bf16 %v6292_v29, %v6292_v29  ;;  %v2713_v10 = vsel %vm1862_vm4, %v2391_v46, 0.0  ;;  %v7341_v46 = vld [vmem:[#allocation11_spill] sm:$0xff] }
 0x1d4   :  { %v6629_v26 = vpop.f32.mrb[91].mxu1  ;;  %3843 = vst.msk [vmem:[%s7223_s2 + $0x294] sm:$0xf] %vm3677_vm3, %v4452_v3  ;;  %v2715_v57 = vsel %vm1862_vm4, %v2392_v49, 0.0  ;;  %3848 = vst.msk [vmem:[%s7223_s2 + $0x2a8] sm:$0xf] %vm3677_vm3, %v4457_v0  ;;  %v2394_v49 = vmul.f32 %v7341_v46, %v7341_v46 }
 0x1d5   :  { %v2109_v45 = vadd.f32 %v2108_v5, %v2107_v58  ;;  %v2712_v12 = vadd.f32 %v2711_v61, %v2710_v14  ;;  %v7340_v58 = vld [vmem:[#allocation14_spill] sm:$0xff]  ;;  %3846 = vst.msk [vmem:[%s7223_s2 + $0x2a0] sm:$0xf] %vm3677_vm3, %v4455_v63  ;;  %v2114_v0 = vsel %vm1862_vm4, %v7341_v46, 0.0  ;;  %v4461_v63 = vpack.c.bf16 %v6345_v16, %v6345_v16 }
 0x1d6   :  { %v2393_v5 = vmul.f32 %v7340_v58, %v7340_v58  ;;  %v2112_v3 = vsel %vm1862_vm4, %v7340_v58, 0.0  ;;  %v7342_v58 = vld [vmem:[#allocation13_spill] sm:$0xff]  ;;  %v2396_v46 = vmul.f32 %v7343_v15, %v7343_v15  ;;  %v2118_v16 = vsel %vm1862_vm4, %v7343_v15, 0.0 }
 0x1d7   :  { %v2111_v47 = vadd.f32 %v2110_v37, %v2109_v45  ;;  %v2714_v14 = vadd.f32 %v2713_v10, %v2712_v12  ;;  %v4458_v37 = vpack.c.bf16 %v6304_v43, %v6304_v43  ;;  %v4456_v45 = vpack.c.bf16 %v6309_v48, %v6309_v48  ;;  %v6665_v10 = vpop.f32.mrb[92].mxu1  ;;  %3852 = vst.msk [vmem:[%s7223_s2 + $0x2b8] sm:$0xf] %vm3677_vm3, %v4461_v63 }
 0x1d8   :  { %v2717_v43 = vsel %vm1862_vm4, %v2393_v5, 0.0  ;;  %v4459_v5 = vpack.c.bf16 %v6356_v62, %v6356_v62  ;;  %v4460_v15 = vpack.c.bf16 %v6373_v4, %v6373_v4 }
 0x1d9   :  { %v2113_v61 = vadd.f32 %v2112_v3, %v2111_v47  ;;  %v2716_v12 = vadd.f32 %v2715_v57, %v2714_v14  ;;  %3849 = vst.msk [vmem:[%s7223_s2 + $0x2ac] sm:$0xf] %vm3677_vm3, %v4458_v37  ;;  %v2395_v47 = vmul.f32 %v7342_v58, %v7342_v58  ;;  %3847 = vst.msk [vmem:[%s7223_s2 + $0x2a4] sm:$0xf] %vm3677_vm3, %v4456_v45  ;;  %v6676_v57 = vpop.f32.mrb[93].mxu1  ;;  %v2116_v14 = vsel %vm1862_vm4, %v7342_v58, 0.0 }
 0x1da   :  { %v2719_v45 = vsel %vm1862_vm4, %v2394_v49, 0.0  ;;  %v4462_v58 = vpack.c.bf16 %v6368_v6, %v6368_v6  ;;  %3850 = vst.msk [vmem:[%s7223_s2 + $0x2b0] sm:$0xf] %vm3677_vm3, %v4459_v5  ;;  %v2723_v49 = vsel %vm1862_vm4, %v2396_v46, 0.0  ;;  %3851 = vst.msk [vmem:[%s7223_s2 + $0x2b4] sm:$0xf] %vm3677_vm3, %v4460_v15 }
 0x1db   :  { %v2115_v3 = vadd.f32 %v2114_v0, %v2113_v61  ;;  %v2718_v37 = vadd.f32 %v2717_v43, %v2716_v12  ;;  %v6688_v61 = vpop.f32.mrb[94].mxu1  ;;  %v2721_v63 = vsel %vm1862_vm4, %v2395_v47, 0.0  ;;  %v7344_v47 = vld [vmem:[#allocation15_spill] sm:$0xff] }
 0x1dc   :  { %v6693_v43 = vpop.f32.mrb[95].mxu1  ;;  %3853 = vst.msk [vmem:[%s7223_s2 + $0x2bc] sm:$0xf] %vm3677_vm3, %v4462_v58  ;;  %v2398_v46 = vmul.f32 %v7344_v47, %v7344_v47 }
 0x1dd   :  { %v2117_v0 = vadd.f32 %v2116_v14, %v2115_v3  ;;  %v2720_v12 = vadd.f32 %v2719_v45, %v2718_v37  ;;  %v2397_v3 = vmul.f32 %v5843_v31, %v5843_v31  ;;  %v2120_v37 = vsel %vm1862_vm4, %v5843_v31, 0.0 }
 0x1de   :  { %v4463_v45 = vpack.c.bf16 %v6420_v35, %v6420_v35  ;;  %v4466_v31 = vpack.c.bf16 %v6432_v33, %v6432_v33 }
 0x1df   :  { %v2119_v62 = vadd.f32 %v2118_v16, %v2117_v0  ;;  %v2722_v14 = vadd.f32 %v2721_v63, %v2720_v12  ;;  %v4465_v16 = vpack.c.bf16 %v6409_v19, %v6409_v19  ;;  %v2122_v0 = vsel %vm1862_vm4, %v7344_v47, 0.0  ;;  %v6729_v12 = vpop.f32.mrb[96].mxu1 }
 0x1e0   :  { %v2725_v63 = vsel %vm1862_vm4, %v2397_v3, 0.0  ;;  %3854 = vst.msk [vmem:[%s7223_s2 + $0x2c0] sm:$0xf] %vm3677_vm3, %v4463_v45  ;;  %v2126_v47 = vsel %vm1862_vm4, %v5875_v11, 0.0  ;;  %3857 = vst.msk [vmem:[%s7223_s2 + $0x2cc] sm:$0xf] %vm3677_vm3, %v4466_v31  ;;  %v4464_v3 = vpack.c.bf16 %v6437_v23, %v6437_v23 }
 0x1e1   :  { %v2121_v5 = vadd.f32 %v2120_v37, %v2119_v62  ;;  %v2724_v58 = vadd.f32 %v2723_v49, %v2722_v14  ;;  %3856 = vst.msk [vmem:[%s7223_s2 + $0x2c8] sm:$0xf] %vm3677_vm3, %v4465_v16  ;;  %v2399_v62 = vmul.f32 %v5840_v21, %v5840_v21  ;;  %v2400_v37 = vmul.f32 %v5875_v11, %v5875_v11  ;;  %v6740_v49 = vpop.f32.mrb[97].mxu1 }
 0x1e2   :  { %v2124_v14 = vsel %vm1862_vm4, %v5840_v21, 0.0  ;;  %v2727_v45 = vsel %vm1862_vm4, %v2398_v46, 0.0  ;;  %v4469_v21 = vpack.c.bf16 %v6473_v51, %v6473_v51  ;;  %3855 = vst.msk [vmem:[%s7223_s2 + $0x2c4] sm:$0xf] %vm3677_vm3, %v4464_v3  ;;  %v4467_v11 = vpack.c.bf16 %v6484_v38, %v6484_v38 }
 0x1e3   :  { %v2123_v15 = vadd.f32 %v2122_v0, %v2121_v5  ;;  %v2726_v16 = vadd.f32 %v2725_v63, %v2724_v58  ;;  %v6752_v5 = vpop.f32.mrb[98].mxu1  ;;  %v2729_v31 = vsel %vm1862_vm4, %v2399_v62, 0.0  ;;  %v2731_v46 = vsel %vm1862_vm4, %v2400_v37, 0.0 }
 0x1e4   :  { %v6757_v58 = vpop.f32.mrb[99].mxu1  ;;  %3860 = vst.msk [vmem:[%s7223_s2 + $0x2d8] sm:$0xf] %vm3677_vm3, %v4469_v21  ;;  %3858 = vst.msk [vmem:[%s7223_s2 + $0x2d0] sm:$0xf] %vm3677_vm3, %v4467_v11  ;;  %v4470_v62 = vpack.c.bf16 %v6496_v52, %v6496_v52  ;;  %v2402_v37 = vmul.f32 %v5868_v2, %v5868_v2  ;;  %v4468_v3 = vpack.c.bf16 %v6501_v8, %v6501_v8 }
 0x1e5   :  { %v2125_v0 = vadd.f32 %v2124_v14, %v2123_v15  ;;  %v2728_v63 = vadd.f32 %v2727_v45, %v2726_v16  ;;  %v2401_v15 = vmul.f32 %v5887_v36, %v5887_v36  ;;  %v2128_v16 = vsel %vm1862_vm4, %v5887_v36, 0.0 }
 0x1e6   :  { %v2130_v45 = vsel %vm1862_vm4, %v5868_v2, 0.0  ;;  %3861 = vst.msk [vmem:[%s7223_s2 + $0x2dc] sm:$0xf] %vm3677_vm3, %v4470_v62  ;;  %v4473_v36 = vpack.c.bf16 %v6537_v7, %v6537_v7  ;;  %v2403_v21 = vmul.f32 %v5884_v22, %v5884_v22  ;;  %v2404_v11 = vmul.f32 %v5919_v17, %v5919_v17  ;;  %3859 = vst.msk [vmem:[%s7223_s2 + $0x2d4] sm:$0xf] %vm3677_vm3, %v4468_v3 }
 0x1e7   :  { %v2127_v33 = vadd.f32 %v2126_v47, %v2125_v0  ;;  %v2730_v14 = vadd.f32 %v2729_v31, %v2728_v63  ;;  %v2132_v2 = vsel %vm1862_vm4, %v5884_v22, 0.0  ;;  %v4474_v62 = vpack.c.bf16 %v6560_v25, %v6560_v25 }
 0x1e8   :  { %3864 = vst.msk [vmem:[%s7223_s2 + $0x2e8] sm:$0xf] %vm3677_vm3, %v4473_v36  ;;  %v4472_v22 = vpack.c.bf16 %v6565_v41, %v6565_v41  ;;  %v2136_v36 = vsel %vm1862_vm4, %v5931_v50, 0.0 }
 0x1e9   :  { %v2129_v47 = vadd.f32 %v2128_v16, %v2127_v33  ;;  %v2732_v0 = vadd.f32 %v2731_v46, %v2730_v14  ;;  %v2733_v33 = vsel %vm1862_vm4, %v2401_v15, 0.0  ;;  %v2134_v46 = vsel %vm1862_vm4, %v5919_v17, 0.0  ;;  %3865 = vst.msk [vmem:[%s7223_s2 + $0x2ec] sm:$0xf] %vm3677_vm3, %v4474_v62 }
 0x1ea   :  { %v4471_v15 = vpack.c.bf16 %v6548_v30, %v6548_v30  ;;  %v2735_v14 = vsel %vm1862_vm4, %v2402_v37, 0.0  ;;  %v2737_v17 = vsel %vm1862_vm4, %v2403_v21, 0.0  ;;  %v2405_v37 = vmul.f32 %v5931_v50, %v5931_v50  ;;  %3863 = vst.msk [vmem:[%s7223_s2 + $0x2e4] sm:$0xf] %vm3677_vm3, %v4472_v22 }
 0x1eb   :  { %v2131_v63 = vadd.f32 %v2130_v45, %v2129_v47  ;;  %v2734_v31 = vadd.f32 %v2733_v33, %v2732_v0  ;;  %v2739_v45 = vsel %vm1862_vm4, %v2404_v11, 0.0  ;;  %v4477_v21 = vpack.c.bf16 %v6601_v20, %v6601_v20 }
 0x1ec   :  { %3862 = vst.msk [vmem:[%s7223_s2 + $0x2e0] sm:$0xf] %vm3677_vm3, %v4471_v15  ;;  %v4475_v11 = vpack.c.bf16 %v6612_v54, %v6612_v54  ;;  %v4478_v50 = vpack.c.bf16 %v6624_v60, %v6624_v60  ;;  %v4476_v22 = vpack.c.bf16 %v6629_v26, %v6629_v26 }
 0x1ed   :  { %v2133_v16 = vadd.f32 %v2132_v2, %v2131_v63  ;;  %v2736_v47 = vadd.f32 %v2735_v14, %v2734_v31  ;;  %v2406_v63 = vmul.f32 %v5912_v9, %v5912_v9  ;;  %v2138_v2 = vsel %vm1862_vm4, %v5912_v9, 0.0  ;;  %3868 = vst.msk [vmem:[%s7223_s2 + $0x2f8] sm:$0xf] %vm3677_vm3, %v4477_v21 }
 0x1ee   :  { %v2741_v14 = vsel %vm1862_vm4, %v2405_v37, 0.0  ;;  %3866 = vst.msk [vmem:[%s7223_s2 + $0x2f0] sm:$0xf] %vm3677_vm3, %v4475_v11  ;;  %v2140_v9 = vsel %vm1862_vm4, %v5928_v39, 0.0  ;;  %3869 = vst.msk [vmem:[%s7223_s2 + $0x2fc] sm:$0xf] %vm3677_vm3, %v4478_v50  ;;  %v2409_v21 = vmul.f32 %v5975_v1, %v5975_v1  ;;  %v4482_v11 = vpack.c.bf16 %v6688_v61, %v6688_v61 }
 0x1ef   :  { %v2135_v3 = vadd.f32 %v2134_v46, %v2133_v16  ;;  %v2738_v0 = vadd.f32 %v2737_v17, %v2736_v47  ;;  %v2407_v46 = vmul.f32 %v5928_v39, %v5928_v39  ;;  %v2408_v16 = vmul.f32 %v5963_v28, %v5963_v28  ;;  %3867 = vst.msk [vmem:[%s7223_s2 + $0x2f4] sm:$0xf] %vm3677_vm3, %v4476_v22 }
 0x1f0   :  { %v2142_v47 = vsel %vm1862_vm4, %v5963_v28, 0.0  ;;  %v2743_v17 = vsel %vm1862_vm4, %v2406_v63, 0.0  ;;  %v4479_v39 = vpack.c.bf16 %v6676_v57, %v6676_v57  ;;  %v4480_v50 = vpack.c.bf16 %v6693_v43, %v6693_v43  ;;  %3873 = vst.msk [vmem:[%s7223_s2 + $0x30c] sm:$0xf] %vm3677_vm3, %v4482_v11 }
 0x1f1   :  { %v2137_v33 = vadd.f32 %v2136_v36, %v2135_v3  ;;  %v2740_v31 = vadd.f32 %v2739_v45, %v2738_v0  ;;  %v4481_v45 = vpack.c.bf16 %v6665_v10, %v6665_v10  ;;  %v2745_v28 = vsel %vm1862_vm4, %v2407_v46, 0.0 }
 0x1f2   :  { %v2747_v36 = vsel %vm1862_vm4, %v2408_v16, 0.0  ;;  %3870 = vst.msk [vmem:[%s7223_s2 + $0x300] sm:$0xf] %vm3677_vm3, %v4479_v39  ;;  %v2146_v46 = vsel %vm1862_vm4, %v5956_v40, 0.0  ;;  %3871 = vst.msk [vmem:[%s7223_s2 + $0x304] sm:$0xf] %vm3677_vm3, %v4480_v50  ;;  %v2415_v50 = vmul.f32 %v6016_v44, %v6016_v44 }
 0x1f3   :  { %v2139_v15 = vadd.f32 %v2138_v2, %v2137_v33  ;;  %v2742_v62 = vadd.f32 %v2741_v14, %v2740_v31  ;;  %3872 = vst.msk [vmem:[%s7223_s2 + $0x308] sm:$0xf] %vm3677_vm3, %v4481_v45  ;;  %v2144_v33 = vsel %vm1862_vm4, %v5975_v1, 0.0  ;;  %v2410_v2 = vmul.f32 %v5956_v40, %v5956_v40 }
 0x1f4   :  { %v2411_v1 = vmul.f32 %v5972_v56, %v5972_v56  ;;  %v4485_v14 = vpack.c.bf16 %v6729_v12, %v6729_v12  ;;  %v2148_v40 = vsel %vm1862_vm4, %v5972_v56, 0.0  ;;  %v2150_v22 = vsel %vm1862_vm4, %v6007_v53, 0.0 }
 0x1f5   :  { %v2141_v3 = vadd.f32 %v2140_v9, %v2139_v15  ;;  %v2744_v37 = vadd.f32 %v2743_v17, %v2742_v62  ;;  %v2749_v9 = vsel %vm1862_vm4, %v2409_v21, 0.0  ;;  %v2412_v62 = vmul.f32 %v6007_v53, %v6007_v53 }
 0x1f6   :  { %3876 = vst.msk [vmem:[%s7223_s2 + $0x318] sm:$0xf] %vm3677_vm3, %v4485_v14  ;;  %v4483_v17 = vpack.c.bf16 %v6740_v49, %v6740_v49  ;;  %v2753_v56 = vsel %vm1862_vm4, %v2411_v1, 0.0  ;;  %v2156_v1 = vsel %vm1862_vm4, %v6016_v44, 0.0  ;;  %v2160_v44 = vsel %vm1862_vm4, %v6063_v32, 0.0 }
 0x1f7   :  { %v2143_v0 = vadd.f32 %v2142_v47, %v2141_v3  ;;  %v2746_v63 = vadd.f32 %v2745_v28, %v2744_v37  ;;  %v2751_v3 = vsel %vm1862_vm4, %v2410_v2, 0.0  ;;  %v4486_v37 = vpack.c.bf16 %v6752_v5, %v6752_v5 }
 0x1f8   :  { %3874 = vst.msk [vmem:[%s7223_s2 + $0x310] sm:$0xf] %vm3677_vm3, %v4483_v17  ;;  %v2755_v28 = vsel %vm1862_vm4, %v2412_v62, 0.0  ;;  %v2154_v2 = vsel %vm1862_vm4, %v6000_v55, 0.0  ;;  %v2417_v17 = vmul.f32 %v6063_v32, %v6063_v32  ;;  %v2164_v32 = vsel %vm1862_vm4, %v6060_v34, 0.0 }
 0x1f9   :  { %v2145_v31 = vadd.f32 %v2144_v33, %v2143_v0  ;;  %v2748_v15 = vadd.f32 %v2747_v36, %v2746_v63  ;;  %v2413_v0 = vmul.f32 %v6019_v59, %v6019_v59  ;;  %3877 = vst.msk [vmem:[%s7223_s2 + $0x31c] sm:$0xf] %vm3677_vm3, %v4486_v37  ;;  %v4484_v36 = vpack.c.bf16 %v6757_v58, %v6757_v58 }
 0x1fa   :  { %v2152_v63 = vsel %vm1862_vm4, %v6019_v59, 0.0  ;;  %v2414_v33 = vmul.f32 %v6000_v55, %v6000_v55  ;;  %v2416_v59 = vmul.f32 %v6051_v24, %v6051_v24  ;;  %v2162_v37 = vsel %vm1862_vm4, %v6044_v18, 0.0 }
 0x1fb   :  { %v2147_v16 = vadd.f32 %v2146_v46, %v2145_v31  ;;  %v2750_v47 = vadd.f32 %v2749_v9, %v2748_v15  ;;  %3875 = vst.msk [vmem:[%s7223_s2 + $0x314] sm:$0xf] %vm3677_vm3, %v4484_v36  ;;  %v2757_v15 = vsel %vm1862_vm4, %v2413_v0, 0.0  ;;  %v2420_v0 = vmul.f32 %v6095_v13, %v6095_v13 }
 0x1fc   :  { %v2759_v9 = vsel %vm1862_vm4, %v2414_v33, 0.0 }
 0x1fd   :  { %v2149_v45 = vadd.f32 %v2148_v40, %v2147_v16  ;;  %v2752_v39 = vadd.f32 %v2751_v3, %v2750_v47  ;;  %v2158_v16 = vsel %vm1862_vm4, %v6051_v24, 0.0  ;;  %v2761_v40 = vsel %vm1862_vm4, %v2415_v50, 0.0  ;;  %v7345_v50 = vld [vmem:[#allocation19_spill] sm:$0xff] }
 0x1ff   :  { %v2151_v53 = vadd.f32 %v2150_v22, %v2149_v45  ;;  %v2754_v21 = vadd.f32 %v2753_v56, %v2752_v39  ;;  %v2763_v22 = vsel %vm1862_vm4, %v2416_v59, 0.0  ;;  %v2418_v45 = vmul.f32 %v6044_v18, %v6044_v18  ;;  %v7346_v59 = vld [vmem:[#allocation17_spill] sm:$0xff] }
 0x200   :  { %v2419_v39 = vmul.f32 %v6060_v34, %v6060_v34  ;;  %v2168_v34 = vsel %vm1862_vm4, %v7345_v50, 0.0 }
 0x201   :  { %v2153_v11 = vadd.f32 %v2152_v63, %v2151_v53  ;;  %v2756_v31 = vadd.f32 %v2755_v28, %v2754_v21  ;;  %v2765_v28 = vsel %vm1862_vm4, %v2417_v17, 0.0  ;;  %v2166_v21 = vsel %vm1862_vm4, %v6095_v13, 0.0 }
 0x202   :  { %v2767_v63 = vsel %vm1862_vm4, %v2418_v45, 0.0 }
 0x203   :  { %v2155_v46 = vadd.f32 %v2154_v2, %v2153_v11  ;;  %v2758_v14 = vadd.f32 %v2757_v15, %v2756_v31  ;;  %v2769_v11 = vsel %vm1862_vm4, %v2419_v39, 0.0  ;;  %v2771_v31 = vsel %vm1862_vm4, %v2420_v0, 0.0 }
 0x205   :  { %v2157_v55 = vadd.f32 %v2156_v1, %v2155_v46  ;;  %v2760_v62 = vadd.f32 %v2759_v9, %v2758_v14  ;;  %v2421_v46 = vmul.f32 %v7345_v50, %v7345_v50  ;;  %v2422_v1 = vmul.f32 %v7346_v59, %v7346_v59  ;;  %v7347_v9 = vld [vmem:[#allocation18_spill] sm:$0xff] }
 0x206   :  { %v2170_v14 = vsel %vm1862_vm4, %v7346_v59, 0.0  ;;  %v2172_v17 = vsel %vm1862_vm4, %v7347_v9, 0.0 }
 0x207   :  { %v2159_v47 = vadd.f32 %v2158_v16, %v2157_v55  ;;  %v2762_v3 = vadd.f32 %v2761_v40, %v2760_v62  ;;  %v2423_v55 = vmul.f32 %v7347_v9, %v7347_v9  ;;  %v2773_v40 = vsel %vm1862_vm4, %v2421_v46, 0.0 }
 0x208   :  { %v2775_v45 = vsel %vm1862_vm4, %v2422_v1, 0.0 }
 0x209   :  { %v2161_v24 = vadd.f32 %v2160_v44, %v2159_v47  ;;  %v2764_v56 = vadd.f32 %v2763_v22, %v2762_v3  ;;  %v7348_v47 = vld [vmem:[#allocation21_spill] sm:$0xff] }
 0x20a   :  { %v2424_v22 = vmul.f32 %v7348_v47, %v7348_v47  ;;  %v2174_v44 = vsel %vm1862_vm4, %v7348_v47, 0.0  ;;  %v2429_v47 = vmul.f32 %v7335_v42, %v7335_v42 }
 0x20b   :  { %v2163_v53 = vadd.f32 %v2162_v37, %v2161_v24  ;;  %v2766_v36 = vadd.f32 %v2765_v28, %v2764_v56  ;;  %v2777_v56 = vsel %vm1862_vm4, %v2423_v55, 0.0  ;;  %v7349_v28 = vld [vmem:[#allocation23_spill] sm:$0xff] }
 0x20c   :  { %v2425_v0 = vmul.f32 %v7349_v28, %v7349_v28 }
 0x20d   :  { %v2165_v18 = vadd.f32 %v2164_v32, %v2163_v53  ;;  %v2768_v33 = vadd.f32 %v2767_v63, %v2766_v36  ;;  %v2779_v53 = vsel %vm1862_vm4, %v2424_v22, 0.0  ;;  %v2176_v36 = vsel %vm1862_vm4, %v7349_v28, 0.0  ;;  %v7354_v28 = vld [vmem:[#allocation29_spill] sm:$0xff] }
 0x20e   :  { %v2781_v46 = vsel %vm1862_vm4, %v2425_v0, 0.0  ;;  %v2432_v0 = vmul.f32 %v7354_v28, %v7354_v28 }
 0x20f   :  { %v2167_v2 = vadd.f32 %v2166_v21, %v2165_v18  ;;  %v2770_v15 = vadd.f32 %v2769_v11, %v2768_v33  ;;  %v7350_v21 = vld [vmem:[#allocation20_spill] sm:$0xff] }
 0x210   :  { %v2426_v63 = vmul.f32 %v7350_v21, %v7350_v21  ;;  %v2178_v33 = vsel %vm1862_vm4, %v7350_v21, 0.0 }
 0x211   :  { %v2169_v13 = vadd.f32 %v2168_v34, %v2167_v2  ;;  %v2772_v16 = vadd.f32 %v2771_v31, %v2770_v15  ;;  %v7351_v2 = vld [vmem:[#allocation22_spill] sm:$0xff]  ;;  %v7352_v15 = vld [vmem:[#allocation25_spill] sm:$0xff] }
 0x212   :  { %v2427_v31 = vmul.f32 %v7351_v2, %v7351_v2  ;;  %v2428_v34 = vmul.f32 %v7352_v15, %v7352_v15  ;;  %v2180_v59 = vsel %vm1862_vm4, %v7351_v2, 0.0  ;;  %v2795_v2 = vsel %vm1862_vm4, %v2432_v0, 0.0 }
 0x213   :  { %v2171_v62 = vadd.f32 %v2170_v14, %v2169_v13  ;;  %v2774_v3 = vadd.f32 %v2773_v40, %v2772_v16  ;;  %v2182_v13 = vsel %vm1862_vm4, %v7352_v15, 0.0  ;;  %v2783_v14 = vsel %vm1862_vm4, %v2426_v63, 0.0  ;;  %v7356_v15 = vld [vmem:[#allocation28_spill] sm:$0xff] }
 0x214   :  { %v2785_v55 = vsel %vm1862_vm4, %v2427_v31, 0.0  ;;  %v2787_v40 = vsel %vm1862_vm4, %v2428_v34, 0.0  ;;  %v7355_v31 = vld [vmem:[#allocation31_spill] sm:$0xff]  ;;  %v2434_v34 = vmul.f32 %v7356_v15, %v7356_v15 }
 0x215   :  { %v2173_v24 = vadd.f32 %v2172_v17, %v2171_v62  ;;  %v2776_v37 = vadd.f32 %v2775_v45, %v2774_v3  ;;  %v2184_v17 = vsel %vm1862_vm4, %v7335_v42, 0.0  ;;  %v7353_v3 = vld [vmem:[#allocation24_spill] sm:$0xff]  ;;  %v2188_v42 = vsel %vm1862_vm4, %v7334_v27, 0.0 }
 0x217   :  { %v2175_v39 = vadd.f32 %v2174_v44, %v2173_v24  ;;  %v2778_v32 = vadd.f32 %v2777_v56, %v2776_v37  ;;  %v2430_v44 = vmul.f32 %v7353_v3, %v7353_v3  ;;  %v2186_v24 = vsel %vm1862_vm4, %v7353_v3, 0.0 }
 0x218   :  { %v2431_v56 = vmul.f32 %v7334_v27, %v7334_v27  ;;  %v2192_v27 = vsel %vm1862_vm4, %v7355_v31, 0.0 }
 0x219   :  { %v2177_v18 = vadd.f32 %v2176_v36, %v2175_v39  ;;  %v2780_v11 = vadd.f32 %v2779_v53, %v2778_v32  ;;  %v2789_v53 = vsel %vm1862_vm4, %v2429_v47, 0.0  ;;  %v2190_v36 = vsel %vm1862_vm4, %v7354_v28, 0.0  ;;  %v7358_v28 = vld [vmem:[#allocation32_spill] sm:$0xff] }
 0x21a   :  { %v2791_v21 = vsel %vm1862_vm4, %v2430_v44, 0.0  ;;  %v2438_v0 = vmul.f32 %v7358_v28, %v7358_v28 }
 0x21b   :  { %v2179_v50 = vadd.f32 %v2178_v33, %v2177_v18  ;;  %v2782_v1 = vadd.f32 %v2781_v46, %v2780_v11  ;;  %v2793_v33 = vsel %vm1862_vm4, %v2431_v56, 0.0  ;;  %v2437_v56 = vmul.f32 %v6309_v48, %v6309_v48 }
 0x21d   :  { %v2181_v16 = vadd.f32 %v2180_v59, %v2179_v50  ;;  %v2784_v9 = vadd.f32 %v2783_v14, %v2782_v1  ;;  %v2433_v50 = vmul.f32 %v7355_v31, %v7355_v31  ;;  %v2194_v1 = vsel %vm1862_vm4, %v7356_v15, 0.0  ;;  %v7357_v14 = vld [vmem:[#allocation30_spill] sm:$0xff] }
 0x21f   :  { %v2183_v62 = vadd.f32 %v2182_v13, %v2181_v16  ;;  %v2786_v22 = vadd.f32 %v2785_v55, %v2784_v9  ;;  %v2435_v16 = vmul.f32 %v7357_v14, %v7357_v14  ;;  %v2797_v55 = vsel %vm1862_vm4, %v2433_v50, 0.0 }
 0x220   :  { %v2807_v50 = vsel %vm1862_vm4, %v2438_v0, 0.0  ;;  %v2445_v0 = vmul.f32 %v6437_v23, %v6437_v23 }
 0x221   :  { %v2185_v45 = vadd.f32 %v2184_v17, %v2183_v62  ;;  %v2788_v37 = vadd.f32 %v2787_v40, %v2786_v22  ;;  %v2436_v62 = vmul.f32 %v6292_v29, %v6292_v29  ;;  %v2196_v40 = vsel %vm1862_vm4, %v7357_v14, 0.0 }
 0x222   :  { %v2198_v22 = vsel %vm1862_vm4, %v6292_v29, 0.0  ;;  %v2799_v17 = vsel %vm1862_vm4, %v2434_v34, 0.0  ;;  %v2208_v14 = vsel %vm1862_vm4, %v6373_v4, 0.0 }
 0x223   :  { %v2187_v39 = vadd.f32 %v2186_v24, %v2185_v45  ;;  %v2790_v32 = vadd.f32 %v2789_v53, %v2788_v37  ;;  %v2801_v45 = vsel %vm1862_vm4, %v2435_v16, 0.0  ;;  %v2803_v37 = vsel %vm1862_vm4, %v2436_v62, 0.0  ;;  %v7361_v16 = vld [vmem:[#allocation34_spill] sm:$0xff] }
 0x224   :  { %v2200_v53 = vsel %vm1862_vm4, %v6309_v48, 0.0  ;;  %v2210_v62 = vsel %vm1862_vm4, %v7361_v16, 0.0 }
 0x225   :  { %v2189_v63 = vadd.f32 %v2188_v42, %v2187_v39  ;;  %v2792_v18 = vadd.f32 %v2791_v21, %v2790_v32  ;;  %v2202_v42 = vsel %vm1862_vm4, %v7358_v28, 0.0 }
 0x227   :  { %v2191_v11 = vadd.f32 %v2190_v36, %v2189_v63  ;;  %v2794_v46 = vadd.f32 %v2793_v33, %v2792_v18  ;;  %v7359_v36 = vld [vmem:[#allocation33_spill] sm:$0xff]  ;;  %v2805_v18 = vsel %vm1862_vm4, %v2437_v56, 0.0  ;;  %v7360_v33 = vld [vmem:[#allocation35_spill] sm:$0xff] }
 0x228   :  { %v2439_v21 = vmul.f32 %v7359_v36, %v7359_v36  ;;  %v2204_v48 = vsel %vm1862_vm4, %v7359_v36, 0.0  ;;  %v2206_v31 = vsel %vm1862_vm4, %v7360_v33, 0.0 }
 0x229   :  { %v2193_v59 = vadd.f32 %v2192_v27, %v2191_v11  ;;  %v2796_v13 = vadd.f32 %v2795_v2, %v2794_v46  ;;  %v2440_v11 = vmul.f32 %v7360_v33, %v7360_v33  ;;  %v2821_v33 = vsel %vm1862_vm4, %v2445_v0, 0.0 }
 0x22a   :  { %v2809_v15 = vsel %vm1862_vm4, %v2439_v21, 0.0  ;;  %v7362_v21 = vld [vmem:[#allocation36_spill] sm:$0xff] }
 0x22b   :  { %v2195_v9 = vadd.f32 %v2194_v1, %v2193_v59  ;;  %v2798_v47 = vadd.f32 %v2797_v55, %v2796_v13  ;;  %v2811_v59 = vsel %vm1862_vm4, %v2440_v11, 0.0  ;;  %v2441_v1 = vmul.f32 %v6373_v4, %v6373_v4 }
 0x22c   :  { %v2212_v4 = vsel %vm1862_vm4, %v6368_v6, 0.0  ;;  %v2448_v11 = vmul.f32 %v6484_v38, %v6484_v38 }
 0x22d   :  { %v2197_v3 = vadd.f32 %v2196_v40, %v2195_v9  ;;  %v2800_v44 = vadd.f32 %v2799_v17, %v2798_v47  ;;  %v2442_v9 = vmul.f32 %v7361_v16, %v7361_v16  ;;  %v2443_v47 = vmul.f32 %v6368_v6, %v6368_v6 }
 0x22e   :  { %v2813_v17 = vsel %vm1862_vm4, %v2441_v1, 0.0  ;;  %v2216_v6 = vsel %vm1862_vm4, %v6437_v23, 0.0  ;;  %v2220_v23 = vsel %vm1862_vm4, %v7362_v21, 0.0  ;;  %v2224_v1 = vsel %vm1862_vm4, %v6501_v8, 0.0 }
 0x22f   :  { %v2199_v24 = vadd.f32 %v2198_v22, %v2197_v3  ;;  %v2802_v39 = vadd.f32 %v2801_v45, %v2800_v44  ;;  %v2444_v3 = vmul.f32 %v6420_v35, %v6420_v35  ;;  %v2214_v45 = vsel %vm1862_vm4, %v6420_v35, 0.0 }
 0x231   :  { %v2201_v29 = vadd.f32 %v2200_v53, %v2199_v24  ;;  %v2804_v32 = vadd.f32 %v2803_v37, %v2802_v39  ;;  %v2815_v24 = vsel %vm1862_vm4, %v2442_v9, 0.0  ;;  %v2817_v39 = vsel %vm1862_vm4, %v2443_v47, 0.0 }
 0x232   :  { %v2819_v28 = vsel %vm1862_vm4, %v2444_v3, 0.0  ;;  %v2451_v9 = vmul.f32 %v6496_v52, %v6496_v52 }
 0x233   :  { %v2203_v63 = vadd.f32 %v2202_v42, %v2201_v29  ;;  %v2806_v2 = vadd.f32 %v2805_v18, %v2804_v32  ;;  %v2446_v42 = vmul.f32 %v6409_v19, %v6409_v19  ;;  %v2218_v32 = vsel %vm1862_vm4, %v6409_v19, 0.0 }
 0x235   :  { %v2205_v46 = vadd.f32 %v2204_v48, %v2203_v63  ;;  %v2808_v27 = vadd.f32 %v2807_v50, %v2806_v2  ;;  %v2447_v63 = vmul.f32 %v7362_v21, %v7362_v21  ;;  %v2222_v2 = vsel %vm1862_vm4, %v6484_v38, 0.0 }
 0x237   :  { %v2207_v34 = vadd.f32 %v2206_v31, %v2205_v46  ;;  %v2810_v13 = vadd.f32 %v2809_v15, %v2808_v27  ;;  %v2823_v31 = vsel %vm1862_vm4, %v2446_v42, 0.0  ;;  %v2825_v46 = vsel %vm1862_vm4, %v2447_v63, 0.0 }
 0x238   :  { %v2827_v15 = vsel %vm1862_vm4, %v2448_v11, 0.0 }
 0x239   :  { %v2209_v55 = vadd.f32 %v2208_v14, %v2207_v34  ;;  %v2812_v40 = vadd.f32 %v2811_v59, %v2810_v13  ;;  %v2449_v34 = vmul.f32 %v6501_v8, %v6501_v8  ;;  %v2450_v13 = vmul.f32 %v6473_v51, %v6473_v51 }
 0x23a   :  { %v2226_v14 = vsel %vm1862_vm4, %v6473_v51, 0.0  ;;  %v2228_v8 = vsel %vm1862_vm4, %v6496_v52, 0.0  ;;  %v2232_v52 = vsel %vm1862_vm4, %v6565_v41, 0.0 }
 0x23b   :  { %v2211_v22 = vadd.f32 %v2210_v62, %v2209_v55  ;;  %v2814_v44 = vadd.f32 %v2813_v17, %v2812_v40  ;;  %v2829_v62 = vsel %vm1862_vm4, %v2449_v34, 0.0  ;;  %v2452_v40 = vmul.f32 %v6548_v30, %v6548_v30 }
 0x23c   :  { %v2831_v17 = vsel %vm1862_vm4, %v2450_v13, 0.0 }
 0x23d   :  { %v2213_v37 = vadd.f32 %v2212_v4, %v2211_v22  ;;  %v2816_v56 = vadd.f32 %v2815_v24, %v2814_v44  ;;  %v2230_v22 = vsel %vm1862_vm4, %v6548_v30, 0.0  ;;  %v2833_v4 = vsel %vm1862_vm4, %v2451_v9, 0.0 }
 0x23e   :  { %v2453_v24 = vmul.f32 %v6565_v41, %v6565_v41  ;;  %v2236_v41 = vsel %vm1862_vm4, %v6560_v25, 0.0  ;;  %v2462_v9 = vmul.f32 %v6665_v10, %v6665_v10 }
 0x23f   :  { %v2215_v53 = vadd.f32 %v2214_v45, %v2213_v37  ;;  %v2818_v29 = vadd.f32 %v2817_v39, %v2816_v56  ;;  %v2835_v45 = vsel %vm1862_vm4, %v2452_v40, 0.0  ;;  %v2454_v56 = vmul.f32 %v6537_v7, %v6537_v7 }
 0x240   :  { %v2234_v39 = vsel %vm1862_vm4, %v6537_v7, 0.0  ;;  %v2463_v40 = vmul.f32 %v6688_v61, %v6688_v61 }
 0x241   :  { %v2217_v35 = vadd.f32 %v2216_v6, %v2215_v53  ;;  %v2820_v36 = vadd.f32 %v2819_v28, %v2818_v29  ;;  %v2455_v28 = vmul.f32 %v6560_v25, %v6560_v25  ;;  %v2837_v29 = vsel %vm1862_vm4, %v2453_v24, 0.0 }
 0x242   :  { %v2456_v6 = vmul.f32 %v6612_v54, %v6612_v54  ;;  %v2240_v25 = vsel %vm1862_vm4, %v6629_v26, 0.0 }
 0x243   :  { %v2219_v18 = vadd.f32 %v2218_v32, %v2217_v35  ;;  %v2822_v48 = vadd.f32 %v2821_v33, %v2820_v36  ;;  %v2238_v35 = vsel %vm1862_vm4, %v6612_v54, 0.0  ;;  %v2839_v32 = vsel %vm1862_vm4, %v2454_v56, 0.0 }
 0x244   :  { %v2841_v21 = vsel %vm1862_vm4, %v2455_v28, 0.0  ;;  %v2457_v33 = vmul.f32 %v6629_v26, %v6629_v26  ;;  %v2244_v26 = vsel %vm1862_vm4, %v6624_v60, 0.0  ;;  %v2466_v56 = vmul.f32 %v6729_v12, %v6729_v12 }
 0x245   :  { %v2221_v19 = vadd.f32 %v2220_v23, %v2219_v18  ;;  %v2824_v50 = vadd.f32 %v2823_v31, %v2822_v48  ;;  %v2843_v18 = vsel %vm1862_vm4, %v2456_v6, 0.0  ;;  %v2458_v23 = vmul.f32 %v6601_v20, %v6601_v20 }
 0x246   :  { %v2242_v48 = vsel %vm1862_vm4, %v6601_v20, 0.0  ;;  %v2459_v31 = vmul.f32 %v6624_v60, %v6624_v60  ;;  %v2248_v60 = vsel %vm1862_vm4, %v6693_v43, 0.0 }
 0x247   :  { %v2223_v27 = vadd.f32 %v2222_v2, %v2221_v19  ;;  %v2826_v59 = vadd.f32 %v2825_v46, %v2824_v50  ;;  %v2845_v50 = vsel %vm1862_vm4, %v2457_v33, 0.0  ;;  %v2460_v46 = vmul.f32 %v6676_v57, %v6676_v57 }
 0x248   :  { %v2847_v34 = vsel %vm1862_vm4, %v2458_v23, 0.0 }
 0x249   :  { %v2225_v38 = vadd.f32 %v2224_v1, %v2223_v27  ;;  %v2828_v16 = vadd.f32 %v2827_v15, %v2826_v59  ;;  %v2246_v15 = vsel %vm1862_vm4, %v6676_v57, 0.0  ;;  %v2849_v1 = vsel %vm1862_vm4, %v2459_v31, 0.0 }
 0x24b   :  { %v2227_v55 = vadd.f32 %v2226_v14, %v2225_v38  ;;  %v2830_v47 = vadd.f32 %v2829_v62, %v2828_v16  ;;  %v2851_v38 = vsel %vm1862_vm4, %v2460_v46, 0.0  ;;  %v2461_v14 = vmul.f32 %v6693_v43, %v6693_v43 }
 0x24c   :  { %v2252_v43 = vsel %vm1862_vm4, %v6688_v61, 0.0  ;;  %v2256_v61 = vsel %vm1862_vm4, %v6757_v58, 0.0 }
 0x24d   :  { %v2229_v51 = vadd.f32 %v2228_v8, %v2227_v55  ;;  %v2832_v3 = vadd.f32 %v2831_v17, %v2830_v47  ;;  %v2250_v55 = vsel %vm1862_vm4, %v6665_v10, 0.0  ;;  %v2853_v47 = vsel %vm1862_vm4, %v2461_v14, 0.0 }
 0x24f   :  { %v2231_v44 = vadd.f32 %v2230_v22, %v2229_v51  ;;  %v2834_v37 = vadd.f32 %v2833_v4, %v2832_v3  ;;  %v2464_v22 = vmul.f32 %v6740_v49, %v6740_v49  ;;  %v2254_v51 = vsel %vm1862_vm4, %v6740_v49, 0.0 }
 0x250   :  { %v2855_v3 = vsel %vm1862_vm4, %v2462_v9, 0.0 }
 0x251   :  { %v2233_v30 = vadd.f32 %v2232_v52, %v2231_v44  ;;  %v2836_v53 = vadd.f32 %v2835_v45, %v2834_v37  ;;  %v2857_v44 = vsel %vm1862_vm4, %v2463_v40, 0.0  ;;  %v2859_v24 = vsel %vm1862_vm4, %v2464_v22, 0.0 }
 0x252   :  { %v2465_v37 = vmul.f32 %v6757_v58, %v6757_v58  ;;  %v2863_v58 = vsel %vm1862_vm4, %v2466_v56, 0.0 }
 0x253   :  { %v2235_v0 = vadd.f32 %v2234_v39, %v2233_v30  ;;  %v2838_v42 = vadd.f32 %v2837_v29, %v2836_v53  ;;  %v2258_v30 = vsel %vm1862_vm4, %v6729_v12, 0.0  ;;  %v2467_v53 = vmul.f32 %v6752_v5, %v6752_v5 }
 0x254   :  { %v2260_v29 = vsel %vm1862_vm4, %v6752_v5, 0.0 }
 0x255   :  { %v2237_v7 = vadd.f32 %v2236_v41, %v2235_v0  ;;  %v2840_v36 = vadd.f32 %v2839_v32, %v2838_v42  ;;  %v2861_v0 = vsel %vm1862_vm4, %v2465_v37, 0.0 }
 0x257   :  { %v2239_v63 = vadd.f32 %v2238_v35, %v2237_v7  ;;  %v2842_v11 = vadd.f32 %v2841_v21, %v2840_v36  ;;  %v2865_v35 = vsel %vm1862_vm4, %v2467_v53, 0.0 }
 0x259   :  { %v2241_v54 = vadd.f32 %v2240_v25, %v2239_v63  ;;  %v2844_v2 = vadd.f32 %v2843_v18, %v2842_v11 }
 0x25b   :  { %v2243_v19 = vadd.f32 %v2242_v48, %v2241_v54  ;;  %v2846_v27 = vadd.f32 %v2845_v50, %v2844_v2 }
 0x25d   :  { %v2245_v20 = vadd.f32 %v2244_v26, %v2243_v19  ;;  %v2848_v59 = vadd.f32 %v2847_v34, %v2846_v27 }
 0x25f   :  { %v2247_v13 = vadd.f32 %v2246_v15, %v2245_v20  ;;  %v2850_v16 = vadd.f32 %v2849_v1, %v2848_v59 }
 0x261   :  { %v2249_v57 = vadd.f32 %v2248_v60, %v2247_v13  ;;  %v2852_v62 = vadd.f32 %v2851_v38, %v2850_v16 }
 0x263   :  { %v2251_v8 = vadd.f32 %v2250_v55, %v2249_v57  ;;  %v2854_v17 = vadd.f32 %v2853_v47, %v2852_v62 }
 0x265   :  { %v2253_v10 = vadd.f32 %v2252_v43, %v2251_v8  ;;  %v2856_v4 = vadd.f32 %v2855_v3, %v2854_v17 }
 0x267   :  { %v2255_v45 = vadd.f32 %v2254_v51, %v2253_v10  ;;  %v2858_v52 = vadd.f32 %v2857_v44, %v2856_v4 }
 0x269   :  { %v2257_v49 = vadd.f32 %v2256_v61, %v2255_v45  ;;  %v2860_v39 = vadd.f32 %v2859_v24, %v2858_v52 }
 0x26b   :  { %v2259_v28 = vadd.f32 %v2258_v30, %v2257_v49  ;;  %v2862_v6 = vadd.f32 %v2861_v0, %v2860_v39 }
 0x26d   :  { %v2261_v41 = vadd.f32 %v2260_v29, %v2259_v28  ;;  %v2864_v42 = vadd.f32 %v2863_v58, %v2862_v6 }
 0x26f   :  { %v2262_v32 = vrot.slane %v2261_v41, 4  ;;  %v2866_v7 = vadd.f32 %v2865_v35, %v2864_v42 }
 0x271   :  { %v2263_v12 = vadd.f32 %v2262_v32, %v2261_v41  ;;  %v2867_v36 = vrot.slane %v2866_v7, 4 }
 0x273   :  { %v2264_v21 = vrot.slane %v2263_v12, 2  ;;  %v2868_v63 = vadd.f32 %v2867_v36, %v2866_v7 }
 0x275   :  { %v2265_v18 = vadd.f32 %v2264_v21, %v2263_v12  ;;  %v2869_v33 = vrot.slane %v2868_v63, 2 }
 0x277   :  { %v2266_v11 = vrot.slane %v2265_v18, 1  ;;  %v2870_v25 = vadd.f32 %v2869_v33, %v2868_v63 }
 0x279   :  { %v2871_v23 = vrot.slane %v2870_v25, 1  ;;  %v2267_v5 = vadd.f32 %v2266_v11, %v2265_v18 }
 0x27b   :  { %v2872_v54 = vadd.f32 %v2871_v23, %v2870_v25 }
 0x27d   :  { %v2874_v48 = vsel %vm2873_vm5, %v2267_v5, %v2872_v54 }
 0x27e   :  { %2876 = vst.msk [vmem:[%s7224_s3] sm:$0x3] %vm2875_vm6, %v2874_v48 }

// kernel: forward.10
= control target key start
LH: loop header
LB: loop body
LE: loop exit
PB: predicated region body
PF: predicated region fallthrough
CT: control target
= control target key end

     0   :  { %s169_s0 = inlined_call_operand.vmem [shape: bf16[4,14,128], index: 0, kind: input, shape index: {}]   ;;  %s170_s1 = inlined_call_operand.vmem [shape: f32[1,128], index: 1, kind: input, shape index: {}]   ;;  %s171_s2 = inlined_call_operand.vmem [shape: f32[1,128], index: 2, kind: input, shape index: {}]   ;;  %s172_s3 = inlined_call_operand.vmem [shape: bf16[14,128], index: 3, kind: output, shape index: {}]  }
   0x1   :  { %v91_v0 = vld [vmem:[%s170_s1] ss:$0 sm:$0xff]  ;;  %v95_v4 = vld [vmem:[%s169_s0 + $0x10] ss:$8 sps:$4 sm:$0xff]   ;;  %v17_v5 = vld [vmem:[%s169_s0 + $0x4] sm:$0x7] }
   0x2   :  { %v16_v1 = vld [vmem:[%s169_s0] ss:$8 sps:$4 sm:$0xff]   ;;  %v94_v6 = vld [vmem:[%s169_s0 + $0xc] sm:$0x7]  ;;  %v54_v8 = vunpack.c.l.bf16 %v95_v4  ;;  %v65_v9 = vunpack.c.h.bf16 %v95_v4  ;;  %v19_v10 = vunpack.c.l.bf16 %v17_v5  ;;  %v96_v12 = vld [vmem:[%s169_s0 + $0x14] sm:$0x7] }
   0x3   :  { %v18_v2 = vunpack.c.l.bf16 %v16_v1  ;;  %v41_v3 = vunpack.c.h.bf16 %v16_v1  ;;  %v92_v7 = vld [vmem:[%s171_s2] ss:$0 sm:$0xff]  ;;  %v42_v11 = vunpack.c.l.bf16 %v94_v6  ;;  %v98_v13 = vld [vmem:[%s169_s0 + $0x1c] sm:$0x7]  ;;  %v55_v16 = vunpack.c.l.bf16 %v96_v12 }
   0x4   :  { %v66_v17 = vunpack.c.l.bf16 %v98_v13  ;;  %v56_v18 = vmul.f32 %v91_v0, %v54_v8  ;;  %v67_v19 = vmul.f32 %v91_v0, %v65_v9  ;;  %v27_v20 = vmul.f32 %v91_v0, %v19_v10 }
   0x5   :  { %v26_v14 = vmul.f32 %v91_v0, %v18_v2  ;;  %v43_v15 = vmul.f32 %v91_v0, %v41_v3  ;;  %v44_v21 = vmul.f32 %v91_v0, %v42_v11  ;;  %v57_v24 = vmul.f32 %v91_v0, %v55_v16 }
   0x6   :  { %v58_v25 = vadd.f32 %v92_v7, %v56_v18  ;;  %v69_v26 = vadd.f32 %v92_v7, %v67_v19  ;;  %v68_v27 = vmul.f32 %v91_v0, %v66_v17  ;;  %v35_v28 = vadd.f32 %v92_v7, %v27_v20 }
   0x7   :  { %v34_v22 = vadd.f32 %v92_v7, %v26_v14  ;;  %v45_v23 = vadd.f32 %v92_v7, %v43_v15  ;;  %v46_v29 = vadd.f32 %v92_v7, %v44_v21  ;;  %v59_v30 = vadd.f32 %v92_v7, %v57_v24 }
   0x8   :  { %v70_v31 = vadd.f32 %v92_v7, %v68_v27 }
   0x9   :  { %103 = vtanh.f32 %v34_v22 }
   0xa   :  { %105 = vtanh.f32 %v45_v23 }
   0xb   :  { %107 = vtanh.f32 %v58_v25 }
   0xc   :  { %109 = vtanh.f32 %v69_v26 }
   0xd   :  { %111 = vtanh.f32 %v35_v28 }
   0xe   :  { %113 = vtanh.f32 %v46_v29 }
   0xf   :  { %115 = vtanh.f32 %v59_v30 }
  0x10   :  { %117 = vtanh.f32 %v70_v31 }
  0x13   :  { %v104_v32 = vpop.eup %103 }
  0x14   :  { %v106_v33 = vpop.eup %105 }
  0x15   :  { %v108_v34 = vpop.eup %107  ;;  %v49_v35 = vmax.f32 %v104_v32, %v106_v33 }
  0x16   :  { %v110_v36 = vpop.eup %109 }
  0x17   :  { %v112_v37 = vpop.eup %111  ;;  %v73_v38 = vmax.f32 %v108_v34, %v110_v36 }
  0x18   :  { %v114_v39 = vpop.eup %113 }
  0x19   :  { %v116_v40 = vpop.eup %115  ;;  %v75_v41 = vmax.f32 %v49_v35, %v73_v38  ;;  %v50_v42 = vmax.f32 %v112_v37, %v114_v39 }
  0x1a   :  { %v118_v43 = vpop.eup %117 }
  0x1b   :  { %v101_v44 = vpack.c.bf16 %v75_v41, %v75_v41  ;;  %v74_v45 = vmax.f32 %v116_v40, %v118_v43 }
  0x1d   :  { %85 = vst [vmem:[%s172_s3] sm:$0xf] %v101_v44  ;;  %v76_v46 = vmax.f32 %v50_v42, %v74_v45 }
  0x1f   :  { %v102_v47 = vpack.c.bf16 %v76_v46, %v76_v46 }
  0x21   :  { %86 = vst [vmem:[%s172_s3 + $0x4] sm:$0x7] %v102_v47 }

// kernel: forward.9
= control target key start
LH: loop header
LB: loop body
LE: loop exit
PB: predicated region body
PF: predicated region fallthrough
CT: control target
= control target key end

     0   :  { %v1636_v0 = vmov 0   ;;  %vm394_vm0 = vcmask 130048   ;;  %vm1254_vm1 = vcmask 125952   ;;  %vm1026_vm2 = vcmask 1040384   ;;  %s2415_s1 = inlined_call_operand.vmem [shape: bf16[144,16], index: 1, kind: input, shape index: {}]   ;;  %s2416_s0 = inlined_call_operand.vmem [shape: bf16[4,112,144], index: 0, kind: input, shape index: {}]   ;;  %s2417_s2 = inlined_call_operand.vmem [shape: bf16[4,112,16], index: 2, kind: output, shape index: {0}]   ;;  %s2418_s3 = inlined_call_operand.vmem [shape: f32[1,2,16], index: 3, kind: output, shape index: {1}]  }
   0x1   :  { %479 = vmatprep.subr.bf16.mxu0 %v1636_v0  ;;  %v1543_v1 = vld [vmem:[%s2415_s1] sm:$0xff]   ;;  %1524 = vmatprep.subr.bf16.mxu1 %v1636_v0  ;;  %v1544_v2 = vld [vmem:[%s2415_s1 + $0x8] sm:$0xff]   ;;  %v1545_v3 = vld [vmem:[%s2415_s1 + $0x10] sm:$0xff]   ;;  %vm1028_vm3 = vcmask 123904  }
   0x2   :  { %480 = vmatpush1.bf16.msra.mxu0 %v1543_v1  ;;  %1533 = vmatpush1.bf16.msra.mxu1 %v1543_v1  ;;  %v1546_v4 = vld [vmem:[%s2415_s1 + $0x18] sm:$0xff]   ;;  %v1554_v5 = vld [vmem:[%s2416_s0 + $0x4] ss:$8 sps:$4 sm:$0xff]   ;;  %v1549_v9 = vld [vmem:[%s2415_s1 + $0x30] sm:$0xff]  }
   0x3   :  { %481 = vmatprep.subr.bf16.mxu0 %v1636_v0  ;;  %1525 = vmatprep.subr.bf16.mxu1 %v1636_v0  ;;  %v1547_v6 = vld [vmem:[%s2415_s1 + $0x20] sm:$0xff]   ;;  %v1548_v7 = vld [vmem:[%s2415_s1 + $0x28] sm:$0xff]   ;;  %v1550_v10 = vld [vmem:[%s2415_s1 + $0x38] sm:$0xff]  }
   0x4   :  { %1384 = vmatprep.mubr.msk.bf16.mxu0 %vm394_vm0, %v1554_v5  ;;  %v1575_v8 = vld [vmem:[%s2416_s0 + $0xe4] ss:$8 sps:$4 sm:$0xff]   ;;  %v1552_v12 = vld [vmem:[%s2416_s0] ss:$8 sps:$4 sm:$0xff]   ;;  %v1555_v13 = vld [vmem:[%s2416_s0 + $0x14] ss:$8 sps:$4 sm:$0xff]  }
   0x5   :  { %1398 = vmatprep.mubr.msk.bf16.mxu1 %vm394_vm0, %v1575_v8  ;;  %v1551_v11 = vld [vmem:[%s2415_s1 + $0x40] sm:$0xff]   ;;  %v1579_v15 = vld [vmem:[%s2416_s0 + $0xf4] ss:$8 sps:$4 sm:$0xff]   ;;  %v1557_v16 = vld [vmem:[%s2416_s0 + $0x10] ss:$8 sps:$4 sm:$0xff]  }
   0x6   :  { %482 = vmatpush1.bf16.msra.mxu0 %v1544_v2  ;;  %1534 = vmatpush1.bf16.msra.mxu1 %v1544_v2  ;;  %v1573_v14 = vld [vmem:[%s2416_s0 + $0xe0] ss:$8 sps:$4 sm:$0xff]   ;;  %v1558_v17 = vld [vmem:[%s2416_s0 + $0x24] ss:$8 sps:$4 sm:$0xff]   ;;  %v1581_v18 = vld [vmem:[%s2416_s0 + $0xf0] ss:$8 sps:$4 sm:$0xff]  }
   0x7   :  { %483 = vmatprep.subr.bf16.mxu0 %v1636_v0  ;;  %1526 = vmatprep.subr.bf16.mxu1 %v1636_v0  ;;  %v1585_v19 = vld [vmem:[%s2416_s0 + $0x104] ss:$8 sps:$4 sm:$0xff]   ;;  %v1560_v20 = vld [vmem:[%s2416_s0 + $0x20] ss:$8 sps:$4 sm:$0xff]   ;;  %v1561_v22 = vld [vmem:[%s2416_s0 + $0x34] ss:$8 sps:$4 sm:$0xff]  }
   0x8   :  { %v1587_v21 = vld [vmem:[%s2416_s0 + $0x100] ss:$8 sps:$4 sm:$0xff]   ;;  %v1591_v23 = vld [vmem:[%s2416_s0 + $0x114] ss:$8 sps:$4 sm:$0xff]   ;;  %v1563_v24 = vld [vmem:[%s2416_s0 + $0x30] ss:$8 sps:$4 sm:$0xff]  }
   0x9   :  { %v1593_v25 = vld [vmem:[%s2416_s0 + $0x110] ss:$8 sps:$4 sm:$0xff]   ;;  %v1564_v26 = vld [vmem:[%s2416_s0 + $0x44] ss:$8 sps:$4 sm:$0xff]   ;;  %v1566_v28 = vld [vmem:[%s2416_s0 + $0x40] ss:$8 sps:$4 sm:$0xff]  }
   0xa   :  { %484 = vmatpush1.bf16.msra.mxu0 %v1545_v3  ;;  %1535 = vmatpush1.bf16.msra.mxu1 %v1545_v3  ;;  %v1597_v27 = vld [vmem:[%s2416_s0 + $0x124] ss:$8 sps:$4 sm:$0xff]   ;;  %v1599_v29 = vld [vmem:[%s2416_s0 + $0x120] ss:$8 sps:$4 sm:$0xff]   ;;  %v1567_v30 = vld [vmem:[%s2416_s0 + $0x54] ss:$8 sps:$4 sm:$0xff]  }
   0xb   :  { %485 = vmatprep.subr.bf16.mxu0 %v1636_v0  ;;  %1527 = vmatprep.subr.bf16.mxu1 %v1636_v0  ;;  %v1603_v31 = vld [vmem:[%s2416_s0 + $0x134] ss:$8 sps:$4 sm:$0xff]   ;;  %v1569_v32 = vld [vmem:[%s2416_s0 + $0x50] ss:$8 sps:$4 sm:$0xff]   ;;  %v1570_v34 = vld [vmem:[%s2416_s0 + $0x64] ss:$8 sps:$4 sm:$0xff]  }
   0xc   :  { %v1605_v33 = vld [vmem:[%s2416_s0 + $0x130] ss:$8 sps:$4 sm:$0xff]   ;;  %v1609_v35 = vld [vmem:[%s2416_s0 + $0x144] ss:$8 sps:$4 sm:$0xff]   ;;  %v1572_v36 = vld [vmem:[%s2416_s0 + $0x60] ss:$8 sps:$4 sm:$0xff]  }
   0xd   :  { %v1611_v37 = vld [vmem:[%s2416_s0 + $0x140] ss:$8 sps:$4 sm:$0xff]   ;;  %v1576_v38 = vld [vmem:[%s2416_s0 + $0x74] ss:$8 sps:$4 sm:$0xff]   ;;  %v1578_v40 = vld [vmem:[%s2416_s0 + $0x70] ss:$8 sps:$4 sm:$0xff]  }
   0xe   :  { %486 = vmatpush1.bf16.msra.mxu0 %v1546_v4  ;;  %1536 = vmatpush1.bf16.msra.mxu1 %v1546_v4  ;;  %v1615_v39 = vld [vmem:[%s2416_s0 + $0x154] ss:$8 sps:$4 sm:$0xff]   ;;  %v1617_v41 = vld [vmem:[%s2416_s0 + $0x150] ss:$8 sps:$4 sm:$0xff]   ;;  %v1582_v42 = vld [vmem:[%s2416_s0 + $0x84] ss:$8 sps:$4 sm:$0xff]  }
   0xf   :  { %487 = vmatprep.subr.bf16.mxu0 %v1636_v0  ;;  %1528 = vmatprep.subr.bf16.mxu1 %v1636_v0  ;;  %v1618_v43 = vld [vmem:[%s2416_s0 + $0x164] ss:$8 sps:$4 sm:$0xff]   ;;  %v1584_v44 = vld [vmem:[%s2416_s0 + $0x80] ss:$8 sps:$4 sm:$0xff]   ;;  %v1588_v46 = vld [vmem:[%s2416_s0 + $0x94] ss:$8 sps:$4 sm:$0xff]  }
  0x10   :  { %v1620_v45 = vld [vmem:[%s2416_s0 + $0x160] ss:$8 sps:$4 sm:$0xff]   ;;  %v1621_v47 = vld [vmem:[%s2416_s0 + $0x174] ss:$8 sps:$4 sm:$0xff]   ;;  %v1590_v48 = vld [vmem:[%s2416_s0 + $0x90] ss:$8 sps:$4 sm:$0xff]  }
  0x11   :  { %v1623_v49 = vld [vmem:[%s2416_s0 + $0x170] ss:$8 sps:$4 sm:$0xff]   ;;  %v1594_v50 = vld [vmem:[%s2416_s0 + $0xa4] ss:$8 sps:$4 sm:$0xff]   ;;  %v1596_v52 = vld [vmem:[%s2416_s0 + $0xa0] ss:$8 sps:$4 sm:$0xff]  }
  0x12   :  { %488 = vmatpush1.bf16.msra.mxu0 %v1547_v6  ;;  %1537 = vmatpush1.bf16.msra.mxu1 %v1547_v6  ;;  %v1624_v51 = vld [vmem:[%s2416_s0 + $0x184] ss:$8 sps:$4 sm:$0xff]   ;;  %v1626_v53 = vld [vmem:[%s2416_s0 + $0x180] ss:$8 sps:$4 sm:$0xff]   ;;  %v1600_v54 = vld [vmem:[%s2416_s0 + $0xb4] ss:$8 sps:$4 sm:$0xff]  }
  0x13   :  { %489 = vmatprep.subr.bf16.mxu0 %v1636_v0  ;;  %1529 = vmatprep.subr.bf16.mxu1 %v1636_v0  ;;  %v1627_v55 = vld [vmem:[%s2416_s0 + $0x194] ss:$8 sps:$4 sm:$0xff]   ;;  %v1602_v56 = vld [vmem:[%s2416_s0 + $0xb0] ss:$8 sps:$4 sm:$0xff]   ;;  %v1606_v58 = vld [vmem:[%s2416_s0 + $0xc4] ss:$8 sps:$4 sm:$0xff]  }
  0x14   :  { %v1629_v57 = vld [vmem:[%s2416_s0 + $0x190] ss:$8 sps:$4 sm:$0xff]   ;;  %v1630_v59 = vld [vmem:[%s2416_s0 + $0x1a4] ss:$8 sps:$4 sm:$0xff]   ;;  %v1608_v60 = vld [vmem:[%s2416_s0 + $0xc0] ss:$8 sps:$4 sm:$0xff]  }
  0x15   :  { %v1632_v61 = vld [vmem:[%s2416_s0 + $0x1a0] ss:$8 sps:$4 sm:$0xff]   ;;  %v1612_v62 = vld [vmem:[%s2416_s0 + $0xd4] ss:$8 sps:$4 sm:$0xff]   ;;  %v1635_v1 = vld [vmem:[%s2416_s0 + $0x1b0] ss:$8 sps:$4 sm:$0xff]  }
  0x16   :  { %490 = vmatpush1.bf16.msra.mxu0 %v1548_v7  ;;  %1538 = vmatpush1.bf16.msra.mxu1 %v1548_v7  ;;  %v1633_v63 = vld [vmem:[%s2416_s0 + $0x1b4] ss:$8 sps:$4 sm:$0xff]  }
  0x17   :  { %491 = vmatprep.subr.bf16.mxu0 %v1636_v0  ;;  %1530 = vmatprep.subr.bf16.mxu1 %v1636_v0 }
  0x1a   :  { %492 = vmatpush1.bf16.msra.mxu0 %v1549_v9  ;;  %1539 = vmatpush1.bf16.msra.mxu1 %v1549_v9 }
  0x1b   :  { %493 = vmatprep.subr.bf16.mxu0 %v1636_v0  ;;  %1531 = vmatprep.subr.bf16.mxu1 %v1636_v0 }
  0x1e   :  { %494 = vmatpush1.bf16.msra.mxu0 %v1550_v10  ;;  %1540 = vmatpush1.bf16.msra.mxu1 %v1550_v10 }
  0x1f   :  { %495 = vmatprep.subr.bf16.mxu0 %v1636_v0  ;;  %1532 = vmatprep.subr.bf16.mxu1 %v1636_v0  ;;  %v1614_v0 = vld [vmem:[%s2416_s0 + $0xd0] ss:$8 sps:$4 sm:$0xff]  }
  0x22   :  { %496 = vmatpush1.bf16.msra.mxu0 %v1551_v11  ;;  %1541 = vmatpush1.bf16.msra.mxu1 %v1551_v11 }
  0x25   :  { %512 = vmatmul.mubr.bf16.vlgmr.msra.gmra.mrb[0].mxu0 %v1552_v12  ;;  %624 = vmatmul.mubr.bf16.vlgmr.msra.gmra.mrb[0].mxu1 %v1573_v14 }
  0x26   :  { %1385 = vmatprep.mubr.msk.bf16.mxu0 %vm394_vm0, %v1555_v13  ;;  %1399 = vmatprep.mubr.msk.bf16.mxu1 %vm394_vm0, %v1579_v15 }
  0x2d   :  { %520 = vmatmul.mubr.bf16.gmra.mrb[4].mxu0 %v1557_v16  ;;  %632 = vmatmul.mubr.bf16.gmra.mrb[4].mxu1 %v1581_v18 }
  0x2e   :  { %1386 = vmatprep.mubr.msk.bf16.mxu0 %vm394_vm0, %v1558_v17  ;;  %1400 = vmatprep.mubr.msk.bf16.mxu1 %vm394_vm0, %v1585_v19 }
  0x35   :  { %528 = vmatmul.mubr.bf16.gmra.mrb[8].mxu0 %v1560_v20  ;;  %640 = vmatmul.mubr.bf16.gmra.mrb[8].mxu1 %v1587_v21 }
  0x36   :  { %1387 = vmatprep.mubr.msk.bf16.mxu0 %vm394_vm0, %v1561_v22  ;;  %1401 = vmatprep.mubr.msk.bf16.mxu1 %vm394_vm0, %v1591_v23 }
  0x3d   :  { %536 = vmatmul.mubr.bf16.gmra.mrb[12].mxu0 %v1563_v24  ;;  %648 = vmatmul.mubr.bf16.gmra.mrb[12].mxu1 %v1593_v25 }
  0x3e   :  { %1388 = vmatprep.mubr.msk.bf16.mxu0 %vm394_vm0, %v1564_v26  ;;  %1402 = vmatprep.mubr.msk.bf16.mxu1 %vm394_vm0, %v1597_v27 }
  0x45   :  { %544 = vmatmul.mubr.bf16.gmra.mrb[16].mxu0 %v1566_v28  ;;  %656 = vmatmul.mubr.bf16.gmra.mrb[16].mxu1 %v1599_v29 }
  0x46   :  { %1389 = vmatprep.mubr.msk.bf16.mxu0 %vm394_vm0, %v1567_v30  ;;  %1403 = vmatprep.mubr.msk.bf16.mxu1 %vm394_vm0, %v1603_v31 }
  0x4d   :  { %552 = vmatmul.mubr.bf16.gmra.mrb[20].mxu0 %v1569_v32  ;;  %664 = vmatmul.mubr.bf16.gmra.mrb[20].mxu1 %v1605_v33 }
  0x4e   :  { %1390 = vmatprep.mubr.msk.bf16.mxu0 %vm394_vm0, %v1570_v34  ;;  %1404 = vmatprep.mubr.msk.bf16.mxu1 %vm394_vm0, %v1609_v35 }
  0x55   :  { %560 = vmatmul.mubr.bf16.gmra.mrb[24].mxu0 %v1572_v36  ;;  %672 = vmatmul.mubr.bf16.gmra.mrb[24].mxu1 %v1611_v37 }
  0x56   :  { %1391 = vmatprep.mubr.msk.bf16.mxu0 %vm394_vm0, %v1576_v38  ;;  %1405 = vmatprep.mubr.msk.bf16.mxu1 %vm394_vm0, %v1615_v39 }
  0x5d   :  { %568 = vmatmul.mubr.bf16.gmra.mrb[28].mxu0 %v1578_v40  ;;  %680 = vmatmul.mubr.bf16.gmra.mrb[28].mxu1 %v1617_v41 }
  0x5e   :  { %1392 = vmatprep.mubr.msk.bf16.mxu0 %vm394_vm0, %v1582_v42  ;;  %1406 = vmatprep.mubr.msk.bf16.mxu1 %vm394_vm0, %v1618_v43 }
  0x65   :  { %576 = vmatmul.mubr.bf16.gmra.mrb[32].mxu0 %v1584_v44  ;;  %688 = vmatmul.mubr.bf16.gmra.mrb[32].mxu1 %v1620_v45 }
  0x66   :  { %1393 = vmatprep.mubr.msk.bf16.mxu0 %vm394_vm0, %v1588_v46  ;;  %1407 = vmatprep.mubr.msk.bf16.mxu1 %vm394_vm0, %v1621_v47 }
  0x6d   :  { %584 = vmatmul.mubr.bf16.gmra.mrb[36].mxu0 %v1590_v48  ;;  %696 = vmatmul.mubr.bf16.gmra.mrb[36].mxu1 %v1623_v49 }
  0x6e   :  { %1394 = vmatprep.mubr.msk.bf16.mxu0 %vm394_vm0, %v1594_v50  ;;  %1408 = vmatprep.mubr.msk.bf16.mxu1 %vm394_vm0, %v1624_v51 }
  0x75   :  { %592 = vmatmul.mubr.bf16.gmra.mrb[40].mxu0 %v1596_v52  ;;  %704 = vmatmul.mubr.bf16.gmra.mrb[40].mxu1 %v1626_v53 }
  0x76   :  { %1395 = vmatprep.mubr.msk.bf16.mxu0 %vm394_vm0, %v1600_v54  ;;  %1409 = vmatprep.mubr.msk.bf16.mxu1 %vm394_vm0, %v1627_v55 }
  0x7d   :  { %600 = vmatmul.mubr.bf16.gmra.mrb[44].mxu0 %v1602_v56  ;;  %712 = vmatmul.mubr.bf16.gmra.mrb[44].mxu1 %v1629_v57 }
  0x7e   :  { %1396 = vmatprep.mubr.msk.bf16.mxu0 %vm394_vm0, %v1606_v58  ;;  %1410 = vmatprep.mubr.msk.bf16.mxu1 %vm394_vm0, %v1630_v59 }
  0x85   :  { %608 = vmatmul.mubr.bf16.gmra.mrb[48].mxu0 %v1608_v60  ;;  %720 = vmatmul.mubr.bf16.gmra.mrb[48].mxu1 %v1632_v61 }
  0x86   :  { %1397 = vmatprep.mubr.msk.bf16.mxu0 %vm394_vm0, %v1612_v62  ;;  %1411 = vmatprep.mubr.msk.bf16.mxu1 %vm394_vm0, %v1633_v63 }
  0x8d   :  { %616 = vmatmul.mubr.bf16.gmra.mrb[52].mxu0 %v1614_v0  ;;  %728 = vmatmul.mubr.bf16.gmra.mrb[52].mxu1 %v1635_v1 }
  0xf8   :  { %v513_v2 = vpop.f32.mrb[0].mxu0  ;;  %v1880_v3 = vpop.f32.mrb[0].mxu1 }
  0xf9   :  { %v853_v4 = vmul.f32 %v513_v2, %v513_v2  ;;  %v1468_v5 = vpack.c.bf16 %v513_v2, %v513_v2  ;;  %v515_v6 = vpop.f32.mrb[1].mxu0  ;;  %v627_v7 = vpop.f32.mrb[1].mxu1  ;;  %v1496_v9 = vpack.c.bf16 %v1880_v3, %v1880_v3  ;;  %v736_v11 = vsel %vm394_vm0, %v513_v2, 0.0 }
  0xfa   :  { %v516_v8 = vpop.f32.mrb[2].mxu0  ;;  %v1884_v10 = vpop.f32.mrb[2].mxu1 }
  0xfb   :  { %1255 = vst.msk [vmem:[%s2417_s2] sm:$0xf] %vm1254_vm1, %v1468_v5  ;;  %v737_v12 = vsel %vm394_vm0, %v516_v8, 0.0  ;;  %v854_v13 = vmul.f32 %v516_v8, %v516_v8  ;;  %v1469_v14 = vpack.c.bf16 %v516_v8, %v516_v8  ;;  %v518_v15 = vpop.f32.mrb[3].mxu0  ;;  %v630_v16 = vpop.f32.mrb[3].mxu1  ;;  %v909_v18 = vsel %vm394_vm0, %v853_v4, 0.0 }
  0xfc   :  { %v738_v17 = vadd.f32 %v737_v12, %v736_v11  ;;  %1283 = vst.msk [vmem:[%s2417_s2 + $0x70] sm:$0xf] %vm1254_vm1, %v1496_v9  ;;  %v1497_v20 = vpack.c.bf16 %v1884_v10, %v1884_v10 }
  0xfd   :  { %v910_v19 = vsel %vm394_vm0, %v854_v13, 0.0  ;;  %1256 = vst.msk [vmem:[%s2417_s2 + $0x4] sm:$0xf] %vm1254_vm1, %v1469_v14 }
  0xfe   :  { %v911_v21 = vadd.f32 %v910_v19, %v909_v18  ;;  %1284 = vst.msk [vmem:[%s2417_s2 + $0x74] sm:$0xf] %vm1254_vm1, %v1497_v20 }
 0x100   :  { %v521_v22 = vpop.f32.mrb[4].mxu0  ;;  %v1908_v23 = vpop.f32.mrb[4].mxu1 }
 0x101   :  { %v739_v24 = vsel %vm394_vm0, %v521_v22, 0.0  ;;  %v855_v25 = vmul.f32 %v521_v22, %v521_v22  ;;  %v1470_v26 = vpack.c.bf16 %v521_v22, %v521_v22  ;;  %v523_v27 = vpop.f32.mrb[5].mxu0  ;;  %v635_v28 = vpop.f32.mrb[5].mxu1  ;;  %v1498_v31 = vpack.c.bf16 %v1908_v23, %v1908_v23 }
 0x102   :  { %v740_v29 = vadd.f32 %v739_v24, %v738_v17  ;;  %v524_v30 = vpop.f32.mrb[6].mxu0  ;;  %v1913_v32 = vpop.f32.mrb[6].mxu1 }
 0x103   :  { %v912_v33 = vsel %vm394_vm0, %v855_v25, 0.0  ;;  %1257 = vst.msk [vmem:[%s2417_s2 + $0x8] sm:$0xf] %vm1254_vm1, %v1470_v26  ;;  %v741_v34 = vsel %vm394_vm0, %v524_v30, 0.0  ;;  %v856_v35 = vmul.f32 %v524_v30, %v524_v30  ;;  %v1471_v36 = vpack.c.bf16 %v524_v30, %v524_v30  ;;  %v526_v37 = vpop.f32.mrb[7].mxu0  ;;  %v638_v38 = vpop.f32.mrb[7].mxu1 }
 0x104   :  { %v913_v39 = vadd.f32 %v912_v33, %v911_v21  ;;  %v742_v40 = vadd.f32 %v741_v34, %v740_v29  ;;  %1285 = vst.msk [vmem:[%s2417_s2 + $0x78] sm:$0xf] %vm1254_vm1, %v1498_v31  ;;  %v1499_v42 = vpack.c.bf16 %v1913_v32, %v1913_v32 }
 0x105   :  { %v914_v41 = vsel %vm394_vm0, %v856_v35, 0.0  ;;  %1258 = vst.msk [vmem:[%s2417_s2 + $0xc] sm:$0xf] %vm1254_vm1, %v1471_v36 }
 0x106   :  { %v915_v43 = vadd.f32 %v914_v41, %v913_v39  ;;  %1286 = vst.msk [vmem:[%s2417_s2 + $0x7c] sm:$0xf] %vm1254_vm1, %v1499_v42 }
 0x108   :  { %v529_v44 = vpop.f32.mrb[8].mxu0  ;;  %v1936_v45 = vpop.f32.mrb[8].mxu1 }
 0x109   :  { %v743_v46 = vsel %vm394_vm0, %v529_v44, 0.0  ;;  %v857_v47 = vmul.f32 %v529_v44, %v529_v44  ;;  %v1472_v48 = vpack.c.bf16 %v529_v44, %v529_v44  ;;  %v531_v49 = vpop.f32.mrb[9].mxu0  ;;  %v643_v50 = vpop.f32.mrb[9].mxu1  ;;  %v1500_v53 = vpack.c.bf16 %v1936_v45, %v1936_v45 }
 0x10a   :  { %v744_v51 = vadd.f32 %v743_v46, %v742_v40  ;;  %v532_v52 = vpop.f32.mrb[10].mxu0  ;;  %v1941_v54 = vpop.f32.mrb[10].mxu1 }
 0x10b   :  { %v916_v55 = vsel %vm394_vm0, %v857_v47, 0.0  ;;  %1259 = vst.msk [vmem:[%s2417_s2 + $0x10] sm:$0xf] %vm1254_vm1, %v1472_v48  ;;  %v745_v56 = vsel %vm394_vm0, %v532_v52, 0.0  ;;  %v858_v57 = vmul.f32 %v532_v52, %v532_v52  ;;  %v1473_v58 = vpack.c.bf16 %v532_v52, %v532_v52  ;;  %v534_v59 = vpop.f32.mrb[11].mxu0  ;;  %v646_v60 = vpop.f32.mrb[11].mxu1 }
 0x10c   :  { %v917_v61 = vadd.f32 %v916_v55, %v915_v43  ;;  %v746_v62 = vadd.f32 %v745_v56, %v744_v51  ;;  %1287 = vst.msk [vmem:[%s2417_s2 + $0x80] sm:$0xf] %vm1254_vm1, %v1500_v53  ;;  %v1501_v0 = vpack.c.bf16 %v1941_v54, %v1941_v54 }
 0x10d   :  { %v918_v63 = vsel %vm394_vm0, %v858_v57, 0.0  ;;  %1260 = vst.msk [vmem:[%s2417_s2 + $0x14] sm:$0xf] %vm1254_vm1, %v1473_v58 }
 0x10e   :  { %v919_v1 = vadd.f32 %v918_v63, %v917_v61  ;;  %1288 = vst.msk [vmem:[%s2417_s2 + $0x84] sm:$0xf] %vm1254_vm1, %v1501_v0 }
 0x110   :  { %v537_v2 = vpop.f32.mrb[12].mxu0  ;;  %v1964_v4 = vpop.f32.mrb[12].mxu1 }
 0x111   :  { %v747_v5 = vsel %vm394_vm0, %v537_v2, 0.0  ;;  %v859_v6 = vmul.f32 %v537_v2, %v537_v2  ;;  %v1474_v7 = vpack.c.bf16 %v537_v2, %v537_v2  ;;  %v539_v8 = vpop.f32.mrb[13].mxu0  ;;  %v651_v9 = vpop.f32.mrb[13].mxu1  ;;  %v1502_v13 = vpack.c.bf16 %v1964_v4, %v1964_v4 }
 0x112   :  { %v748_v11 = vadd.f32 %v747_v5, %v746_v62  ;;  %v540_v12 = vpop.f32.mrb[14].mxu0  ;;  %v1969_v14 = vpop.f32.mrb[14].mxu1 }
 0x113   :  { %v920_v15 = vsel %vm394_vm0, %v859_v6, 0.0  ;;  %1261 = vst.msk [vmem:[%s2417_s2 + $0x18] sm:$0xf] %vm1254_vm1, %v1474_v7  ;;  %v749_v16 = vsel %vm394_vm0, %v540_v12, 0.0  ;;  %v860_v17 = vmul.f32 %v540_v12, %v540_v12  ;;  %v1475_v18 = vpack.c.bf16 %v540_v12, %v540_v12  ;;  %v542_v19 = vpop.f32.mrb[15].mxu0  ;;  %v654_v20 = vpop.f32.mrb[15].mxu1 }
 0x114   :  { %v921_v21 = vadd.f32 %v920_v15, %v919_v1  ;;  %v750_v22 = vadd.f32 %v749_v16, %v748_v11  ;;  %1289 = vst.msk [vmem:[%s2417_s2 + $0x88] sm:$0xf] %vm1254_vm1, %v1502_v13  ;;  %v1503_v25 = vpack.c.bf16 %v1969_v14, %v1969_v14 }
 0x115   :  { %v922_v24 = vsel %vm394_vm0, %v860_v17, 0.0  ;;  %1262 = vst.msk [vmem:[%s2417_s2 + $0x1c] sm:$0xf] %vm1254_vm1, %v1475_v18 }
 0x116   :  { %v923_v26 = vadd.f32 %v922_v24, %v921_v21  ;;  %1290 = vst.msk [vmem:[%s2417_s2 + $0x8c] sm:$0xf] %vm1254_vm1, %v1503_v25 }
 0x118   :  { %v545_v27 = vpop.f32.mrb[16].mxu0  ;;  %v1992_v28 = vpop.f32.mrb[16].mxu1 }
 0x119   :  { %v751_v29 = vsel %vm394_vm0, %v545_v27, 0.0  ;;  %v861_v30 = vmul.f32 %v545_v27, %v545_v27  ;;  %v1476_v31 = vpack.c.bf16 %v545_v27, %v545_v27  ;;  %v547_v33 = vpop.f32.mrb[17].mxu0  ;;  %v659_v34 = vpop.f32.mrb[17].mxu1  ;;  %v1504_v37 = vpack.c.bf16 %v1992_v28, %v1992_v28 }
 0x11a   :  { %v752_v35 = vadd.f32 %v751_v29, %v750_v22  ;;  %v548_v36 = vpop.f32.mrb[18].mxu0  ;;  %v1997_v38 = vpop.f32.mrb[18].mxu1 }
 0x11b   :  { %v924_v39 = vsel %vm394_vm0, %v861_v30, 0.0  ;;  %1263 = vst.msk [vmem:[%s2417_s2 + $0x20] sm:$0xf] %vm1254_vm1, %v1476_v31  ;;  %v753_v40 = vsel %vm394_vm0, %v548_v36, 0.0  ;;  %v862_v41 = vmul.f32 %v548_v36, %v548_v36  ;;  %v1477_v42 = vpack.c.bf16 %v548_v36, %v548_v36  ;;  %v550_v43 = vpop.f32.mrb[19].mxu0  ;;  %v662_v44 = vpop.f32.mrb[19].mxu1 }
 0x11c   :  { %v925_v46 = vadd.f32 %v924_v39, %v923_v26  ;;  %v754_v47 = vadd.f32 %v753_v40, %v752_v35  ;;  %1291 = vst.msk [vmem:[%s2417_s2 + $0x90] sm:$0xf] %vm1254_vm1, %v1504_v37  ;;  %v1505_v49 = vpack.c.bf16 %v1997_v38, %v1997_v38 }
 0x11d   :  { %v926_v48 = vsel %vm394_vm0, %v862_v41, 0.0  ;;  %1264 = vst.msk [vmem:[%s2417_s2 + $0x24] sm:$0xf] %vm1254_vm1, %v1477_v42 }
 0x11e   :  { %v927_v50 = vadd.f32 %v926_v48, %v925_v46  ;;  %1292 = vst.msk [vmem:[%s2417_s2 + $0x94] sm:$0xf] %vm1254_vm1, %v1505_v49 }
 0x120   :  { %v553_v51 = vpop.f32.mrb[20].mxu0  ;;  %v2020_v52 = vpop.f32.mrb[20].mxu1 }
 0x121   :  { %v755_v53 = vsel %vm394_vm0, %v553_v51, 0.0  ;;  %v863_v55 = vmul.f32 %v553_v51, %v553_v51  ;;  %v1478_v56 = vpack.c.bf16 %v553_v51, %v553_v51  ;;  %v555_v57 = vpop.f32.mrb[21].mxu0  ;;  %v667_v58 = vpop.f32.mrb[21].mxu1  ;;  %v1506_v61 = vpack.c.bf16 %v2020_v52, %v2020_v52 }
 0x122   :  { %v756_v59 = vadd.f32 %v755_v53, %v754_v47  ;;  %v556_v60 = vpop.f32.mrb[22].mxu0  ;;  %v2025_v62 = vpop.f32.mrb[22].mxu1 }
 0x123   :  { %v928_v63 = vsel %vm394_vm0, %v863_v55, 0.0  ;;  %1265 = vst.msk [vmem:[%s2417_s2 + $0x28] sm:$0xf] %vm1254_vm1, %v1478_v56  ;;  %v757_v0 = vsel %vm394_vm0, %v556_v60, 0.0  ;;  %v864_v1 = vmul.f32 %v556_v60, %v556_v60  ;;  %v1479_v2 = vpack.c.bf16 %v556_v60, %v556_v60  ;;  %v558_v5 = vpop.f32.mrb[23].mxu0  ;;  %v670_v6 = vpop.f32.mrb[23].mxu1 }
 0x124   :  { %v929_v7 = vadd.f32 %v928_v63, %v927_v50  ;;  %v758_v8 = vadd.f32 %v757_v0, %v756_v59  ;;  %1293 = vst.msk [vmem:[%s2417_s2 + $0x98] sm:$0xf] %vm1254_vm1, %v1506_v61  ;;  %v1507_v11 = vpack.c.bf16 %v2025_v62, %v2025_v62 }
 0x125   :  { %v930_v9 = vsel %vm394_vm0, %v864_v1, 0.0  ;;  %1266 = vst.msk [vmem:[%s2417_s2 + $0x2c] sm:$0xf] %vm1254_vm1, %v1479_v2 }
 0x126   :  { %v931_v12 = vadd.f32 %v930_v9, %v929_v7  ;;  %1294 = vst.msk [vmem:[%s2417_s2 + $0x9c] sm:$0xf] %vm1254_vm1, %v1507_v11 }
 0x128   :  { %v561_v13 = vpop.f32.mrb[24].mxu0  ;;  %v2048_v15 = vpop.f32.mrb[24].mxu1 }
 0x129   :  { %v759_v16 = vsel %vm394_vm0, %v561_v13, 0.0  ;;  %v865_v17 = vmul.f32 %v561_v13, %v561_v13  ;;  %v1480_v18 = vpack.c.bf16 %v561_v13, %v561_v13  ;;  %v563_v19 = vpop.f32.mrb[25].mxu0  ;;  %v675_v20 = vpop.f32.mrb[25].mxu1  ;;  %v1508_v24 = vpack.c.bf16 %v2048_v15, %v2048_v15 }
 0x12a   :  { %v760_v21 = vadd.f32 %v759_v16, %v758_v8  ;;  %v564_v22 = vpop.f32.mrb[26].mxu0  ;;  %v2053_v25 = vpop.f32.mrb[26].mxu1 }
 0x12b   :  { %v932_v26 = vsel %vm394_vm0, %v865_v17, 0.0  ;;  %1267 = vst.msk [vmem:[%s2417_s2 + $0x30] sm:$0xf] %vm1254_vm1, %v1480_v18  ;;  %v761_v27 = vsel %vm394_vm0, %v564_v22, 0.0  ;;  %v866_v29 = vmul.f32 %v564_v22, %v564_v22  ;;  %v1481_v30 = vpack.c.bf16 %v564_v22, %v564_v22  ;;  %v566_v31 = vpop.f32.mrb[27].mxu0  ;;  %v678_v33 = vpop.f32.mrb[27].mxu1 }
 0x12c   :  { %v933_v34 = vadd.f32 %v932_v26, %v931_v12  ;;  %v762_v35 = vadd.f32 %v761_v27, %v760_v21  ;;  %1295 = vst.msk [vmem:[%s2417_s2 + $0xa0] sm:$0xf] %vm1254_vm1, %v1508_v24  ;;  %v1509_v37 = vpack.c.bf16 %v2053_v25, %v2053_v25 }
 0x12d   :  { %v934_v36 = vsel %vm394_vm0, %v866_v29, 0.0  ;;  %1268 = vst.msk [vmem:[%s2417_s2 + $0x34] sm:$0xf] %vm1254_vm1, %v1481_v30 }
 0x12e   :  { %v935_v39 = vadd.f32 %v934_v36, %v933_v34  ;;  %1296 = vst.msk [vmem:[%s2417_s2 + $0xa4] sm:$0xf] %vm1254_vm1, %v1509_v37 }
 0x130   :  { %v569_v40 = vpop.f32.mrb[28].mxu0  ;;  %v2076_v41 = vpop.f32.mrb[28].mxu1 }
 0x131   :  { %v763_v42 = vsel %vm394_vm0, %v569_v40, 0.0  ;;  %v867_v43 = vmul.f32 %v569_v40, %v569_v40  ;;  %v1482_v44 = vpack.c.bf16 %v569_v40, %v569_v40  ;;  %v571_v46 = vpop.f32.mrb[29].mxu0  ;;  %v683_v47 = vpop.f32.mrb[29].mxu1  ;;  %v1510_v50 = vpack.c.bf16 %v2076_v41, %v2076_v41 }
 0x132   :  { %v764_v48 = vadd.f32 %v763_v42, %v762_v35  ;;  %v572_v49 = vpop.f32.mrb[30].mxu0  ;;  %v2081_v51 = vpop.f32.mrb[30].mxu1 }
 0x133   :  { %v936_v53 = vsel %vm394_vm0, %v867_v43, 0.0  ;;  %1269 = vst.msk [vmem:[%s2417_s2 + $0x38] sm:$0xf] %vm1254_vm1, %v1482_v44  ;;  %v765_v55 = vsel %vm394_vm0, %v572_v49, 0.0  ;;  %v868_v56 = vmul.f32 %v572_v49, %v572_v49  ;;  %v1483_v57 = vpack.c.bf16 %v572_v49, %v572_v49  ;;  %v574_v58 = vpop.f32.mrb[31].mxu0  ;;  %v686_v59 = vpop.f32.mrb[31].mxu1 }
 0x134   :  { %v937_v60 = vadd.f32 %v936_v53, %v935_v39  ;;  %v766_v61 = vadd.f32 %v765_v55, %v764_v48  ;;  %1297 = vst.msk [vmem:[%s2417_s2 + $0xa8] sm:$0xf] %vm1254_vm1, %v1510_v50  ;;  %v1511_v0 = vpack.c.bf16 %v2081_v51, %v2081_v51 }
 0x135   :  { %v938_v63 = vsel %vm394_vm0, %v868_v56, 0.0  ;;  %1270 = vst.msk [vmem:[%s2417_s2 + $0x3c] sm:$0xf] %vm1254_vm1, %v1483_v57 }
 0x136   :  { %v939_v1 = vadd.f32 %v938_v63, %v937_v60  ;;  %1298 = vst.msk [vmem:[%s2417_s2 + $0xac] sm:$0xf] %vm1254_vm1, %v1511_v0 }
 0x138   :  { %v577_v2 = vpop.f32.mrb[32].mxu0  ;;  %v2104_v5 = vpop.f32.mrb[32].mxu1 }
 0x139   :  { %v767_v6 = vsel %vm394_vm0, %v577_v2, 0.0  ;;  %v869_v7 = vmul.f32 %v577_v2, %v577_v2  ;;  %v1484_v8 = vpack.c.bf16 %v577_v2, %v577_v2  ;;  %v579_v9 = vpop.f32.mrb[33].mxu0  ;;  %v691_v11 = vpop.f32.mrb[33].mxu1  ;;  %v1512_v16 = vpack.c.bf16 %v2104_v5, %v2104_v5 }
 0x13a   :  { %v768_v12 = vadd.f32 %v767_v6, %v766_v61  ;;  %v580_v13 = vpop.f32.mrb[34].mxu0  ;;  %v2109_v17 = vpop.f32.mrb[34].mxu1 }
 0x13b   :  { %v940_v18 = vsel %vm394_vm0, %v869_v7, 0.0  ;;  %1271 = vst.msk [vmem:[%s2417_s2 + $0x40] sm:$0xf] %vm1254_vm1, %v1484_v8  ;;  %v769_v19 = vsel %vm394_vm0, %v580_v13, 0.0  ;;  %v870_v20 = vmul.f32 %v580_v13, %v580_v13  ;;  %v1485_v21 = vpack.c.bf16 %v580_v13, %v580_v13  ;;  %v582_v22 = vpop.f32.mrb[35].mxu0  ;;  %v694_v24 = vpop.f32.mrb[35].mxu1 }
 0x13c   :  { %v941_v26 = vadd.f32 %v940_v18, %v939_v1  ;;  %v770_v27 = vadd.f32 %v769_v19, %v768_v12  ;;  %1299 = vst.msk [vmem:[%s2417_s2 + $0xb0] sm:$0xf] %vm1254_vm1, %v1512_v16  ;;  %v1513_v30 = vpack.c.bf16 %v2109_v17, %v2109_v17 }
 0x13d   :  { %v942_v29 = vsel %vm394_vm0, %v870_v20, 0.0  ;;  %1272 = vst.msk [vmem:[%s2417_s2 + $0x44] sm:$0xf] %vm1254_vm1, %v1485_v21 }
 0x13e   :  { %v943_v31 = vadd.f32 %v942_v29, %v941_v26  ;;  %1300 = vst.msk [vmem:[%s2417_s2 + $0xb4] sm:$0xf] %vm1254_vm1, %v1513_v30 }
 0x140   :  { %v585_v33 = vpop.f32.mrb[36].mxu0  ;;  %v2132_v34 = vpop.f32.mrb[36].mxu1 }
 0x141   :  { %v771_v35 = vsel %vm394_vm0, %v585_v33, 0.0  ;;  %v871_v36 = vmul.f32 %v585_v33, %v585_v33  ;;  %v1486_v37 = vpack.c.bf16 %v585_v33, %v585_v33  ;;  %v587_v39 = vpop.f32.mrb[37].mxu0  ;;  %v699_v40 = vpop.f32.mrb[37].mxu1  ;;  %v1514_v44 = vpack.c.bf16 %v2132_v34, %v2132_v34 }
 0x142   :  { %v772_v42 = vadd.f32 %v771_v35, %v770_v27  ;;  %v588_v43 = vpop.f32.mrb[38].mxu0  ;;  %v2137_v46 = vpop.f32.mrb[38].mxu1 }
 0x143   :  { %v944_v47 = vsel %vm394_vm0, %v871_v36, 0.0  ;;  %1273 = vst.msk [vmem:[%s2417_s2 + $0x48] sm:$0xf] %vm1254_vm1, %v1486_v37  ;;  %v773_v48 = vsel %vm394_vm0, %v588_v43, 0.0  ;;  %v872_v49 = vmul.f32 %v588_v43, %v588_v43  ;;  %v1487_v50 = vpack.c.bf16 %v588_v43, %v588_v43  ;;  %v590_v53 = vpop.f32.mrb[39].mxu0  ;;  %v702_v55 = vpop.f32.mrb[39].mxu1 }
 0x144   :  { %v945_v56 = vadd.f32 %v944_v47, %v943_v31  ;;  %v774_v57 = vadd.f32 %v773_v48, %v772_v42  ;;  %1301 = vst.msk [vmem:[%s2417_s2 + $0xb8] sm:$0xf] %vm1254_vm1, %v1514_v44  ;;  %v1515_v59 = vpack.c.bf16 %v2137_v46, %v2137_v46 }
 0x145   :  { %v946_v58 = vsel %vm394_vm0, %v872_v49, 0.0  ;;  %1274 = vst.msk [vmem:[%s2417_s2 + $0x4c] sm:$0xf] %vm1254_vm1, %v1487_v50 }
 0x146   :  { %v947_v60 = vadd.f32 %v946_v58, %v945_v56  ;;  %1302 = vst.msk [vmem:[%s2417_s2 + $0xbc] sm:$0xf] %vm1254_vm1, %v1515_v59 }
 0x148   :  { %v593_v61 = vpop.f32.mrb[40].mxu0  ;;  %v2160_v63 = vpop.f32.mrb[40].mxu1 }
 0x149   :  { %v775_v0 = vsel %vm394_vm0, %v593_v61, 0.0  ;;  %v873_v1 = vmul.f32 %v593_v61, %v593_v61  ;;  %v1488_v2 = vpack.c.bf16 %v593_v61, %v593_v61  ;;  %v595_v6 = vpop.f32.mrb[41].mxu0  ;;  %v707_v7 = vpop.f32.mrb[41].mxu1  ;;  %v1516_v11 = vpack.c.bf16 %v2160_v63, %v2160_v63 }
 0x14a   :  { %v776_v8 = vadd.f32 %v775_v0, %v774_v57  ;;  %v596_v9 = vpop.f32.mrb[42].mxu0  ;;  %v2165_v12 = vpop.f32.mrb[42].mxu1 }
 0x14b   :  { %v948_v13 = vsel %vm394_vm0, %v873_v1, 0.0  ;;  %1275 = vst.msk [vmem:[%s2417_s2 + $0x50] sm:$0xf] %vm1254_vm1, %v1488_v2  ;;  %v777_v16 = vsel %vm394_vm0, %v596_v9, 0.0  ;;  %v874_v18 = vmul.f32 %v596_v9, %v596_v9  ;;  %v1489_v19 = vpack.c.bf16 %v596_v9, %v596_v9  ;;  %v598_v20 = vpop.f32.mrb[43].mxu0  ;;  %v710_v21 = vpop.f32.mrb[43].mxu1 }
 0x14c   :  { %v949_v22 = vadd.f32 %v948_v13, %v947_v60  ;;  %v778_v24 = vadd.f32 %v777_v16, %v776_v8  ;;  %1303 = vst.msk [vmem:[%s2417_s2 + $0xc0] sm:$0xf] %vm1254_vm1, %v1516_v11  ;;  %v1517_v27 = vpack.c.bf16 %v2165_v12, %v2165_v12 }
 0x14d   :  { %v950_v26 = vsel %vm394_vm0, %v874_v18, 0.0  ;;  %1276 = vst.msk [vmem:[%s2417_s2 + $0x54] sm:$0xf] %vm1254_vm1, %v1489_v19 }
 0x14e   :  { %v951_v29 = vadd.f32 %v950_v26, %v949_v22  ;;  %1304 = vst.msk [vmem:[%s2417_s2 + $0xc4] sm:$0xf] %vm1254_vm1, %v1517_v27 }
 0x150   :  { %v601_v30 = vpop.f32.mrb[44].mxu0  ;;  %v2188_v31 = vpop.f32.mrb[44].mxu1 }
 0x151   :  { %v779_v33 = vsel %vm394_vm0, %v601_v30, 0.0  ;;  %v875_v35 = vmul.f32 %v601_v30, %v601_v30  ;;  %v1490_v36 = vpack.c.bf16 %v601_v30, %v601_v30  ;;  %v603_v37 = vpop.f32.mrb[45].mxu0  ;;  %v715_v39 = vpop.f32.mrb[45].mxu1  ;;  %v1518_v43 = vpack.c.bf16 %v2188_v31, %v2188_v31 }
 0x152   :  { %v780_v40 = vadd.f32 %v779_v33, %v778_v24  ;;  %v604_v42 = vpop.f32.mrb[46].mxu0  ;;  %v2193_v44 = vpop.f32.mrb[46].mxu1 }
 0x153   :  { %v952_v47 = vsel %vm394_vm0, %v875_v35, 0.0  ;;  %1277 = vst.msk [vmem:[%s2417_s2 + $0x58] sm:$0xf] %vm1254_vm1, %v1490_v36  ;;  %v781_v48 = vsel %vm394_vm0, %v604_v42, 0.0  ;;  %v876_v49 = vmul.f32 %v604_v42, %v604_v42  ;;  %v1491_v50 = vpack.c.bf16 %v604_v42, %v604_v42  ;;  %v606_v53 = vpop.f32.mrb[47].mxu0  ;;  %v718_v55 = vpop.f32.mrb[47].mxu1 }
 0x154   :  { %v953_v56 = vadd.f32 %v952_v47, %v951_v29  ;;  %v782_v57 = vadd.f32 %v781_v48, %v780_v40  ;;  %1305 = vst.msk [vmem:[%s2417_s2 + $0xc8] sm:$0xf] %vm1254_vm1, %v1518_v43  ;;  %v1519_v59 = vpack.c.bf16 %v2193_v44, %v2193_v44  ;;  %v881_v47 = vmul.f32 %v1880_v3, %v1880_v3 }
 0x155   :  { %v954_v58 = vsel %vm394_vm0, %v876_v49, 0.0  ;;  %1278 = vst.msk [vmem:[%s2417_s2 + $0x5c] sm:$0xf] %vm1254_vm1, %v1491_v50 }
 0x156   :  { %v955_v60 = vadd.f32 %v954_v58, %v953_v56  ;;  %1306 = vst.msk [vmem:[%s2417_s2 + $0xcc] sm:$0xf] %vm1254_vm1, %v1519_v59 }
 0x158   :  { %v609_v61 = vpop.f32.mrb[48].mxu0  ;;  %v2216_v0 = vpop.f32.mrb[48].mxu1 }
 0x159   :  { %v783_v1 = vsel %vm394_vm0, %v609_v61, 0.0  ;;  %v877_v2 = vmul.f32 %v609_v61, %v609_v61  ;;  %v1492_v6 = vpack.c.bf16 %v609_v61, %v609_v61  ;;  %v611_v7 = vpop.f32.mrb[49].mxu0  ;;  %v723_v8 = vpop.f32.mrb[49].mxu1  ;;  %v1520_v13 = vpack.c.bf16 %v2216_v0, %v2216_v0 }
 0x15a   :  { %v784_v9 = vadd.f32 %v783_v1, %v782_v57  ;;  %v612_v11 = vpop.f32.mrb[50].mxu0  ;;  %v2221_v16 = vpop.f32.mrb[50].mxu1 }
 0x15b   :  { %v956_v18 = vsel %vm394_vm0, %v877_v2, 0.0  ;;  %1279 = vst.msk [vmem:[%s2417_s2 + $0x60] sm:$0xf] %vm1254_vm1, %v1492_v6  ;;  %v785_v19 = vsel %vm394_vm0, %v612_v11, 0.0  ;;  %v878_v20 = vmul.f32 %v612_v11, %v612_v11  ;;  %v1493_v21 = vpack.c.bf16 %v612_v11, %v612_v11  ;;  %v614_v22 = vpop.f32.mrb[51].mxu0  ;;  %v726_v24 = vpop.f32.mrb[51].mxu1 }
 0x15c   :  { %v957_v26 = vadd.f32 %v956_v18, %v955_v60  ;;  %v786_v27 = vadd.f32 %v785_v19, %v784_v9  ;;  %1307 = vst.msk [vmem:[%s2417_s2 + $0xd0] sm:$0xf] %vm1254_vm1, %v1520_v13  ;;  %v1521_v30 = vpack.c.bf16 %v2221_v16, %v2221_v16  ;;  %v791_v2 = vsel %vm394_vm0, %v1880_v3, 0.0 }
 0x15d   :  { %v958_v29 = vsel %vm394_vm0, %v878_v20, 0.0  ;;  %1280 = vst.msk [vmem:[%s2417_s2 + $0x64] sm:$0xf] %vm1254_vm1, %v1493_v21  ;;  %v882_v6 = vmul.f32 %v1884_v10, %v1884_v10  ;;  %v964_v13 = vsel %vm394_vm0, %v881_v47, 0.0  ;;  %v793_v3 = vsel %vm394_vm0, %v1884_v10, 0.0 }
 0x15e   :  { %v959_v33 = vadd.f32 %v958_v29, %v957_v26  ;;  %1308 = vst.msk [vmem:[%s2417_s2 + $0xd4] sm:$0xf] %vm1254_vm1, %v1521_v30  ;;  %v883_v18 = vmul.f32 %v1908_v23, %v1908_v23  ;;  %v795_v22 = vsel %vm394_vm0, %v1908_v23, 0.0  ;;  %v884_v24 = vmul.f32 %v1913_v32, %v1913_v32 }
 0x15f   :  { %v966_v21 = vsel %vm394_vm0, %v882_v6, 0.0  ;;  %v797_v29 = vsel %vm394_vm0, %v1913_v32, 0.0  ;;  %v885_v30 = vmul.f32 %v1936_v45, %v1936_v45  ;;  %v799_v23 = vsel %vm394_vm0, %v1936_v45, 0.0 }
 0x160   :  { %v617_v35 = vpop.f32.mrb[52].mxu0  ;;  %v2244_v36 = vpop.f32.mrb[52].mxu1  ;;  %v801_v32 = vsel %vm394_vm0, %v1941_v54, 0.0  ;;  %v887_v47 = vmul.f32 %v1964_v4, %v1964_v4  ;;  %v803_v45 = vsel %vm394_vm0, %v1964_v4, 0.0  ;;  %v807_v4 = vsel %vm394_vm0, %v1992_v28, 0.0 }
 0x161   :  { %v787_v37 = vsel %vm394_vm0, %v617_v35, 0.0  ;;  %v879_v39 = vmul.f32 %v617_v35, %v617_v35  ;;  %v1494_v40 = vpack.c.bf16 %v617_v35, %v617_v35  ;;  %v619_v42 = vpop.f32.mrb[53].mxu0  ;;  %v731_v43 = vpop.f32.mrb[53].mxu1  ;;  %v1522_v50 = vpack.c.bf16 %v2244_v36, %v2244_v36 }
 0x162   :  { %v788_v48 = vadd.f32 %v787_v37, %v786_v27  ;;  %v620_v49 = vpop.f32.mrb[54].mxu0  ;;  %v2251_v53 = vpop.f32.mrb[54].mxu1  ;;  %v968_v27 = vsel %vm394_vm0, %v883_v18, 0.0  ;;  %v970_v37 = vsel %vm394_vm0, %v884_v24, 0.0  ;;  %v972_v43 = vsel %vm394_vm0, %v885_v30, 0.0 }
 0x163   :  { %v960_v55 = vsel %vm394_vm0, %v879_v39, 0.0  ;;  %1281 = vst.msk [vmem:[%s2417_s2 + $0x68] sm:$0xf] %vm1254_vm1, %v1494_v40  ;;  %v789_v56 = vsel %vm394_vm0, %v620_v49, 0.0  ;;  %v880_v57 = vmul.f32 %v620_v49, %v620_v49  ;;  %v1495_v58 = vpack.c.bf16 %v620_v49, %v620_v49  ;;  %v622_v59 = vpop.f32.mrb[55].mxu0  ;;  %v734_v60 = vpop.f32.mrb[55].mxu1 }
 0x164   :  { %v961_v61 = vadd.f32 %v960_v55, %v959_v33  ;;  %v790_v1 = vadd.f32 %v789_v56, %v788_v48  ;;  %1309 = vst.msk [vmem:[%s2417_s2 + $0xd8] sm:$0xf] %vm1254_vm1, %v1522_v50  ;;  %v1523_v8 = vpack.c.bf16 %v2251_v53, %v2251_v53  ;;  %v886_v39 = vmul.f32 %v1941_v54, %v1941_v54 }
 0x165   :  { %v962_v7 = vsel %vm394_vm0, %v880_v57, 0.0  ;;  %1282 = vst.msk [vmem:[%s2417_s2 + $0x6c] sm:$0xf] %vm1254_vm1, %v1495_v58  ;;  %v888_v55 = vmul.f32 %v1969_v14, %v1969_v14  ;;  %v976_v58 = vsel %vm394_vm0, %v887_v47, 0.0  ;;  %v805_v54 = vsel %vm394_vm0, %v1969_v14, 0.0 }
 0x166   :  { %v792_v9 = vadd.f32 %v791_v2, %v790_v1  ;;  %v963_v11 = vadd.f32 %v962_v7, %v961_v61  ;;  %1310 = vst.msk [vmem:[%s2417_s2 + $0xdc] sm:$0xf] %vm1254_vm1, %v1523_v8  ;;  %v974_v50 = vsel %vm394_vm0, %v886_v39, 0.0  ;;  %v889_v59 = vmul.f32 %v1992_v28, %v1992_v28 }
 0x167   :  { %v978_v1 = vsel %vm394_vm0, %v888_v55, 0.0  ;;  %v890_v2 = vmul.f32 %v1997_v38, %v1997_v38  ;;  %v809_v14 = vsel %vm394_vm0, %v1997_v38, 0.0  ;;  %v811_v28 = vsel %vm394_vm0, %v2020_v52, 0.0 }
 0x168   :  { %v794_v19 = vadd.f32 %v793_v3, %v792_v9  ;;  %v965_v20 = vadd.f32 %v964_v13, %v963_v11  ;;  %v980_v8 = vsel %vm394_vm0, %v889_v59, 0.0  ;;  %v891_v9 = vmul.f32 %v2020_v52, %v2020_v52 }
 0x169   :  { %v982_v3 = vsel %vm394_vm0, %v890_v2, 0.0  ;;  %v892_v18 = vmul.f32 %v2025_v62, %v2025_v62  ;;  %v813_v38 = vsel %vm394_vm0, %v2025_v62, 0.0  ;;  %v815_v52 = vsel %vm394_vm0, %v2048_v15, 0.0 }
 0x16a   :  { %v796_v26 = vadd.f32 %v795_v22, %v794_v19  ;;  %v967_v10 = vadd.f32 %v966_v21, %v965_v20  ;;  %v984_v21 = vsel %vm394_vm0, %v891_v9, 0.0  ;;  %v893_v22 = vmul.f32 %v2048_v15, %v2048_v15 }
 0x16b   :  { %v817_v62 = vsel %vm394_vm0, %v2053_v25, 0.0  ;;  %v819_v15 = vsel %vm394_vm0, %v2076_v41, 0.0  ;;  %v897_v47 = vmul.f32 %v2104_v5, %v2104_v5  ;;  %v902_v9 = vmul.f32 %v2165_v12, %v2165_v12 }
 0x16c   :  { %v798_v33 = vadd.f32 %v797_v29, %v796_v26  ;;  %v969_v35 = vadd.f32 %v968_v27, %v967_v10  ;;  %v986_v10 = vsel %vm394_vm0, %v892_v18, 0.0  ;;  %v894_v27 = vmul.f32 %v2053_v25, %v2053_v25 }
 0x16d   :  { %v821_v25 = vsel %vm394_vm0, %v2081_v51, 0.0 }
 0x16e   :  { %v800_v40 = vadd.f32 %v799_v23, %v798_v33  ;;  %v971_v42 = vadd.f32 %v970_v37, %v969_v35  ;;  %v988_v33 = vsel %vm394_vm0, %v893_v22, 0.0  ;;  %v895_v35 = vmul.f32 %v2076_v41, %v2076_v41 }
 0x16f   :  { %v990_v39 = vsel %vm394_vm0, %v894_v27, 0.0  ;;  %v823_v41 = vsel %vm394_vm0, %v2104_v5, 0.0  ;;  %v827_v5 = vsel %vm394_vm0, %v2132_v34, 0.0 }
 0x170   :  { %v802_v48 = vadd.f32 %v801_v32, %v800_v40  ;;  %v973_v49 = vadd.f32 %v972_v43, %v971_v42  ;;  %v896_v40 = vmul.f32 %v2081_v51, %v2081_v51  ;;  %v992_v32 = vsel %vm394_vm0, %v895_v35, 0.0 }
 0x171   :  { %v825_v51 = vsel %vm394_vm0, %v2109_v17, 0.0  ;;  %v841_v35 = vsel %vm394_vm0, %v2221_v16, 0.0 }
 0x172   :  { %v804_v56 = vadd.f32 %v803_v45, %v802_v48  ;;  %v975_v57 = vadd.f32 %v974_v50, %v973_v49  ;;  %v994_v50 = vsel %vm394_vm0, %v896_v40, 0.0  ;;  %v898_v45 = vmul.f32 %v2109_v17, %v2109_v17 }
 0x173   :  { %v829_v17 = vsel %vm394_vm0, %v2137_v46, 0.0  ;;  %v908_v40 = vmul.f32 %v2251_v53, %v2251_v53 }
 0x174   :  { %v977_v60 = vadd.f32 %v976_v58, %v975_v57  ;;  %v806_v61 = vadd.f32 %v805_v54, %v804_v56  ;;  %v996_v57 = vsel %vm394_vm0, %v897_v47, 0.0  ;;  %v899_v58 = vmul.f32 %v2132_v34, %v2132_v34 }
 0x175   :  { %v831_v34 = vsel %vm394_vm0, %v2160_v63, 0.0 }
 0x176   :  { %v808_v6 = vadd.f32 %v807_v4, %v806_v61  ;;  %v979_v7 = vadd.f32 %v978_v1, %v977_v60  ;;  %v998_v60 = vsel %vm394_vm0, %v898_v45, 0.0  ;;  %v900_v61 = vmul.f32 %v2137_v46, %v2137_v46 }
 0x177   :  { %v1000_v2 = vsel %vm394_vm0, %v899_v58, 0.0  ;;  %v833_v46 = vsel %vm394_vm0, %v2165_v12, 0.0  ;;  %v837_v12 = vsel %vm394_vm0, %v2193_v44, 0.0 }
 0x178   :  { %v810_v11 = vadd.f32 %v809_v14, %v808_v6  ;;  %v981_v13 = vadd.f32 %v980_v8, %v979_v7  ;;  %v901_v6 = vmul.f32 %v2160_v63, %v2160_v63  ;;  %v1002_v14 = vsel %vm394_vm0, %v900_v61, 0.0 }
 0x179   :  { %v835_v63 = vsel %vm394_vm0, %v2188_v31, 0.0 }
 0x17a   :  { %v812_v19 = vadd.f32 %v811_v28, %v810_v11  ;;  %v983_v20 = vadd.f32 %v982_v3, %v981_v13  ;;  %v1004_v3 = vsel %vm394_vm0, %v901_v6, 0.0  ;;  %v903_v28 = vmul.f32 %v2188_v31, %v2188_v31 }
 0x17b   :  { %v839_v31 = vsel %vm394_vm0, %v2216_v0, 0.0 }
 0x17c   :  { %v814_v24 = vadd.f32 %v813_v38, %v812_v19  ;;  %v985_v26 = vadd.f32 %v984_v21, %v983_v20  ;;  %v1006_v20 = vsel %vm394_vm0, %v902_v9, 0.0  ;;  %v904_v21 = vmul.f32 %v2193_v44, %v2193_v44 }
 0x17e   :  { %v816_v29 = vadd.f32 %v815_v52, %v814_v24  ;;  %v987_v30 = vadd.f32 %v986_v10, %v985_v26  ;;  %v1008_v24 = vsel %vm394_vm0, %v903_v28, 0.0  ;;  %v905_v26 = vmul.f32 %v2216_v0, %v2216_v0 }
 0x17f   :  { %v1010_v27 = vsel %vm394_vm0, %v904_v21, 0.0 }
 0x180   :  { %v818_v37 = vadd.f32 %v817_v62, %v816_v29  ;;  %v989_v23 = vadd.f32 %v988_v33, %v987_v30  ;;  %v906_v29 = vmul.f32 %v2221_v16, %v2221_v16  ;;  %v907_v30 = vmul.f32 %v2244_v36, %v2244_v36 }
 0x181   :  { %v1012_v44 = vsel %vm394_vm0, %v905_v26, 0.0  ;;  %v1018_v16 = vsel %vm394_vm0, %v908_v40, 0.0 }
 0x182   :  { %v820_v42 = vadd.f32 %v819_v15, %v818_v37  ;;  %v991_v43 = vadd.f32 %v990_v39, %v989_v23  ;;  %v843_v37 = vsel %vm394_vm0, %v2244_v36, 0.0  ;;  %v1014_v0 = vsel %vm394_vm0, %v906_v29, 0.0 }
 0x183   :  { %v1016_v15 = vsel %vm394_vm0, %v907_v30, 0.0 }
 0x184   :  { %v993_v48 = vadd.f32 %v992_v32, %v991_v43  ;;  %v822_v49 = vadd.f32 %v821_v25, %v820_v42  ;;  %v845_v32 = vsel %vm394_vm0, %v2251_v53, 0.0 }
 0x186   :  { %v995_v55 = vadd.f32 %v994_v50, %v993_v48  ;;  %v824_v56 = vadd.f32 %v823_v41, %v822_v49 }
 0x188   :  { %v997_v54 = vadd.f32 %v996_v57, %v995_v55  ;;  %v826_v59 = vadd.f32 %v825_v51, %v824_v56 }
 0x18a   :  { %v999_v1 = vadd.f32 %v998_v60, %v997_v54  ;;  %v828_v4 = vadd.f32 %v827_v5, %v826_v59 }
 0x18c   :  { %v1001_v7 = vadd.f32 %v1000_v2, %v999_v1  ;;  %v830_v8 = vadd.f32 %v829_v17, %v828_v4 }
 0x18e   :  { %v1003_v11 = vadd.f32 %v1002_v14, %v1001_v7  ;;  %v832_v13 = vadd.f32 %v831_v34, %v830_v8 }
 0x190   :  { %v1005_v18 = vadd.f32 %v1004_v3, %v1003_v11  ;;  %v834_v19 = vadd.f32 %v833_v46, %v832_v13 }
 0x192   :  { %v1007_v38 = vadd.f32 %v1006_v20, %v1005_v18  ;;  %v836_v22 = vadd.f32 %v835_v63, %v834_v19 }
 0x194   :  { %v1009_v10 = vadd.f32 %v1008_v24, %v1007_v38  ;;  %v838_v52 = vadd.f32 %v837_v12, %v836_v22 }
 0x196   :  { %v1011_v33 = vadd.f32 %v1010_v27, %v1009_v10  ;;  %v840_v62 = vadd.f32 %v839_v31, %v838_v52 }
 0x198   :  { %v1013_v23 = vadd.f32 %v1012_v44, %v1011_v33  ;;  %v842_v39 = vadd.f32 %v841_v35, %v840_v62 }
 0x19a   :  { %v1015_v42 = vadd.f32 %v1014_v0, %v1013_v23  ;;  %v844_v43 = vadd.f32 %v843_v37, %v842_v39 }
 0x19c   :  { %v1017_v25 = vadd.f32 %v1016_v15, %v1015_v42  ;;  %v846_v47 = vadd.f32 %v845_v32, %v844_v43 }
 0x19e   :  { %v847_v48 = vrot.slane %v846_v47, 4  ;;  %v1019_v36 = vadd.f32 %v1018_v16, %v1017_v25 }
 0x1a0   :  { %v848_v49 = vadd.f32 %v847_v48, %v846_v47  ;;  %v1020_v50 = vrot.slane %v1019_v36, 4 }
 0x1a2   :  { %v849_v41 = vrot.slane %v848_v49, 2  ;;  %v1021_v45 = vadd.f32 %v1020_v50, %v1019_v36 }
 0x1a4   :  { %v850_v55 = vadd.f32 %v849_v41, %v848_v49  ;;  %v1022_v56 = vrot.slane %v1021_v45, 2 }
 0x1a6   :  { %v851_v57 = vrot.slane %v850_v55, 1  ;;  %v1023_v51 = vadd.f32 %v1022_v56, %v1021_v45 }
 0x1a8   :  { %v1024_v58 = vrot.slane %v1023_v51, 1  ;;  %v852_v54 = vadd.f32 %v851_v57, %v850_v55 }
 0x1aa   :  { %v1025_v59 = vadd.f32 %v1024_v58, %v1023_v51 }
 0x1ac   :  { %v1027_v53 = vsel %vm1026_vm2, %v852_v54, %v1025_v59 }
 0x1ad   :  { %1029 = vst.msk [vmem:[%s2418_s3] sm:$0x3] %vm1028_vm3, %v1027_v53 }

// kernel: forward.11
= control target key start
LH: loop header
LB: loop body
LE: loop exit
PB: predicated region body
PF: predicated region fallthrough
CT: control target
= control target key end

     0   :  { %v145_v29 = vlaneseq  ;;  %v1137_v33 = vmov 1966171168   ;;  %v1138_v40 = vmov 0.0   ;;  %vm1139_vm0 = vmmov 0   ;;  %s1416_s0 = inlined_call_operand.vmem [shape: bf16[2,784], index: 0, kind: input, shape index: {}]   ;;  %s1417_s1 = inlined_call_operand.vmem [shape: bf16[784,128], index: 1, kind: input, shape index: {}]   ;;  %s1418_s2 = inlined_call_operand.vmem [shape: f32[1,128], index: 2, kind: input, shape index: {}]   ;;  %s1419_s3 = inlined_call_operand.vmem [shape: f32[1,128], index: 3, kind: input, shape index: {}]   ;;  %s1420_s4 = inlined_call_operand.vmem [shape: f32[1,128], index: 4, kind: input, shape index: {}]   ;;  %s1421_s5 = inlined_call_operand.vmem [shape: bf16[128,128], index: 5, kind: input, shape index: {}]   ;;  %s1422_s6 = inlined_call_operand.vmem [shape: f32[1,128], index: 6, kind: input, shape index: {}]   ;;  %s1423_s7 = inlined_call_operand.vmem [shape: f32[1,128], index: 7, kind: input, shape index: {}]   ;;  %s1424_s8 = inlined_call_operand.vmem [shape: f32[1,128], index: 8, kind: input, shape index: {}]   ;;  %s1425_s9 = inlined_call_operand.hbm [shape: f32[2,128], index: 9, kind: output, shape index: {}]  }
   0x1   :  { %v1045_v0 = vld [vmem:[%s1417_s1 + $0x40] sm:$0xff]   ;;  %v1049_v4 = vld [vmem:[%s1417_s1 + $0x48] sm:$0xff]   ;;  %v1053_v8 = vld [vmem:[%s1417_s1 + $0x50] sm:$0xff]   ;;  %v143_v34 = vunpack.c.l.s4 %v1137_v33  ;;  %vm489_vm1 = vcmask 130048  }
   0x2   :  { %v1046_v1 = vld [vmem:[%s1417_s1] sm:$0xff]   ;;  %938 = vmatprep.subr.bf16.mxu0 %v1045_v0  ;;  %v1050_v5 = vld [vmem:[%s1417_s1 + $0x8] sm:$0xff]   ;;  %v1054_v9 = vld [vmem:[%s1417_s1 + $0x10] sm:$0xff]   ;;  %v146_v35 = vshrl.u32 %v145_v29, 7 }
   0x3   :  { %v1047_v2 = vld [vmem:[%s1417_s1 + $0xc0] sm:$0xff]   ;;  %939 = vmatpush3.bf16.msra.mxu0 %v1046_v1  ;;  %v1051_v6 = vld [vmem:[%s1417_s1 + $0xc8] sm:$0xff]   ;;  %v1055_v10 = vld [vmem:[%s1417_s1 + $0xd0] sm:$0xff]   ;;  %v144_v39 = vunpack.c.0.s8 %v143_v34 }
   0x4   :  { %v1048_v3 = vld [vmem:[%s1417_s1 + $0x80] sm:$0xff]   ;;  %960 = vmatprep.subr.bf16.mxu1 %v1047_v2  ;;  %940 = vmatprep.subr.bf16.mxu0 %v1049_v4  ;;  %v1052_v7 = vld [vmem:[%s1417_s1 + $0x88] sm:$0xff]   ;;  %v1056_v11 = vld [vmem:[%s1417_s1 + $0x90] sm:$0xff]  }
   0x5   :  { %961 = vmatpush3.bf16.msra.mxu1 %v1048_v3  ;;  %v1057_v12 = vld [vmem:[%s1417_s1 + $0x58] sm:$0xff]   ;;  %v1061_v16 = vld [vmem:[%s1417_s1 + $0x60] sm:$0xff]   ;;  %v1065_v20 = vld [vmem:[%s1417_s1 + $0x68] sm:$0xff]   ;;  %v147_v41 = vsub.s32 %v144_v39, %v146_v35 }
   0x6   :  { %962 = vmatprep.subr.bf16.mxu1 %v1051_v6  ;;  %v1058_v13 = vld [vmem:[%s1417_s1 + $0x18] sm:$0xff]   ;;  %v1062_v17 = vld [vmem:[%s1417_s1 + $0x20] sm:$0xff]   ;;  %v1066_v21 = vld [vmem:[%s1417_s1 + $0x28] sm:$0xff]  }
   0x7   :  { %941 = vmatpush3.bf16.msra.mxu0 %v1050_v5  ;;  %v1059_v14 = vld [vmem:[%s1417_s1 + $0xd8] sm:$0xff]   ;;  %v1063_v18 = vld [vmem:[%s1417_s1 + $0xe0] sm:$0xff]   ;;  %v1067_v22 = vld [vmem:[%s1417_s1 + $0xe8] sm:$0xff]  }
   0x8   :  { %942 = vmatprep.subr.bf16.mxu0 %v1053_v8  ;;  %v1060_v15 = vld [vmem:[%s1417_s1 + $0x98] sm:$0xff]   ;;  %v1064_v19 = vld [vmem:[%s1417_s1 + $0xa0] sm:$0xff]   ;;  %v1068_v23 = vld [vmem:[%s1417_s1 + $0xa8] sm:$0xff]  }
   0x9   :  { %963 = vmatpush3.bf16.msra.mxu1 %v1052_v7  ;;  %v1069_v24 = vld [vmem:[%s1417_s1 + $0x70] sm:$0xff]   ;;  %v1073_v28 = vld [vmem:[%s1417_s1 + $0x78] sm:$0xff]   ;;  %v34_v32 = vld [vmem:[%s1416_s0] sm:$0x7f] }
   0xa   :  { %964 = vmatprep.subr.bf16.mxu1 %v1055_v10  ;;  %v1070_v25 = vld [vmem:[%s1417_s1 + $0x30] sm:$0xff]   ;;  %v1074_v30 = vld [vmem:[%s1417_s1 + $0x38] sm:$0xff]   ;;  %v1078_v37 = vld [vmem:[%s1417_s1 + $0x140] sm:$0xff]   ;;  %v141_v38 = vcombine.high %v34_v32, %v34_v32  ;;  %v148_v42 = vrot.slane %v34_v32, %v147_v41 }
   0xb   :  { %943 = vmatpush3.bf16.msra.mxu0 %v1054_v9  ;;  %v1071_v26 = vld [vmem:[%s1417_s1 + $0xf0] sm:$0xff]   ;;  %v1075_v31 = vld [vmem:[%s1417_s1 + $0xf8] sm:$0xff]   ;;  %v1079_v48 = vld [vmem:[%s1417_s1 + $0x100] sm:$0xff]  }
   0xc   :  { %944 = vmatprep.subr.bf16.mxu0 %v1057_v12  ;;  %v1072_v27 = vld [vmem:[%s1417_s1 + $0xb0] sm:$0xff]   ;;  %v1077_v36 = vld [vmem:[%s1417_s1 + $0xb8] sm:$0xff]   ;;  %v155_v43 = vrot.slane %v141_v38, %v147_v41  ;;  %v156_v44 = vcombine.high %v148_v42, %v148_v42  ;;  %v164_v45 = vrot.slane %v148_v42, %v147_v41  ;;  %v1080_v50 = vld [vmem:[%s1417_s1 + $0x148] sm:$0xff]  }
   0xd   :  { %965 = vmatpush3.bf16.msra.mxu1 %v1056_v11  ;;  %v1081_v53 = vld [vmem:[%s1417_s1 + $0x108] sm:$0xff]   ;;  %v1082_v54 = vld [vmem:[%s1417_s1 + $0x150] sm:$0xff]   ;;  %v1084_v57 = vld [vmem:[%s1417_s1 + $0x158] sm:$0xff]  }
   0xe   :  { %966 = vmatprep.subr.bf16.mxu1 %v1059_v14  ;;  %v157_v46 = vcombine.high %v155_v43, %v155_v43  ;;  %v178_v47 = vrot.slane %v156_v44, %v147_v41  ;;  %v186_v49 = vcombine.high %v164_v45, %v164_v45  ;;  %v171_v55 = vrot.slane %v155_v43, %v147_v41  ;;  %v1083_v56 = vld [vmem:[%s1417_s1 + $0x110] sm:$0xff]   ;;  %v1094_v58 = vld [vmem:[%s1417_s1 + $0x180] sm:$0xff]   ;;  %v1085_v60 = vld [vmem:[%s1417_s1 + $0x118] sm:$0xff]  }
   0xf   :  { %945 = vmatpush3.bf16.msra.mxu0 %v1058_v13  ;;  %v1086_v61 = vld [vmem:[%s1417_s1 + $0x160] sm:$0xff]  }
  0x10   :  { %946 = vmatprep.subr.bf16.mxu0 %v1061_v16  ;;  %525 = vmatprep.mubr.bf16.mxu0 %v178_v47  ;;  %v188_v51 = vcombine.high %v178_v47, %v178_v47  ;;  %v185_v52 = vrot.slane %v157_v46, %v147_v41  ;;  %v187_v59 = vcombine.high %v171_v55, %v171_v55 }
  0x11   :  { %967 = vmatpush3.bf16.msra.mxu1 %v1060_v15 }
  0x12   :  { %968 = vmatprep.subr.bf16.mxu1 %v1063_v18  ;;  %565 = vmatprep.mubr.bf16.mxu1 %v188_v51 }
  0x13   :  { %947 = vmatpush3.bf16.msra.mxu0 %v1062_v17 }
  0x14   :  { %948 = vmatprep.subr.bf16.mxu0 %v1065_v20 }
  0x15   :  { %969 = vmatpush3.bf16.msra.mxu1 %v1064_v19 }
  0x16   :  { %970 = vmatprep.subr.bf16.mxu1 %v1067_v22 }
  0x17   :  { %949 = vmatpush3.bf16.msra.mxu0 %v1066_v21 }
  0x18   :  { %950 = vmatprep.subr.bf16.mxu0 %v1069_v24 }
  0x19   :  { %971 = vmatpush3.bf16.msra.mxu1 %v1068_v23 }
  0x1a   :  { %972 = vmatprep.subr.bf16.mxu1 %v1071_v26 }
  0x1b   :  { %951 = vmatpush3.bf16.msra.mxu0 %v1070_v25 }
  0x1c   :  { %952 = vmatprep.subr.bf16.mxu0 %v1073_v28 }
  0x1d   :  { %973 = vmatpush3.bf16.msra.mxu1 %v1072_v27 }
  0x1e   :  { %974 = vmatprep.subr.bf16.mxu1 %v1075_v31 }
  0x1f   :  { %953 = vmatpush3.bf16.msra.mxu0 %v1074_v30 }
  0x20   :  { %982 = vmatprep.subr.bf16.mxu0 %v1078_v37 }
  0x21   :  { %975 = vmatpush3.bf16.msra.mxu1 %v1077_v36 }
  0x22   :  { %1015 = vmatprep.subr.bf16.mxu1 %v1138_v40  ;;  %526 = vmatmul.mubr.bf16.vlgmr.msra.gmra.mrb[0].mxu0 %v164_v45 }
  0x23   :  { %983 = vmatpush3.bf16.msra.mxu0 %v1079_v48  ;;  %605 = vmatprep.mubr.bf16.mxu0 %v185_v52 }
  0x24   :  { %566 = vmatmul.mubr.bf16.vlgmr.msra.gmra.mrb[0].mxu1 %v186_v49  ;;  %984 = vmatprep.subr.bf16.mxu0 %v1080_v50 }
  0x25   :  { %1017 = vmatprep.mubr.msk.bf16.mxu1 %vm1139_vm0, %v1138_v40  ;;  %1016 = vmatpush3.bf16.msra.mxu1 %v1094_v58 }
  0x26   :  { %1021 = vmatprep.subr.bf16.mxu1 %v1138_v40 }
  0x27   :  { %985 = vmatpush3.bf16.msra.mxu0 %v1081_v53 }
  0x28   :  { %986 = vmatprep.subr.bf16.mxu0 %v1082_v54 }
  0x2b   :  { %987 = vmatpush3.bf16.msra.mxu0 %v1083_v56 }
  0x2c   :  { %988 = vmatprep.subr.bf16.mxu0 %v1084_v57  ;;  %1018 = vmatmul.mubr.msk.bf16.vlgmr.msra.gmra.mrb[4].mxu1 %vm489_vm1, %v187_v59 }
  0x2d   :  { %14 = vsyncpa [#allocation3], 0  ;;  %1037 = vmatprep.mubr.msk.bf16.mxu1 %vm1139_vm0, %v1138_v40  ;;  %v1087_v62 = vld [vmem:[%s1417_s1 + $0x120] sm:$0xff]   ;;  %v1088_v63 = vld [vmem:[%s1417_s1 + $0x168] sm:$0xff]   ;;  %vm653_vm2 = vcmask 1041408  }
  0x2e   :  { %v1089_v0 = vld [vmem:[%s1417_s1 + $0x128] sm:$0xff]   ;;  %v1090_v1 = vld [vmem:[%s1417_s1 + $0x170] sm:$0xff]   ;;  %v1092_v3 = vld [vmem:[%s1417_s1 + $0x178] sm:$0xff]  }
  0x2f   :  { %989 = vmatpush3.bf16.msra.mxu0 %v1085_v60  ;;  %v1091_v2 = vld [vmem:[%s1417_s1 + $0x130] sm:$0xff]   ;;  %v1093_v4 = vld [vmem:[%s1417_s1 + $0x138] sm:$0xff]   ;;  %v1095_v5 = vld [vmem:[%s1421_s5] sm:$0xff]  }
  0x30   :  { %990 = vmatprep.subr.bf16.mxu0 %v1086_v61  ;;  %1022 = vmatpush3.bf16.msra.mxu1 %v1095_v5  ;;  %v1096_v6 = vld [vmem:[%s1421_s5 + $0x8] sm:$0xff]   ;;  %v1097_v7 = vld [vmem:[%s1421_s5 + $0x10] sm:$0xff]   ;;  %v1098_v8 = vld [vmem:[%s1421_s5 + $0x18] sm:$0xff]  }
  0x31   :  { %1023 = vmatprep.subr.bf16.mxu1 %v1138_v40  ;;  %v1099_v9 = vld [vmem:[%s1421_s5 + $0x20] sm:$0xff]   ;;  %v1100_v10 = vld [vmem:[%s1421_s5 + $0x28] sm:$0xff]   ;;  %v1101_v11 = vld [vmem:[%s1421_s5 + $0x30] sm:$0xff]  }
  0x32   :  { %v1102_v12 = vld [vmem:[%s1421_s5 + $0x38] sm:$0xff]   ;;  %v874_v14 = vld [vmem:[%s1418_s2] ss:$0 sm:$0xff] }
  0x33   :  { %991 = vmatpush3.bf16.msra.mxu0 %v1087_v62  ;;  %v925_v57 = vld [vmem:[%s1419_s3] ss:$0 sm:$0xff] }
  0x34   :  { %992 = vmatprep.subr.bf16.mxu0 %v1088_v63  ;;  %1024 = vmatpush3.bf16.msra.mxu1 %v1096_v6  ;;  %v926_v60 = vld [vmem:[%s1420_s4] ss:$0 sm:$0xff] }
  0x35   :  { %1025 = vmatprep.subr.bf16.mxu1 %v1138_v40 }
  0x37   :  { %993 = vmatpush3.bf16.msra.mxu0 %v1089_v0 }
  0x38   :  { %994 = vmatprep.subr.bf16.mxu0 %v1090_v1  ;;  %1026 = vmatpush3.bf16.msra.mxu1 %v1097_v7  ;;  %v927_v1 = vld [vmem:[%s1422_s6] ss:$0 sm:$0xff] }
  0x39   :  { %1027 = vmatprep.subr.bf16.mxu1 %v1138_v40 }
  0x3b   :  { %995 = vmatpush3.bf16.msra.mxu0 %v1091_v2 }
  0x3c   :  { %996 = vmatprep.subr.bf16.mxu0 %v1092_v3  ;;  %1028 = vmatpush3.bf16.msra.mxu1 %v1098_v8 }
  0x3d   :  { %1029 = vmatprep.subr.bf16.mxu1 %v1138_v40 }
  0x3f   :  { %997 = vmatpush3.bf16.msra.mxu0 %v1093_v4 }
  0x40   :  { %1030 = vmatpush3.bf16.msra.mxu1 %v1099_v9 }
  0x41   :  { %1031 = vmatprep.subr.bf16.mxu1 %v1138_v40 }
  0x42   :  { %606 = vmatmul.mubr.bf16.vlgmr.msra.gmra.mrb[4].mxu0 %v171_v55 }
  0x44   :  { %1032 = vmatpush3.bf16.msra.mxu1 %v1100_v10 }
  0x45   :  { %1033 = vmatprep.subr.bf16.mxu1 %v1138_v40 }
  0x48   :  { %1034 = vmatpush3.bf16.msra.mxu1 %v1101_v11 }
  0x49   :  { %1035 = vmatprep.subr.bf16.mxu1 %v1138_v40 }
  0x4c   :  { %1036 = vmatpush3.bf16.msra.mxu1 %v1102_v12 }
  0xf5   :  { %v954_v13 = vpop.f32.mrb[0].mxu0 }
  0xf6   :  { %v955_v15 = vpop.f32.mrb[1].mxu0 }
  0xf7   :  { %v956_v16 = vadd.f32 %v955_v15, %v954_v13  ;;  %v957_v17 = vpop.f32.mrb[2].mxu0  ;;  %v976_v18 = vpop.f32.mrb[0].mxu1 }
  0xf8   :  { %v958_v19 = vpop.f32.mrb[3].mxu0  ;;  %v977_v20 = vpop.f32.mrb[1].mxu1 }
  0xf9   :  { %v528_v21 = vadd.f32 %v956_v16, %v874_v14  ;;  %v978_v22 = vadd.f32 %v977_v20, %v976_v18  ;;  %v979_v23 = vpop.f32.mrb[2].mxu1 }
  0xfa   :  { %v980_v24 = vpop.f32.mrb[3].mxu1 }
  0xfb   :  { %v568_v25 = vadd.f32 %v978_v22, %v528_v21 }
  0xff   :  { %v647_v26 = vpop.f32.mrb[4].mxu1 }
 0x100   :  { %v1019_v27 = vpop.f32.mrb[5].mxu1 }
 0x101   :  { %v650_v28 = vpop.f32.mrb[6].mxu1  ;;  %v843_v27 = vand.u32 127, %v145_v29 }
 0x102   :  { %v1020_v30 = vpop.f32.mrb[7].mxu1 }
 0x103   :  { %vm844_vm3 = vcmp.lt.s32.totalorder %v843_v27, 10 }
 0x115   :  { %v998_v31 = vpop.f32.mrb[4].mxu0 }
 0x116   :  { %v999_v32 = vpop.f32.mrb[5].mxu0 }
 0x117   :  { %v1000_v33 = vadd.f32 %v999_v32, %v998_v31  ;;  %v1001_v34 = vpop.f32.mrb[6].mxu0  ;;  %v937_v31 = vld [vmem:[%s1424_s8] ss:$0 sm:$0xff] }
 0x118   :  { %v1002_v35 = vpop.f32.mrb[7].mxu0 }
 0x119   :  { %v608_v36 = vadd.f32 %v1000_v33, %v568_v25 }
 0x11b   :  { %v648_v37 = vadd.f32 %v647_v26, %v608_v36  ;;  %v936_v26 = vld [vmem:[%s1423_s7] ss:$0 sm:$0xff]  ;;  %s1140_s7 = smov [#allocation2]  }
 0x11c   :  { %s866_s8 = sshll.u32 %s1140_s7, 4  ;;  %s867_s8 = int_to_ptr.vmem [resolvable:$true] %s866_s8 }
 0x11d   :  { %v654_v38 = vsel %vm653_vm2, %v648_v37, 0.0  ;;  %s1113_s23 = scalar_lea.vmem %s867_s8, 32  ;;  %p1118_p1 = scmp.lt.s32.totalorder %s867_s8, %s867_s8 }
 0x11e   :  { %v655_v39 = vrot.slane %v654_v38, 4  ;;  %p1114_p0 = scmp.ne.s32.totalorder %s867_s8, %s1113_s23  ;;  %p1119_p2 = scmp.lt.s32.totalorder %s1113_s23, %s1113_s23 }
 0x120   :  { %v656_v40 = vadd.f32 %v655_v39, %v654_v38  ;;  %p1120_p3 = por %p1119_p2, %p1118_p1 }
 0x122   :  { %v657_v41 = vrot.slane %v656_v40, 2  ;;  %p1121_p4 = pnand %p1120_p3, %p1114_p0 }
 0x124   :  { %v658_v42 = vadd.f32 %v657_v41, %v656_v40 }
 0x126   :  { %v659_v43 = vrot.slane %v658_v42, 1 }
 0x128   :  { %v660_v44 = vadd.f32 %v659_v43, %v658_v42 }
 0x12a   :  { %v662_v45 = vmul.f32 0.5, %v660_v44 }
 0x12c   :  { %v663_v46 = vsub.f32 %v648_v37, %v662_v45 }
 0x12e   :  { %v664_v47 = vmul.f32 %v663_v46, %v663_v46  ;;  %v680_v58 = vmul.f32 %v925_v57, %v663_v46 }
 0x130   :  { %v665_v48 = vsel %vm653_vm2, %v664_v47, 0.0 }
 0x131   :  { %v666_v49 = vrot.slane %v665_v48, 4 }
 0x133   :  { %v667_v50 = vadd.f32 %v666_v49, %v665_v48 }
 0x135   :  { %v668_v51 = vrot.slane %v667_v50, 2 }
 0x137   :  { %v669_v52 = vadd.f32 %v668_v51, %v667_v50 }
 0x139   :  { %v670_v53 = vrot.slane %v669_v52, 1 }
 0x13b   :  { %v671_v54 = vadd.f32 %v670_v53, %v669_v52 }
 0x13d   :  { %v672_v55 = vmul.f32 0.5, %v671_v54 }
 0x13f   :  { %v681_v56 = vadd.f32 1e-05, %v672_v55 }
 0x141   :  { %1103 = vrsqrt.f32 %v681_v56 }
 0x14b   :  { %v1104_v59 = vpop.eup %1103 }
 0x14c   :  { %v683_v61 = vmul.f32 %v1104_v59, %v680_v58 }
 0x14e   :  { %v691_v62 = vadd.f32 %v926_v60, %v683_v61 }
 0x150   :  { %1105 = vtanh.f32 %v691_v62 }
 0x15a   :  { %v1106_v63 = vpop.eup %1105 }
 0x15b   :  { %v693_v0 = vpack.c.bf16 %v1106_v63, %v1106_v63 }
 0x15d   :  { %1038 = vmatmul.mubr.bf16.vlgmr.msra.gmra.mrb[8].mxu1 %v693_v0 }
 0x230   :  { %v799_v2 = vpop.f32.mrb[8].mxu1 }
 0x231   :  { %v800_v3 = vadd.f32 %v927_v1, %v799_v2  ;;  %v1039_v4 = vpop.f32.mrb[9].mxu1 }
 0x232   :  { %v802_v5 = vpop.f32.mrb[10].mxu1 }
 0x233   :  { %v805_v6 = vsel %vm653_vm2, %v800_v3, 0.0  ;;  %v1040_v7 = vpop.f32.mrb[11].mxu1 }
 0x234   :  { %v806_v8 = vrot.slane %v805_v6, 4 }
 0x236   :  { %v807_v9 = vadd.f32 %v806_v8, %v805_v6 }
 0x238   :  { %v808_v10 = vrot.slane %v807_v9, 2 }
 0x23a   :  { %v809_v11 = vadd.f32 %v808_v10, %v807_v9 }
 0x23c   :  { %v810_v12 = vrot.slane %v809_v11, 1 }
 0x23e   :  { %v811_v13 = vadd.f32 %v810_v12, %v809_v11 }
 0x240   :  { %v812_v14 = vmul.f32 0.5, %v811_v13 }
 0x242   :  { %v813_v15 = vsub.f32 %v800_v3, %v812_v14 }
 0x244   :  { %v814_v16 = vmul.f32 %v813_v15, %v813_v15  ;;  %v830_v28 = vmul.f32 %v936_v26, %v813_v15 }
 0x246   :  { %v815_v17 = vsel %vm653_vm2, %v814_v16, 0.0 }
 0x247   :  { %v816_v18 = vrot.slane %v815_v17, 4 }
 0x249   :  { %v817_v19 = vadd.f32 %v816_v18, %v815_v17 }
 0x24b   :  { %v818_v20 = vrot.slane %v817_v19, 2 }
 0x24d   :  { %v819_v21 = vadd.f32 %v818_v20, %v817_v19 }
 0x24f   :  { %v820_v22 = vrot.slane %v819_v21, 1 }
 0x251   :  { %v821_v23 = vadd.f32 %v820_v22, %v819_v21 }
 0x253   :  { %v822_v24 = vmul.f32 0.5, %v821_v23 }
 0x255   :  { %v831_v25 = vadd.f32 1e-05, %v822_v24 }
 0x257   :  { %1107 = vrsqrt.f32 %v831_v25 }
 0x261   :  { %v1108_v30 = vpop.eup %1107 }
 0x262   :  { %v833_v32 = vmul.f32 %v1108_v30, %v830_v28 }
 0x264   :  { %v841_v33 = vadd.f32 %v937_v31, %v833_v32 }
 0x266   :  { %v845_v34 = vsel %vm844_vm3, %v841_v33, -1e+30 }
 0x267   :  { %v846_v35 = vsel %vm653_vm2, %v845_v34, -inf }
 0x268   :  { %847 = vmax.xlane.f32.xlu0 %v846_v35 }
 0x2f5   :  { %v848_v36 = vpop.xlane.xlu0 %847 }
 0x2f6   :  { %v849_v37 = vsub.f32 %v845_v34, %v848_v36 }
 0x2f8   :  { %v850_v38 = vmul.f32 1.442695, %v849_v37 }
 0x2fa   :  { %1109 = vpow2.f32 %v850_v38 }
 0x304   :  { %v1110_v39 = vpop.eup %1109 }
 0x305   :  { %v852_v29 = vsel %vm653_vm2, %v1110_v39, 0.0 }
 0x306   :  { %853 = vadd.xlane.f32.xlu0 %v852_v29 }
 0x393   :  { %v854_v40 = vpop.xlane.xlu0 %853 }
 0x394   :  { %1111 = vlog2.f32 %v854_v40 }
 0x39e   :  { %v1112_v41 = vpop.eup %1111 }
 0x39f   :  { %v856_v42 = vmul.f32 0.6931472, %v1112_v41 }
 0x3a1   :  { %v857_v43 = vadd.f32 %v856_v42, %v848_v36 }
 0x3a3   :  { %v858_v44 = vsub.f32 %v845_v34, %v857_v43 }
 0x3a5   :  { %859 = vst [vmem:[#allocation2] sm:$0x3] %v858_v44 }
 0x3a6   :  { %1124 = shalt.err (!%p1121_p4)
}
 0x3a7   :  { %s1125_s26 = scalar_lea.hbm %s1425_s9, 32 }
 0x3a8   :  { %p1126_p5 = scmp.ne.s32.totalorder %s1425_s9, %s1125_s26  ;;  %p1129_p6 = scmp.lt.u32.totalorder %s1125_s26, %s1425_s9 }
 0x3aa   :  { %p1131_p7 = pnand %p1129_p6, %p1126_p5 }
 0x3ac   :  { %1134 = shalt.err (!%p1131_p7)
}
 0x3ad   :  { %869 = dma.vmem_to_hbm [thread:$0]  %s867_s8, 32, %s1425_s9, [#allocation3]  }
 0x3ae   :  { %1135 = dma.done.wait [#allocation3], 32  }
 0x3af   :  { %1136 = vsyncadd [#allocation3], 4294967264 }
 0x3b0   :  { %873 = vsyncpa [#allocation3], 1 }

</bundles_post_ra>
